<compile_context>
chip_gen: v7x
topology: tpu7x:2x2x1
jax: 0.10.0
libtpu: 0.0.40
codegen_flags: <defaults>
</compile_context>

<pallas_src>
import functools

import jax
import jax.numpy as jnp
from jax import lax
from jax.experimental import pallas as pl
from jax.experimental.pallas import tpu as pltpu

EPS = 1e-5
NEG_SLOPE = 0.01
MM_DTYPE = jnp.bfloat16   # MXU operand dtype (f32 accumulation). Use jnp.float32 on v5e.
HALO = 128                # lane-aligned halo around the flattened image (must be >= W+1)


# ------------------------------ fused kernel --------------------------------

def _dense_up_kernel(x_ref, masks_ref, w0_ref, g0_ref, be0_ref,
                     w1_ref, b1_ref, w2a_ref, w2b_ref, b2_ref,
                     w3a_ref, w3b_ref, w3c_ref, g3_ref, be3_ref,
                     o_ref, r1buf, out1buf,
                     *, aim, m, offsets, mm_dtype):
    inv_m = 1.0 / m

    def mm(a, b):
        # MXU matmul, bf16 operands / f32 accumulation.
        return jnp.dot(a.astype(mm_dtype), b.astype(mm_dtype),
                       preferred_element_type=jnp.float32)

    def bn_lrelu(y, g_ref, be_ref):
        # One-pass batch stats (biased variance) over the lane axis (XLU),
        # then a single hoisted per-channel FMA + LeakyReLU on the big tensor.
        s = jnp.sum(y, axis=-1, keepdims=True)               # (aim, 1)
        ss = jnp.sum(y * y, axis=-1, keepdims=True)          # (aim, 1)
        mean = s * inv_m
        var = jnp.maximum(ss * inv_m - mean * mean, 0.0)
        scale = g_ref[...] * lax.rsqrt(var + EPS)             # (aim, 1)
        shift = be_ref[...] - mean * scale
        z = y * scale + shift
        return jnp.where(z >= 0.0, z, NEG_SLOPE * z)

    def conv3x3(w_taps_ref, src_buf):
        # 3x3 conv (pad=1) as 9 shifted matmuls over the zero-haloed scratch.
        acc = jnp.zeros((aim, m), jnp.float32)
        for t, off in enumerate(offsets):
            sl = src_buf[:, HALO + off:HALO + off + m]        # shifted activation
            if off != 0:                                      # center tap needs no mask
                sl = sl * masks_ref[t:t + 1, :]               # zero out-of-image taps
            acc = acc + mm(w_taps_ref[t], sl)
        return acc

    # ---- conv0 (1x1; bias omitted: cancelled by batch-stat BN) + BN0 + LReLU
    x = x_ref[...]                                            # (Cin, M) f32
    r1 = bn_lrelu(mm(w0_ref[...], x), g0_ref, be0_ref)        # residual_1, (aim, M)

    # stage r1 into a zero-haloed VMEM scratch so taps are static lane slices
    r1buf[...] = jnp.zeros_like(r1buf)
    r1buf[:, HALO:HALO + m] = r1

    # ---- conv1 (3x3 on r1) -> out_1 (= residual_2)
    out1 = conv3x3(w1_ref, r1buf) + b1_ref[...]               # (aim, M)
    out1buf[...] = jnp.zeros_like(out1buf)
    out1buf[:, HALO:HALO + m] = out1

    # ---- conv2 (3x3 on concat[out_1, r1]) via split-K (no materialized concat)
    out = conv3x3(w2a_ref, out1buf) + conv3x3(w2b_ref, r1buf) + b2_ref[...]

    # ---- conv3 (1x1 on concat[out, r1, out_1]) split-K; bias cancelled by BN3
    y3 = mm(w3a_ref[...], out) + mm(w3b_ref[...], r1) + mm(w3c_ref[...], out1)

    # ---- BN3 + LReLU -> lane-dense (aim, M) output
    o_ref[...] = bn_lrelu(y3, g3_ref, be3_ref)


# --------------------------------- wrapper -----------------------------------

def _make_shift_masks(n, h, w):
    """(9, n*h*w) f32: tap t=(dh+1)*3+(dw+1) is 1 where (y+dh, x+dw) is inside
    the image -- implements the zero padding of the 3x3 convs."""
    hh = jnp.arange(h)
    ww = jnp.arange(w)
    rows = []
    for dh in (-1, 0, 1):
        for dw in (-1, 0, 1):
            mh = (hh + dh >= 0) & (hh + dh < h)
            mw = (ww + dw >= 0) & (ww + dw < w)
            m2d = (mh[:, None] & mw[None, :]).astype(jnp.float32)   # (h, w)
            rows.append(jnp.tile(m2d.reshape(-1), n))               # (n*h*w,)
    return jnp.stack(rows)                                          # (9, M)


def _taps(w_oihw):
    """OIHW (O, I, 3, 3) -> (9, O, I) with tap index = kh*3 + kw."""
    o, i, kh, kw = w_oihw.shape
    return jnp.transpose(w_oihw, (2, 3, 0, 1)).reshape(kh * kw, o, i)


def dense_up_block_forward(x_nchw, p):
    n, cin, h, w = x_nchw.shape
    aim = cin // 2
    m = n * h * w
    assert HALO >= w + 1, "halo must cover one image row + one pixel"
    col = lambda v: v.reshape(-1, 1)                # per-channel params as (aim, 1)

    x2d = jnp.transpose(x_nchw, (1, 0, 2, 3)).reshape(cin, m)   # (Cin, M) lane-dense
    masks = _make_shift_masks(n, h, w)                          # (9, M)

    w0 = p["w0"][:, :, 0, 0]                                    # (aim, Cin)
    w1 = _taps(p["w1"])                                         # (9, aim, aim)
    w2 = _taps(p["w2"])                                         # (9, aim, 2*aim)
    w2a, w2b = w2[:, :, :aim], w2[:, :, aim:]                   # out1-half, r1-half
    w3 = p["w3"][:, :, 0, 0]                                    # (aim, 3*aim)
    w3a, w3b, w3c = w3[:, :aim], w3[:, aim:2 * aim], w3[:, 2 * aim:]

    offsets = tuple(dh * w + dw for dh in (-1, 0, 1) for dw in (-1, 0, 1))
    kernel = functools.partial(_dense_up_kernel, aim=aim, m=m,
                               offsets=offsets, mm_dtype=MM_DTYPE)

    # TODO(synk): at production shapes (large N*H*W / channels) this single
    # full-array block must become a grid over M (lane tiles multiple of 128)
    # with per-tile halo rows and a two-pass BatchNorm (cross-tile sum/sumsq
    # reduction) to preserve batch-statistic semantics; size tiles for the
    # 64 MiB VMEM of v7x and mark the M axis "parallel" for its 2 TensorCores.
    vmem = pl.BlockSpec(memory_space=pltpu.MemorySpace.VMEM)
    out2d = pl.pallas_call(
        kernel,
        out_shape=jax.ShapeDtypeStruct((aim, m), jnp.float32),
        in_specs=[vmem] * 15,
        out_specs=vmem,
        scratch_shapes=[pltpu.VMEM((aim, m + 2 * HALO), jnp.float32),   # r1 + halo
                        pltpu.VMEM((aim, m + 2 * HALO), jnp.float32)],  # out1 + halo
    )(x2d, masks, w0, col(p["g0"]), col(p["be0"]),
      w1, col(p["b1"]), w2a, w2b, col(p["b2"]),
      w3a, w3b, w3c, col(p["g3"]), col(p["be3"]))

    return jnp.transpose(out2d.reshape(aim, n, h, w), (1, 0, 2, 3))    # back to NCHW


# ---------------------------- pure-JAX reference -----------------------------

def _conv2d_nchw_ref(x, w, b, pad):
    out = lax.conv_general_dilated(
        x, w, window_strides=(1, 1),
        padding=[(pad, pad), (pad, pad)],
        dimension_numbers=("NCHW", "OIHW", "NCHW"))
    return out + b[None, :, None, None]


def _bn_lrelu_ref(x, gamma, beta):
    mean = jnp.mean(x, axis=(0, 2, 3), keepdims=True)
    var = jnp.mean(jnp.square(x - mean), axis=(0, 2, 3), keepdims=True)
    xhat = (x - mean) / jnp.sqrt(var + EPS)
    z = xhat * gamma[None, :, None, None] + beta[None, :, None, None]
    return jnp.where(z >= 0, z, NEG_SLOPE * z)


def dense_up_block_ref(x, p):
    r1 = _bn_lrelu_ref(_conv2d_nchw_ref(x, p["w0"], p["b0"], 0), p["g0"], p["be0"])
    out1 = _conv2d_nchw_ref(r1, p["w1"], p["b1"], 1)
    cat1 = jnp.concatenate([out1, r1], axis=1)
    out = _conv2d_nchw_ref(cat1, p["w2"], p["b2"], 1)
    cat2 = jnp.concatenate([out, r1, out1], axis=1)
    return _bn_lrelu_ref(_conv2d_nchw_ref(cat2, p["w3"], p["b3"], 0), p["g3"], p["be3"])


# --------------------------------- main --------------------------------------

def init_params(key, in_channel):
    aim = in_channel // 2
    ks = jax.random.split(key, 12)
    nrm = lambda k, s, sc=0.2: sc * jax.random.normal(k, s, jnp.float32)
    return {
        "w0": nrm(ks[0], (aim, in_channel, 1, 1)),
        "b0": nrm(ks[1], (aim,), 0.05),
        "g0": 1.0 + nrm(ks[2], (aim,), 0.05),
        "be0": nrm(ks[3], (aim,), 0.05),
        "w1": nrm(ks[4], (aim, aim, 3, 3)),
        "b1": nrm(ks[5], (aim,), 0.05),
        "w2": nrm(ks[6], (aim, 2 * aim, 3, 3)),
        "b2": nrm(ks[7], (aim,), 0.05),
        "w3": nrm(ks[8], (aim, 3 * aim, 1, 1)),
        "b3": nrm(ks[9], (aim,), 0.05),
        "g3": 1.0 + nrm(ks[10], (aim,), 0.05),
        "be3": nrm(ks[11], (aim,), 0.05),
    }
    # NOTE: dropout_rate / out_planes are unused by DenseUpBlock.forward.


if __name__ == "__main__":
    key = jax.random.PRNGKey(0)
    kx, kp = jax.random.split(key)

    N, C, H, W = 2, 4, 16, 16           # in_channel=4 -> aim_planes=2 output channels
    x = jax.random.normal(kx, (N, C, H, W), jnp.float32)
    params = init_params(kp, C)

    y = jax.block_until_ready(jax.jit(dense_up_block_forward)(x, params))
    y_ref = jax.block_until_ready(dense_up_block_ref(x, params))

    assert y.shape == (N, C // 2, H, W), y.shape
    # tolerance accounts for bf16 MXU operands (f32 accumulation); f32 mode is ~1e-3
    tol = 5e-2 if MM_DTYPE == jnp.bfloat16 else 1e-3
    max_err = float(jnp.max(jnp.abs(y - y_ref)))
    assert jnp.allclose(y, y_ref, rtol=tol, atol=tol), max_err

    print("KERNEL_OK")
</pallas_src>

<mosaic_0001>
module attributes {stable_mosaic.version = 11 : i64} {
  func.func @_dense_up_kernel(%arg0: memref<4x512xf32, #tpu.memory_space<vmem>>, %arg1: memref<9x512xf32, #tpu.memory_space<vmem>>, %arg2: memref<2x4xf32, #tpu.memory_space<vmem>>, %arg3: memref<2x1xf32, #tpu.memory_space<vmem>>, %arg4: memref<2x1xf32, #tpu.memory_space<vmem>>, %arg5: memref<9x2x2xf32, #tpu.memory_space<vmem>>, %arg6: memref<2x1xf32, #tpu.memory_space<vmem>>, %arg7: memref<9x2x2xf32, #tpu.memory_space<vmem>>, %arg8: memref<9x2x2xf32, #tpu.memory_space<vmem>>, %arg9: memref<2x1xf32, #tpu.memory_space<vmem>>, %arg10: memref<2x2xf32, #tpu.memory_space<vmem>>, %arg11: memref<2x2xf32, #tpu.memory_space<vmem>>, %arg12: memref<2x2xf32, #tpu.memory_space<vmem>>, %arg13: memref<2x1xf32, #tpu.memory_space<vmem>>, %arg14: memref<2x1xf32, #tpu.memory_space<vmem>>, %arg15: memref<2x512xf32, #tpu.memory_space<vmem>>, %arg16: memref<2x768xf32, #tpu.memory_space<vmem>>, %arg17: memref<2x768xf32, #tpu.memory_space<vmem>>) attributes {dimension_semantics = [], scalar_prefetch = 0 : i64, scratch_operands = 2 : i64, tpu.core_type = #tpu.core_type<tc>} {
    %c0 = arith.constant 0 : index
    %c0_0 = arith.constant 0 : index
    %0 = vector.load %arg0[%c0, %c0_0] : memref<4x512xf32, #tpu.memory_space<vmem>>, vector<4x512xf32>
    %c0_1 = arith.constant 0 : index
    %c0_2 = arith.constant 0 : index
    %1 = vector.load %arg2[%c0_1, %c0_2] : memref<2x4xf32, #tpu.memory_space<vmem>>, vector<2x4xf32>
    %2 = arith.truncf %1 : vector<2x4xf32> to vector<2x4xbf16>
    %3 = arith.truncf %0 : vector<4x512xf32> to vector<4x512xbf16>
    %cst = arith.constant dense<0.000000e+00> : vector<2x512xf32>
    %4 = tpu.matmul %2, %3, %cst {dimension_numbers = #tpu.dot_dimension_numbers<[1], [0], [0], [1], [0, 0, 1, 1], [], []>} : vector<2x4xbf16>, vector<4x512xbf16>, vector<2x512xf32> -> vector<2x512xf32>
    %cst_3 = arith.constant dense<0.000000e+00> : vector<2xf32>
    %5 = vector.multi_reduction <add>, %4, %cst_3 [1] : vector<2x512xf32> to vector<2xf32>
    %6 = vector.shape_cast %5 : vector<2xf32> to vector<2x1xf32>
    %7 = arith.mulf %4, %4 : vector<2x512xf32>
    %cst_4 = arith.constant dense<0.000000e+00> : vector<2xf32>
    %8 = vector.multi_reduction <add>, %7, %cst_4 [1] : vector<2x512xf32> to vector<2xf32>
    %9 = vector.shape_cast %8 : vector<2xf32> to vector<2x1xf32>
    %cst_5 = arith.constant 0.001953125 : f32
    %10 = vector.broadcast %cst_5 : f32 to vector<2x1xf32>
    %11 = arith.mulf %6, %10 : vector<2x1xf32>
    %cst_6 = arith.constant 0.001953125 : f32
    %12 = vector.broadcast %cst_6 : f32 to vector<2x1xf32>
    %13 = arith.mulf %9, %12 : vector<2x1xf32>
    %14 = arith.mulf %11, %11 : vector<2x1xf32>
    %15 = arith.subf %13, %14 : vector<2x1xf32>
    %cst_7 = arith.constant 0.000000e+00 : f32
    %16 = vector.broadcast %cst_7 : f32 to vector<2x1xf32>
    %17 = arith.maximumf %15, %16 : vector<2x1xf32>
    %c0_8 = arith.constant 0 : index
    %c0_9 = arith.constant 0 : index
    %18 = vector.load %arg3[%c0_8, %c0_9] : memref<2x1xf32, #tpu.memory_space<vmem>>, vector<2x1xf32>
    %cst_10 = arith.constant 9.99999974E-6 : f32
    %19 = vector.broadcast %cst_10 : f32 to vector<2x1xf32>
    %20 = arith.addf %17, %19 : vector<2x1xf32>
    %21 = math.rsqrt %20 : vector<2x1xf32>
    %22 = arith.mulf %18, %21 : vector<2x1xf32>
    %c0_11 = arith.constant 0 : index
    %c0_12 = arith.constant 0 : index
    %23 = vector.load %arg4[%c0_11, %c0_12] : memref<2x1xf32, #tpu.memory_space<vmem>>, vector<2x1xf32>
    %24 = arith.mulf %11, %22 : vector<2x1xf32>
    %25 = arith.subf %23, %24 : vector<2x1xf32>
    %26 = vector.broadcast %22 : vector<2x1xf32> to vector<2x512xf32>
    %27 = arith.mulf %4, %26 : vector<2x512xf32>
    %28 = vector.broadcast %25 : vector<2x1xf32> to vector<2x512xf32>
    %29 = arith.addf %27, %28 : vector<2x512xf32>
    %cst_13 = arith.constant 0.000000e+00 : f32
    %30 = vector.broadcast %cst_13 : f32 to vector<2x512xf32>
    %31 = arith.cmpf oge, %29, %30 : vector<2x512xf32>
    %cst_14 = arith.constant 0.00999999977 : f32
    %32 = vector.broadcast %cst_14 : f32 to vector<2x512xf32>
    %33 = arith.mulf %32, %29 : vector<2x512xf32>
    %34 = arith.select %31, %29, %33 : vector<2x512xi1>, vector<2x512xf32>
    %cst_15 = arith.constant 0.000000e+00 : f32
    %35 = vector.broadcast %cst_15 : f32 to vector<2x768xf32>
    %c0_16 = arith.constant 0 : index
    %c0_17 = arith.constant 0 : index
    %36 = vector.load %arg16[%c0_16, %c0_17] : memref<2x768xf32, #tpu.memory_space<vmem>>, vector<2x768xf32>
    tpu.vector_store %arg16[%c0_16, %c0_17], %35 {strides = array<i32>} : memref<2x768xf32, #tpu.memory_space<vmem>>, vector<2x768xf32>,
    %c0_18 = arith.constant 0 : index
    %c128 = arith.constant 128 : index
    %37 = vector.load %arg16[%c0_18, %c128] : memref<2x768xf32, #tpu.memory_space<vmem>>, vector<2x512xf32>
    tpu.vector_store %arg16[%c0_18, %c128], %34 {strides = array<i32>} : memref<2x768xf32, #tpu.memory_space<vmem>>, vector<2x512xf32>,
    %cst_19 = arith.constant 0.000000e+00 : f32
    %38 = vector.broadcast %cst_19 : f32 to vector<2x512xf32>
    %c0_20 = arith.constant 0 : index
    %c111 = arith.constant 111 : index
    %39 = vector.load %arg16[%c0_20, %c111] : memref<2x768xf32, #tpu.memory_space<vmem>>, vector<2x512xf32>
    %c0_21 = arith.constant 0 : index
    %c0_22 = arith.constant 0 : index
    %40 = vector.load %arg1[%c0_21, %c0_22] : memref<9x512xf32, #tpu.memory_space<vmem>>, vector<1x512xf32>
    %41 = vector.broadcast %40 : vector<1x512xf32> to vector<2x512xf32>
    %42 = arith.mulf %39, %41 : vector<2x512xf32>
    %c0_23 = arith.constant 0 : index
    %c0_24 = arith.constant 0 : index
    %c0_25 = arith.constant 0 : index
    %43 = vector.load %arg5[%c0_23, %c0_24, %c0_25] : memref<9x2x2xf32, #tpu.memory_space<vmem>>, vector<1x2x2xf32>
    %44 = vector.shape_cast %43 : vector<1x2x2xf32> to vector<2x2xf32>
    %45 = arith.truncf %44 : vector<2x2xf32> to vector<2x2xbf16>
    %46 = arith.truncf %42 : vector<2x512xf32> to vector<2x512xbf16>
    %cst_26 = arith.constant dense<0.000000e+00> : vector<2x512xf32>
    %47 = tpu.matmul %45, %46, %cst_26 {dimension_numbers = #tpu.dot_dimension_numbers<[1], [0], [0], [1], [0, 0, 1, 1], [], []>} : vector<2x2xbf16>, vector<2x512xbf16>, vector<2x512xf32> -> vector<2x512xf32>
    %48 = arith.addf %38, %47 : vector<2x512xf32>
    %c0_27 = arith.constant 0 : index
    %c112 = arith.constant 112 : index
    %49 = vector.load %arg16[%c0_27, %c112] : memref<2x768xf32, #tpu.memory_space<vmem>>, vector<2x512xf32>
    %c1 = arith.constant 1 : index
    %c0_28 = arith.constant 0 : index
    %50 = vector.load %arg1[%c1, %c0_28] : memref<9x512xf32, #tpu.memory_space<vmem>>, vector<1x512xf32>
    %51 = vector.broadcast %50 : vector<1x512xf32> to vector<2x512xf32>
    %52 = arith.mulf %49, %51 : vector<2x512xf32>
    %c1_29 = arith.constant 1 : index
    %c0_30 = arith.constant 0 : index
    %c0_31 = arith.constant 0 : index
    %53 = vector.load %arg5[%c1_29, %c0_30, %c0_31] : memref<9x2x2xf32, #tpu.memory_space<vmem>>, vector<1x2x2xf32>
    %54 = vector.shape_cast %53 : vector<1x2x2xf32> to vector<2x2xf32>
    %55 = arith.truncf %54 : vector<2x2xf32> to vector<2x2xbf16>
    %56 = arith.truncf %52 : vector<2x512xf32> to vector<2x512xbf16>
    %cst_32 = arith.constant dense<0.000000e+00> : vector<2x512xf32>
    %57 = tpu.matmul %55, %56, %cst_32 {dimension_numbers = #tpu.dot_dimension_numbers<[1], [0], [0], [1], [0, 0, 1, 1], [], []>} : vector<2x2xbf16>, vector<2x512xbf16>, vector<2x512xf32> -> vector<2x512xf32>
    %58 = arith.addf %48, %57 : vector<2x512xf32>
    %c0_33 = arith.constant 0 : index
    %c113 = arith.constant 113 : index
    %59 = vector.load %arg16[%c0_33, %c113] : memref<2x768xf32, #tpu.memory_space<vmem>>, vector<2x512xf32>
    %c2 = arith.constant 2 : index
    %c0_34 = arith.constant 0 : index
    %60 = vector.load %arg1[%c2, %c0_34] : memref<9x512xf32, #tpu.memory_space<vmem>>, vector<1x512xf32>
    %61 = vector.broadcast %60 : vector<1x512xf32> to vector<2x512xf32>
    %62 = arith.mulf %59, %61 : vector<2x512xf32>
    %c2_35 = arith.constant 2 : index
    %c0_36 = arith.constant 0 : index
    %c0_37 = arith.constant 0 : index
    %63 = vector.load %arg5[%c2_35, %c0_36, %c0_37] : memref<9x2x2xf32, #tpu.memory_space<vmem>>, vector<1x2x2xf32>
    %64 = vector.shape_cast %63 : vector<1x2x2xf32> to vector<2x2xf32>
    %65 = arith.truncf %64 : vector<2x2xf32> to vector<2x2xbf16>
    %66 = arith.truncf %62 : vector<2x512xf32> to vector<2x512xbf16>
    %cst_38 = arith.constant dense<0.000000e+00> : vector<2x512xf32>
    %67 = tpu.matmul %65, %66, %cst_38 {dimension_numbers = #tpu.dot_dimension_numbers<[1], [0], [0], [1], [0, 0, 1, 1], [], []>} : vector<2x2xbf16>, vector<2x512xbf16>, vector<2x512xf32> -> vector<2x512xf32>
    %68 = arith.addf %58, %67 : vector<2x512xf32>
    %c0_39 = arith.constant 0 : index
    %c127 = arith.constant 127 : index
    %69 = vector.load %arg16[%c0_39, %c127] : memref<2x768xf32, #tpu.memory_space<vmem>>, vector<2x512xf32>
    %c3 = arith.constant 3 : index
    %c0_40 = arith.constant 0 : index
    %70 = vector.load %arg1[%c3, %c0_40] : memref<9x512xf32, #tpu.memory_space<vmem>>, vector<1x512xf32>
    %71 = vector.broadcast %70 : vector<1x512xf32> to vector<2x512xf32>
    %72 = arith.mulf %69, %71 : vector<2x512xf32>
    %c3_41 = arith.constant 3 : index
    %c0_42 = arith.constant 0 : index
    %c0_43 = arith.constant 0 : index
    %73 = vector.load %arg5[%c3_41, %c0_42, %c0_43] : memref<9x2x2xf32, #tpu.memory_space<vmem>>, vector<1x2x2xf32>
    %74 = vector.shape_cast %73 : vector<1x2x2xf32> to vector<2x2xf32>
    %75 = arith.truncf %74 : vector<2x2xf32> to vector<2x2xbf16>
    %76 = arith.truncf %72 : vector<2x512xf32> to vector<2x512xbf16>
    %cst_44 = arith.constant dense<0.000000e+00> : vector<2x512xf32>
    %77 = tpu.matmul %75, %76, %cst_44 {dimension_numbers = #tpu.dot_dimension_numbers<[1], [0], [0], [1], [0, 0, 1, 1], [], []>} : vector<2x2xbf16>, vector<2x512xbf16>, vector<2x512xf32> -> vector<2x512xf32>
    %78 = arith.addf %68, %77 : vector<2x512xf32>
    %c0_45 = arith.constant 0 : index
    %c128_46 = arith.constant 128 : index
    %79 = vector.load %arg16[%c0_45, %c128_46] : memref<2x768xf32, #tpu.memory_space<vmem>>, vector<2x512xf32>
    %c4 = arith.constant 4 : index
    %c0_47 = arith.constant 0 : index
    %c0_48 = arith.constant 0 : index
    %80 = vector.load %arg5[%c4, %c0_47, %c0_48] : memref<9x2x2xf32, #tpu.memory_space<vmem>>, vector<1x2x2xf32>
    %81 = vector.shape_cast %80 : vector<1x2x2xf32> to vector<2x2xf32>
    %82 = arith.truncf %81 : vector<2x2xf32> to vector<2x2xbf16>
    %83 = arith.truncf %79 : vector<2x512xf32> to vector<2x512xbf16>
    %cst_49 = arith.constant dense<0.000000e+00> : vector<2x512xf32>
    %84 = tpu.matmul %82, %83, %cst_49 {dimension_numbers = #tpu.dot_dimension_numbers<[1], [0], [0], [1], [0, 0, 1, 1], [], []>} : vector<2x2xbf16>, vector<2x512xbf16>, vector<2x512xf32> -> vector<2x512xf32>
    %85 = arith.addf %78, %84 : vector<2x512xf32>
    %c0_50 = arith.constant 0 : index
    %c129 = arith.constant 129 : index
    %86 = vector.load %arg16[%c0_50, %c129] : memref<2x768xf32, #tpu.memory_space<vmem>>, vector<2x512xf32>
    %c5 = arith.constant 5 : index
    %c0_51 = arith.constant 0 : index
    %87 = vector.load %arg1[%c5, %c0_51] : memref<9x512xf32, #tpu.memory_space<vmem>>, vector<1x512xf32>
    %88 = vector.broadcast %87 : vector<1x512xf32> to vector<2x512xf32>
    %89 = arith.mulf %86, %88 : vector<2x512xf32>
    %c5_52 = arith.constant 5 : index
    %c0_53 = arith.constant 0 : index
    %c0_54 = arith.constant 0 : index
    %90 = vector.load %arg5[%c5_52, %c0_53, %c0_54] : memref<9x2x2xf32, #tpu.memory_space<vmem>>, vector<1x2x2xf32>
    %91 = vector.shape_cast %90 : vector<1x2x2xf32> to vector<2x2xf32>
    %92 = arith.truncf %91 : vector<2x2xf32> to vector<2x2xbf16>
    %93 = arith.truncf %89 : vector<2x512xf32> to vector<2x512xbf16>
    %cst_55 = arith.constant dense<0.000000e+00> : vector<2x512xf32>
    %94 = tpu.matmul %92, %93, %cst_55 {dimension_numbers = #tpu.dot_dimension_numbers<[1], [0], [0], [1], [0, 0, 1, 1], [], []>} : vector<2x2xbf16>, vector<2x512xbf16>, vector<2x512xf32> -> vector<2x512xf32>
    %95 = arith.addf %85, %94 : vector<2x512xf32>
    %c0_56 = arith.constant 0 : index
    %c143 = arith.constant 143 : index
    %96 = vector.load %arg16[%c0_56, %c143] : memref<2x768xf32, #tpu.memory_space<vmem>>, vector<2x512xf32>
    %c6 = arith.constant 6 : index
    %c0_57 = arith.constant 0 : index
    %97 = vector.load %arg1[%c6, %c0_57] : memref<9x512xf32, #tpu.memory_space<vmem>>, vector<1x512xf32>
    %98 = vector.broadcast %97 : vector<1x512xf32> to vector<2x512xf32>
    %99 = arith.mulf %96, %98 : vector<2x512xf32>
    %c6_58 = arith.constant 6 : index
    %c0_59 = arith.constant 0 : index
    %c0_60 = arith.constant 0 : index
    %100 = vector.load %arg5[%c6_58, %c0_59, %c0_60] : memref<9x2x2xf32, #tpu.memory_space<vmem>>, vector<1x2x2xf32>
    %101 = vector.shape_cast %100 : vector<1x2x2xf32> to vector<2x2xf32>
    %102 = arith.truncf %101 : vector<2x2xf32> to vector<2x2xbf16>
    %103 = arith.truncf %99 : vector<2x512xf32> to vector<2x512xbf16>
    %cst_61 = arith.constant dense<0.000000e+00> : vector<2x512xf32>
    %104 = tpu.matmul %102, %103, %cst_61 {dimension_numbers = #tpu.dot_dimension_numbers<[1], [0], [0], [1], [0, 0, 1, 1], [], []>} : vector<2x2xbf16>, vector<2x512xbf16>, vector<2x512xf32> -> vector<2x512xf32>
    %105 = arith.addf %95, %104 : vector<2x512xf32>
    %c0_62 = arith.constant 0 : index
    %c144 = arith.constant 144 : index
    %106 = vector.load %arg16[%c0_62, %c144] : memref<2x768xf32, #tpu.memory_space<vmem>>, vector<2x512xf32>
    %c7 = arith.constant 7 : index
    %c0_63 = arith.constant 0 : index
    %107 = vector.load %arg1[%c7, %c0_63] : memref<9x512xf32, #tpu.memory_space<vmem>>, vector<1x512xf32>
    %108 = vector.broadcast %107 : vector<1x512xf32> to vector<2x512xf32>
    %109 = arith.mulf %106, %108 : vector<2x512xf32>
    %c7_64 = arith.constant 7 : index
    %c0_65 = arith.constant 0 : index
    %c0_66 = arith.constant 0 : index
    %110 = vector.load %arg5[%c7_64, %c0_65, %c0_66] : memref<9x2x2xf32, #tpu.memory_space<vmem>>, vector<1x2x2xf32>
    %111 = vector.shape_cast %110 : vector<1x2x2xf32> to vector<2x2xf32>
    %112 = arith.truncf %111 : vector<2x2xf32> to vector<2x2xbf16>
    %113 = arith.truncf %109 : vector<2x512xf32> to vector<2x512xbf16>
    %cst_67 = arith.constant dense<0.000000e+00> : vector<2x512xf32>
    %114 = tpu.matmul %112, %113, %cst_67 {dimension_numbers = #tpu.dot_dimension_numbers<[1], [0], [0], [1], [0, 0, 1, 1], [], []>} : vector<2x2xbf16>, vector<2x512xbf16>, vector<2x512xf32> -> vector<2x512xf32>
    %115 = arith.addf %105, %114 : vector<2x512xf32>
    %c0_68 = arith.constant 0 : index
    %c145 = arith.constant 145 : index
    %116 = vector.load %arg16[%c0_68, %c145] : memref<2x768xf32, #tpu.memory_space<vmem>>, vector<2x512xf32>
    %c8 = arith.constant 8 : index
    %c0_69 = arith.constant 0 : index
    %117 = vector.load %arg1[%c8, %c0_69] : memref<9x512xf32, #tpu.memory_space<vmem>>, vector<1x512xf32>
    %118 = vector.broadcast %117 : vector<1x512xf32> to vector<2x512xf32>
    %119 = arith.mulf %116, %118 : vector<2x512xf32>
    %c8_70 = arith.constant 8 : index
    %c0_71 = arith.constant 0 : index
    %c0_72 = arith.constant 0 : index
    %120 = vector.load %arg5[%c8_70, %c0_71, %c0_72] : memref<9x2x2xf32, #tpu.memory_space<vmem>>, vector<1x2x2xf32>
    %121 = vector.shape_cast %120 : vector<1x2x2xf32> to vector<2x2xf32>
    %122 = arith.truncf %121 : vector<2x2xf32> to vector<2x2xbf16>
    %123 = arith.truncf %119 : vector<2x512xf32> to vector<2x512xbf16>
    %cst_73 = arith.constant dense<0.000000e+00> : vector<2x512xf32>
    %124 = tpu.matmul %122, %123, %cst_73 {dimension_numbers = #tpu.dot_dimension_numbers<[1], [0], [0], [1], [0, 0, 1, 1], [], []>} : vector<2x2xbf16>, vector<2x512xbf16>, vector<2x512xf32> -> vector<2x512xf32>
    %125 = arith.addf %115, %124 : vector<2x512xf32>
    %c0_74 = arith.constant 0 : index
    %c0_75 = arith.constant 0 : index
    %126 = vector.load %arg6[%c0_74, %c0_75] : memref<2x1xf32, #tpu.memory_space<vmem>>, vector<2x1xf32>
    %127 = vector.broadcast %126 : vector<2x1xf32> to vector<2x512xf32>
    %128 = arith.addf %125, %127 : vector<2x512xf32>
    %cst_76 = arith.constant 0.000000e+00 : f32
    %129 = vector.broadcast %cst_76 : f32 to vector<2x768xf32>
    %c0_77 = arith.constant 0 : index
    %c0_78 = arith.constant 0 : index
    %130 = vector.load %arg17[%c0_77, %c0_78] : memref<2x768xf32, #tpu.memory_space<vmem>>, vector<2x768xf32>
    tpu.vector_store %arg17[%c0_77, %c0_78], %129 {strides = array<i32>} : memref<2x768xf32, #tpu.memory_space<vmem>>, vector<2x768xf32>,
    %c0_79 = arith.constant 0 : index
    %c128_80 = arith.constant 128 : index
    %131 = vector.load %arg17[%c0_79, %c128_80] : memref<2x768xf32, #tpu.memory_space<vmem>>, vector<2x512xf32>
    tpu.vector_store %arg17[%c0_79, %c128_80], %128 {strides = array<i32>} : memref<2x768xf32, #tpu.memory_space<vmem>>, vector<2x512xf32>,
    %cst_81 = arith.constant 0.000000e+00 : f32
    %132 = vector.broadcast %cst_81 : f32 to vector<2x512xf32>
    %c0_82 = arith.constant 0 : index
    %c111_83 = arith.constant 111 : index
    %133 = vector.load %arg17[%c0_82, %c111_83] : memref<2x768xf32, #tpu.memory_space<vmem>>, vector<2x512xf32>
    %c0_84 = arith.constant 0 : index
    %c0_85 = arith.constant 0 : index
    %134 = vector.load %arg1[%c0_84, %c0_85] : memref<9x512xf32, #tpu.memory_space<vmem>>, vector<1x512xf32>
    %135 = vector.broadcast %134 : vector<1x512xf32> to vector<2x512xf32>
    %136 = arith.mulf %133, %135 : vector<2x512xf32>
    %c0_86 = arith.constant 0 : index
    %c0_87 = arith.constant 0 : index
    %c0_88 = arith.constant 0 : index
    %137 = vector.load %arg7[%c0_86, %c0_87, %c0_88] : memref<9x2x2xf32, #tpu.memory_space<vmem>>, vector<1x2x2xf32>
    %138 = vector.shape_cast %137 : vector<1x2x2xf32> to vector<2x2xf32>
    %139 = arith.truncf %138 : vector<2x2xf32> to vector<2x2xbf16>
    %140 = arith.truncf %136 : vector<2x512xf32> to vector<2x512xbf16>
    %cst_89 = arith.constant dense<0.000000e+00> : vector<2x512xf32>
    %141 = tpu.matmul %139, %140, %cst_89 {dimension_numbers = #tpu.dot_dimension_numbers<[1], [0], [0], [1], [0, 0, 1, 1], [], []>} : vector<2x2xbf16>, vector<2x512xbf16>, vector<2x512xf32> -> vector<2x512xf32>
    %142 = arith.addf %132, %141 : vector<2x512xf32>
    %c0_90 = arith.constant 0 : index
    %c112_91 = arith.constant 112 : index
    %143 = vector.load %arg17[%c0_90, %c112_91] : memref<2x768xf32, #tpu.memory_space<vmem>>, vector<2x512xf32>
    %c1_92 = arith.constant 1 : index
    %c0_93 = arith.constant 0 : index
    %144 = vector.load %arg1[%c1_92, %c0_93] : memref<9x512xf32, #tpu.memory_space<vmem>>, vector<1x512xf32>
    %145 = vector.broadcast %144 : vector<1x512xf32> to vector<2x512xf32>
    %146 = arith.mulf %143, %145 : vector<2x512xf32>
    %c1_94 = arith.constant 1 : index
    %c0_95 = arith.constant 0 : index
    %c0_96 = arith.constant 0 : index
    %147 = vector.load %arg7[%c1_94, %c0_95, %c0_96] : memref<9x2x2xf32, #tpu.memory_space<vmem>>, vector<1x2x2xf32>
    %148 = vector.shape_cast %147 : vector<1x2x2xf32> to vector<2x2xf32>
    %149 = arith.truncf %148 : vector<2x2xf32> to vector<2x2xbf16>
    %150 = arith.truncf %146 : vector<2x512xf32> to vector<2x512xbf16>
    %cst_97 = arith.constant dense<0.000000e+00> : vector<2x512xf32>
    %151 = tpu.matmul %149, %150, %cst_97 {dimension_numbers = #tpu.dot_dimension_numbers<[1], [0], [0], [1], [0, 0, 1, 1], [], []>} : vector<2x2xbf16>, vector<2x512xbf16>, vector<2x512xf32> -> vector<2x512xf32>
    %152 = arith.addf %142, %151 : vector<2x512xf32>
    %c0_98 = arith.constant 0 : index
    %c113_99 = arith.constant 113 : index
    %153 = vector.load %arg17[%c0_98, %c113_99] : memref<2x768xf32, #tpu.memory_space<vmem>>, vector<2x512xf32>
    %c2_100 = arith.constant 2 : index
    %c0_101 = arith.constant 0 : index
    %154 = vector.load %arg1[%c2_100, %c0_101] : memref<9x512xf32, #tpu.memory_space<vmem>>, vector<1x512xf32>
    %155 = vector.broadcast %154 : vector<1x512xf32> to vector<2x512xf32>
    %156 = arith.mulf %153, %155 : vector<2x512xf32>
    %c2_102 = arith.constant 2 : index
    %c0_103 = arith.constant 0 : index
    %c0_104 = arith.constant 0 : index
    %157 = vector.load %arg7[%c2_102, %c0_103, %c0_104] : memref<9x2x2xf32, #tpu.memory_space<vmem>>, vector<1x2x2xf32>
    %158 = vector.shape_cast %157 : vector<1x2x2xf32> to vector<2x2xf32>
    %159 = arith.truncf %158 : vector<2x2xf32> to vector<2x2xbf16>
    %160 = arith.truncf %156 : vector<2x512xf32> to vector<2x512xbf16>
    %cst_105 = arith.constant dense<0.000000e+00> : vector<2x512xf32>
    %161 = tpu.matmul %159, %160, %cst_105 {dimension_numbers = #tpu.dot_dimension_numbers<[1], [0], [0], [1], [0, 0, 1, 1], [], []>} : vector<2x2xbf16>, vector<2x512xbf16>, vector<2x512xf32> -> vector<2x512xf32>
    %162 = arith.addf %152, %161 : vector<2x512xf32>
    %c0_106 = arith.constant 0 : index
    %c127_107 = arith.constant 127 : index
    %163 = vector.load %arg17[%c0_106, %c127_107] : memref<2x768xf32, #tpu.memory_space<vmem>>, vector<2x512xf32>
    %c3_108 = arith.constant 3 : index
    %c0_109 = arith.constant 0 : index
    %164 = vector.load %arg1[%c3_108, %c0_109] : memref<9x512xf32, #tpu.memory_space<vmem>>, vector<1x512xf32>
    %165 = vector.broadcast %164 : vector<1x512xf32> to vector<2x512xf32>
    %166 = arith.mulf %163, %165 : vector<2x512xf32>
    %c3_110 = arith.constant 3 : index
    %c0_111 = arith.constant 0 : index
    %c0_112 = arith.constant 0 : index
    %167 = vector.load %arg7[%c3_110, %c0_111, %c0_112] : memref<9x2x2xf32, #tpu.memory_space<vmem>>, vector<1x2x2xf32>
    %168 = vector.shape_cast %167 : vector<1x2x2xf32> to vector<2x2xf32>
    %169 = arith.truncf %168 : vector<2x2xf32> to vector<2x2xbf16>
    %170 = arith.truncf %166 : vector<2x512xf32> to vector<2x512xbf16>
    %cst_113 = arith.constant dense<0.000000e+00> : vector<2x512xf32>
    %171 = tpu.matmul %169, %170, %cst_113 {dimension_numbers = #tpu.dot_dimension_numbers<[1], [0], [0], [1], [0, 0, 1, 1], [], []>} : vector<2x2xbf16>, vector<2x512xbf16>, vector<2x512xf32> -> vector<2x512xf32>
    %172 = arith.addf %162, %171 : vector<2x512xf32>
    %c0_114 = arith.constant 0 : index
    %c128_115 = arith.constant 128 : index
    %173 = vector.load %arg17[%c0_114, %c128_115] : memref<2x768xf32, #tpu.memory_space<vmem>>, vector<2x512xf32>
    %c4_116 = arith.constant 4 : index
    %c0_117 = arith.constant 0 : index
    %c0_118 = arith.constant 0 : index
    %174 = vector.load %arg7[%c4_116, %c0_117, %c0_118] : memref<9x2x2xf32, #tpu.memory_space<vmem>>, vector<1x2x2xf32>
    %175 = vector.shape_cast %174 : vector<1x2x2xf32> to vector<2x2xf32>
    %176 = arith.truncf %175 : vector<2x2xf32> to vector<2x2xbf16>
    %177 = arith.truncf %173 : vector<2x512xf32> to vector<2x512xbf16>
    %cst_119 = arith.constant dense<0.000000e+00> : vector<2x512xf32>
    %178 = tpu.matmul %176, %177, %cst_119 {dimension_numbers = #tpu.dot_dimension_numbers<[1], [0], [0], [1], [0, 0, 1, 1], [], []>} : vector<2x2xbf16>, vector<2x512xbf16>, vector<2x512xf32> -> vector<2x512xf32>
    %179 = arith.addf %172, %178 : vector<2x512xf32>
    %c0_120 = arith.constant 0 : index
    %c129_121 = arith.constant 129 : index
    %180 = vector.load %arg17[%c0_120, %c129_121] : memref<2x768xf32, #tpu.memory_space<vmem>>, vector<2x512xf32>
    %c5_122 = arith.constant 5 : index
    %c0_123 = arith.constant 0 : index
    %181 = vector.load %arg1[%c5_122, %c0_123] : memref<9x512xf32, #tpu.memory_space<vmem>>, vector<1x512xf32>
    %182 = vector.broadcast %181 : vector<1x512xf32> to vector<2x512xf32>
    %183 = arith.mulf %180, %182 : vector<2x512xf32>
    %c5_124 = arith.constant 5 : index
    %c0_125 = arith.constant 0 : index
    %c0_126 = arith.constant 0 : index
    %184 = vector.load %arg7[%c5_124, %c0_125, %c0_126] : memref<9x2x2xf32, #tpu.memory_space<vmem>>, vector<1x2x2xf32>
    %185 = vector.shape_cast %184 : vector<1x2x2xf32> to vector<2x2xf32>
    %186 = arith.truncf %185 : vector<2x2xf32> to vector<2x2xbf16>
    %187 = arith.truncf %183 : vector<2x512xf32> to vector<2x512xbf16>
    %cst_127 = arith.constant dense<0.000000e+00> : vector<2x512xf32>
    %188 = tpu.matmul %186, %187, %cst_127 {dimension_numbers = #tpu.dot_dimension_numbers<[1], [0], [0], [1], [0, 0, 1, 1], [], []>} : vector<2x2xbf16>, vector<2x512xbf16>, vector<2x512xf32> -> vector<2x512xf32>
    %189 = arith.addf %179, %188 : vector<2x512xf32>
    %c0_128 = arith.constant 0 : index
    %c143_129 = arith.constant 143 : index
    %190 = vector.load %arg17[%c0_128, %c143_129] : memref<2x768xf32, #tpu.memory_space<vmem>>, vector<2x512xf32>
    %c6_130 = arith.constant 6 : index
    %c0_131 = arith.constant 0 : index
    %191 = vector.load %arg1[%c6_130, %c0_131] : memref<9x512xf32, #tpu.memory_space<vmem>>, vector<1x512xf32>
    %192 = vector.broadcast %191 : vector<1x512xf32> to vector<2x512xf32>
    %193 = arith.mulf %190, %192 : vector<2x512xf32>
    %c6_132 = arith.constant 6 : index
    %c0_133 = arith.constant 0 : index
    %c0_134 = arith.constant 0 : index
    %194 = vector.load %arg7[%c6_132, %c0_133, %c0_134] : memref<9x2x2xf32, #tpu.memory_space<vmem>>, vector<1x2x2xf32>
    %195 = vector.shape_cast %194 : vector<1x2x2xf32> to vector<2x2xf32>
    %196 = arith.truncf %195 : vector<2x2xf32> to vector<2x2xbf16>
    %197 = arith.truncf %193 : vector<2x512xf32> to vector<2x512xbf16>
    %cst_135 = arith.constant dense<0.000000e+00> : vector<2x512xf32>
    %198 = tpu.matmul %196, %197, %cst_135 {dimension_numbers = #tpu.dot_dimension_numbers<[1], [0], [0], [1], [0, 0, 1, 1], [], []>} : vector<2x2xbf16>, vector<2x512xbf16>, vector<2x512xf32> -> vector<2x512xf32>
    %199 = arith.addf %189, %198 : vector<2x512xf32>
    %c0_136 = arith.constant 0 : index
    %c144_137 = arith.constant 144 : index
    %200 = vector.load %arg17[%c0_136, %c144_137] : memref<2x768xf32, #tpu.memory_space<vmem>>, vector<2x512xf32>
    %c7_138 = arith.constant 7 : index
    %c0_139 = arith.constant 0 : index
    %201 = vector.load %arg1[%c7_138, %c0_139] : memref<9x512xf32, #tpu.memory_space<vmem>>, vector<1x512xf32>
    %202 = vector.broadcast %201 : vector<1x512xf32> to vector<2x512xf32>
    %203 = arith.mulf %200, %202 : vector<2x512xf32>
    %c7_140 = arith.constant 7 : index
    %c0_141 = arith.constant 0 : index
    %c0_142 = arith.constant 0 : index
    %204 = vector.load %arg7[%c7_140, %c0_141, %c0_142] : memref<9x2x2xf32, #tpu.memory_space<vmem>>, vector<1x2x2xf32>
    %205 = vector.shape_cast %204 : vector<1x2x2xf32> to vector<2x2xf32>
    %206 = arith.truncf %205 : vector<2x2xf32> to vector<2x2xbf16>
    %207 = arith.truncf %203 : vector<2x512xf32> to vector<2x512xbf16>
    %cst_143 = arith.constant dense<0.000000e+00> : vector<2x512xf32>
    %208 = tpu.matmul %206, %207, %cst_143 {dimension_numbers = #tpu.dot_dimension_numbers<[1], [0], [0], [1], [0, 0, 1, 1], [], []>} : vector<2x2xbf16>, vector<2x512xbf16>, vector<2x512xf32> -> vector<2x512xf32>
    %209 = arith.addf %199, %208 : vector<2x512xf32>
    %c0_144 = arith.constant 0 : index
    %c145_145 = arith.constant 145 : index
    %210 = vector.load %arg17[%c0_144, %c145_145] : memref<2x768xf32, #tpu.memory_space<vmem>>, vector<2x512xf32>
    %c8_146 = arith.constant 8 : index
    %c0_147 = arith.constant 0 : index
    %211 = vector.load %arg1[%c8_146, %c0_147] : memref<9x512xf32, #tpu.memory_space<vmem>>, vector<1x512xf32>
    %212 = vector.broadcast %211 : vector<1x512xf32> to vector<2x512xf32>
    %213 = arith.mulf %210, %212 : vector<2x512xf32>
    %c8_148 = arith.constant 8 : index
    %c0_149 = arith.constant 0 : index
    %c0_150 = arith.constant 0 : index
    %214 = vector.load %arg7[%c8_148, %c0_149, %c0_150] : memref<9x2x2xf32, #tpu.memory_space<vmem>>, vector<1x2x2xf32>
    %215 = vector.shape_cast %214 : vector<1x2x2xf32> to vector<2x2xf32>
    %216 = arith.truncf %215 : vector<2x2xf32> to vector<2x2xbf16>
    %217 = arith.truncf %213 : vector<2x512xf32> to vector<2x512xbf16>
    %cst_151 = arith.constant dense<0.000000e+00> : vector<2x512xf32>
    %218 = tpu.matmul %216, %217, %cst_151 {dimension_numbers = #tpu.dot_dimension_numbers<[1], [0], [0], [1], [0, 0, 1, 1], [], []>} : vector<2x2xbf16>, vector<2x512xbf16>, vector<2x512xf32> -> vector<2x512xf32>
    %219 = arith.addf %209, %218 : vector<2x512xf32>
    %cst_152 = arith.constant 0.000000e+00 : f32
    %220 = vector.broadcast %cst_152 : f32 to vector<2x512xf32>
    %c0_153 = arith.constant 0 : index
    %c111_154 = arith.constant 111 : index
    %221 = vector.load %arg16[%c0_153, %c111_154] : memref<2x768xf32, #tpu.memory_space<vmem>>, vector<2x512xf32>
    %c0_155 = arith.constant 0 : index
    %c0_156 = arith.constant 0 : index
    %222 = vector.load %arg1[%c0_155, %c0_156] : memref<9x512xf32, #tpu.memory_space<vmem>>, vector<1x512xf32>
    %223 = vector.broadcast %222 : vector<1x512xf32> to vector<2x512xf32>
    %224 = arith.mulf %221, %223 : vector<2x512xf32>
    %c0_157 = arith.constant 0 : index
    %c0_158 = arith.constant 0 : index
    %c0_159 = arith.constant 0 : index
    %225 = vector.load %arg8[%c0_157, %c0_158, %c0_159] : memref<9x2x2xf32, #tpu.memory_space<vmem>>, vector<1x2x2xf32>
    %226 = vector.shape_cast %225 : vector<1x2x2xf32> to vector<2x2xf32>
    %227 = arith.truncf %226 : vector<2x2xf32> to vector<2x2xbf16>
    %228 = arith.truncf %224 : vector<2x512xf32> to vector<2x512xbf16>
    %cst_160 = arith.constant dense<0.000000e+00> : vector<2x512xf32>
    %229 = tpu.matmul %227, %228, %cst_160 {dimension_numbers = #tpu.dot_dimension_numbers<[1], [0], [0], [1], [0, 0, 1, 1], [], []>} : vector<2x2xbf16>, vector<2x512xbf16>, vector<2x512xf32> -> vector<2x512xf32>
    %230 = arith.addf %220, %229 : vector<2x512xf32>
    %c0_161 = arith.constant 0 : index
    %c112_162 = arith.constant 112 : index
    %231 = vector.load %arg16[%c0_161, %c112_162] : memref<2x768xf32, #tpu.memory_space<vmem>>, vector<2x512xf32>
    %c1_163 = arith.constant 1 : index
    %c0_164 = arith.constant 0 : index
    %232 = vector.load %arg1[%c1_163, %c0_164] : memref<9x512xf32, #tpu.memory_space<vmem>>, vector<1x512xf32>
    %233 = vector.broadcast %232 : vector<1x512xf32> to vector<2x512xf32>
    %234 = arith.mulf %231, %233 : vector<2x512xf32>
    %c1_165 = arith.constant 1 : index
    %c0_166 = arith.constant 0 : index
    %c0_167 = arith.constant 0 : index
    %235 = vector.load %arg8[%c1_165, %c0_166, %c0_167] : memref<9x2x2xf32, #tpu.memory_space<vmem>>, vector<1x2x2xf32>
    %236 = vector.shape_cast %235 : vector<1x2x2xf32> to vector<2x2xf32>
    %237 = arith.truncf %236 : vector<2x2xf32> to vector<2x2xbf16>
    %238 = arith.truncf %234 : vector<2x512xf32> to vector<2x512xbf16>
    %cst_168 = arith.constant dense<0.000000e+00> : vector<2x512xf32>
    %239 = tpu.matmul %237, %238, %cst_168 {dimension_numbers = #tpu.dot_dimension_numbers<[1], [0], [0], [1], [0, 0, 1, 1], [], []>} : vector<2x2xbf16>, vector<2x512xbf16>, vector<2x512xf32> -> vector<2x512xf32>
    %240 = arith.addf %230, %239 : vector<2x512xf32>
    %c0_169 = arith.constant 0 : index
    %c113_170 = arith.constant 113 : index
    %241 = vector.load %arg16[%c0_169, %c113_170] : memref<2x768xf32, #tpu.memory_space<vmem>>, vector<2x512xf32>
    %c2_171 = arith.constant 2 : index
    %c0_172 = arith.constant 0 : index
    %242 = vector.load %arg1[%c2_171, %c0_172] : memref<9x512xf32, #tpu.memory_space<vmem>>, vector<1x512xf32>
    %243 = vector.broadcast %242 : vector<1x512xf32> to vector<2x512xf32>
    %244 = arith.mulf %241, %243 : vector<2x512xf32>
    %c2_173 = arith.constant 2 : index
    %c0_174 = arith.constant 0 : index
    %c0_175 = arith.constant 0 : index
    %245 = vector.load %arg8[%c2_173, %c0_174, %c0_175] : memref<9x2x2xf32, #tpu.memory_space<vmem>>, vector<1x2x2xf32>
    %246 = vector.shape_cast %245 : vector<1x2x2xf32> to vector<2x2xf32>
    %247 = arith.truncf %246 : vector<2x2xf32> to vector<2x2xbf16>
    %248 = arith.truncf %244 : vector<2x512xf32> to vector<2x512xbf16>
    %cst_176 = arith.constant dense<0.000000e+00> : vector<2x512xf32>
    %249 = tpu.matmul %247, %248, %cst_176 {dimension_numbers = #tpu.dot_dimension_numbers<[1], [0], [0], [1], [0, 0, 1, 1], [], []>} : vector<2x2xbf16>, vector<2x512xbf16>, vector<2x512xf32> -> vector<2x512xf32>
    %250 = arith.addf %240, %249 : vector<2x512xf32>
    %c0_177 = arith.constant 0 : index
    %c127_178 = arith.constant 127 : index
    %251 = vector.load %arg16[%c0_177, %c127_178] : memref<2x768xf32, #tpu.memory_space<vmem>>, vector<2x512xf32>
    %c3_179 = arith.constant 3 : index
    %c0_180 = arith.constant 0 : index
    %252 = vector.load %arg1[%c3_179, %c0_180] : memref<9x512xf32, #tpu.memory_space<vmem>>, vector<1x512xf32>
    %253 = vector.broadcast %252 : vector<1x512xf32> to vector<2x512xf32>
    %254 = arith.mulf %251, %253 : vector<2x512xf32>
    %c3_181 = arith.constant 3 : index
    %c0_182 = arith.constant 0 : index
    %c0_183 = arith.constant 0 : index
    %255 = vector.load %arg8[%c3_181, %c0_182, %c0_183] : memref<9x2x2xf32, #tpu.memory_space<vmem>>, vector<1x2x2xf32>
    %256 = vector.shape_cast %255 : vector<1x2x2xf32> to vector<2x2xf32>
    %257 = arith.truncf %256 : vector<2x2xf32> to vector<2x2xbf16>
    %258 = arith.truncf %254 : vector<2x512xf32> to vector<2x512xbf16>
    %cst_184 = arith.constant dense<0.000000e+00> : vector<2x512xf32>
    %259 = tpu.matmul %257, %258, %cst_184 {dimension_numbers = #tpu.dot_dimension_numbers<[1], [0], [0], [1], [0, 0, 1, 1], [], []>} : vector<2x2xbf16>, vector<2x512xbf16>, vector<2x512xf32> -> vector<2x512xf32>
    %260 = arith.addf %250, %259 : vector<2x512xf32>
    %c0_185 = arith.constant 0 : index
    %c128_186 = arith.constant 128 : index
    %261 = vector.load %arg16[%c0_185, %c128_186] : memref<2x768xf32, #tpu.memory_space<vmem>>, vector<2x512xf32>
    %c4_187 = arith.constant 4 : index
    %c0_188 = arith.constant 0 : index
    %c0_189 = arith.constant 0 : index
    %262 = vector.load %arg8[%c4_187, %c0_188, %c0_189] : memref<9x2x2xf32, #tpu.memory_space<vmem>>, vector<1x2x2xf32>
    %263 = vector.shape_cast %262 : vector<1x2x2xf32> to vector<2x2xf32>
    %264 = arith.truncf %263 : vector<2x2xf32> to vector<2x2xbf16>
    %265 = arith.truncf %261 : vector<2x512xf32> to vector<2x512xbf16>
    %cst_190 = arith.constant dense<0.000000e+00> : vector<2x512xf32>
    %266 = tpu.matmul %264, %265, %cst_190 {dimension_numbers = #tpu.dot_dimension_numbers<[1], [0], [0], [1], [0, 0, 1, 1], [], []>} : vector<2x2xbf16>, vector<2x512xbf16>, vector<2x512xf32> -> vector<2x512xf32>
    %267 = arith.addf %260, %266 : vector<2x512xf32>
    %c0_191 = arith.constant 0 : index
    %c129_192 = arith.constant 129 : index
    %268 = vector.load %arg16[%c0_191, %c129_192] : memref<2x768xf32, #tpu.memory_space<vmem>>, vector<2x512xf32>
    %c5_193 = arith.constant 5 : index
    %c0_194 = arith.constant 0 : index
    %269 = vector.load %arg1[%c5_193, %c0_194] : memref<9x512xf32, #tpu.memory_space<vmem>>, vector<1x512xf32>
    %270 = vector.broadcast %269 : vector<1x512xf32> to vector<2x512xf32>
    %271 = arith.mulf %268, %270 : vector<2x512xf32>
    %c5_195 = arith.constant 5 : index
    %c0_196 = arith.constant 0 : index
    %c0_197 = arith.constant 0 : index
    %272 = vector.load %arg8[%c5_195, %c0_196, %c0_197] : memref<9x2x2xf32, #tpu.memory_space<vmem>>, vector<1x2x2xf32>
    %273 = vector.shape_cast %272 : vector<1x2x2xf32> to vector<2x2xf32>
    %274 = arith.truncf %273 : vector<2x2xf32> to vector<2x2xbf16>
    %275 = arith.truncf %271 : vector<2x512xf32> to vector<2x512xbf16>
    %cst_198 = arith.constant dense<0.000000e+00> : vector<2x512xf32>
    %276 = tpu.matmul %274, %275, %cst_198 {dimension_numbers = #tpu.dot_dimension_numbers<[1], [0], [0], [1], [0, 0, 1, 1], [], []>} : vector<2x2xbf16>, vector<2x512xbf16>, vector<2x512xf32> -> vector<2x512xf32>
    %277 = arith.addf %267, %276 : vector<2x512xf32>
    %c0_199 = arith.constant 0 : index
    %c143_200 = arith.constant 143 : index
    %278 = vector.load %arg16[%c0_199, %c143_200] : memref<2x768xf32, #tpu.memory_space<vmem>>, vector<2x512xf32>
    %c6_201 = arith.constant 6 : index
    %c0_202 = arith.constant 0 : index
    %279 = vector.load %arg1[%c6_201, %c0_202] : memref<9x512xf32, #tpu.memory_space<vmem>>, vector<1x512xf32>
    %280 = vector.broadcast %279 : vector<1x512xf32> to vector<2x512xf32>
    %281 = arith.mulf %278, %280 : vector<2x512xf32>
    %c6_203 = arith.constant 6 : index
    %c0_204 = arith.constant 0 : index
    %c0_205 = arith.constant 0 : index
    %282 = vector.load %arg8[%c6_203, %c0_204, %c0_205] : memref<9x2x2xf32, #tpu.memory_space<vmem>>, vector<1x2x2xf32>
    %283 = vector.shape_cast %282 : vector<1x2x2xf32> to vector<2x2xf32>
    %284 = arith.truncf %283 : vector<2x2xf32> to vector<2x2xbf16>
    %285 = arith.truncf %281 : vector<2x512xf32> to vector<2x512xbf16>
    %cst_206 = arith.constant dense<0.000000e+00> : vector<2x512xf32>
    %286 = tpu.matmul %284, %285, %cst_206 {dimension_numbers = #tpu.dot_dimension_numbers<[1], [0], [0], [1], [0, 0, 1, 1], [], []>} : vector<2x2xbf16>, vector<2x512xbf16>, vector<2x512xf32> -> vector<2x512xf32>
    %287 = arith.addf %277, %286 : vector<2x512xf32>
    %c0_207 = arith.constant 0 : index
    %c144_208 = arith.constant 144 : index
    %288 = vector.load %arg16[%c0_207, %c144_208] : memref<2x768xf32, #tpu.memory_space<vmem>>, vector<2x512xf32>
    %c7_209 = arith.constant 7 : index
    %c0_210 = arith.constant 0 : index
    %289 = vector.load %arg1[%c7_209, %c0_210] : memref<9x512xf32, #tpu.memory_space<vmem>>, vector<1x512xf32>
    %290 = vector.broadcast %289 : vector<1x512xf32> to vector<2x512xf32>
    %291 = arith.mulf %288, %290 : vector<2x512xf32>
    %c7_211 = arith.constant 7 : index
    %c0_212 = arith.constant 0 : index
    %c0_213 = arith.constant 0 : index
    %292 = vector.load %arg8[%c7_211, %c0_212, %c0_213] : memref<9x2x2xf32, #tpu.memory_space<vmem>>, vector<1x2x2xf32>
    %293 = vector.shape_cast %292 : vector<1x2x2xf32> to vector<2x2xf32>
    %294 = arith.truncf %293 : vector<2x2xf32> to vector<2x2xbf16>
    %295 = arith.truncf %291 : vector<2x512xf32> to vector<2x512xbf16>
    %cst_214 = arith.constant dense<0.000000e+00> : vector<2x512xf32>
    %296 = tpu.matmul %294, %295, %cst_214 {dimension_numbers = #tpu.dot_dimension_numbers<[1], [0], [0], [1], [0, 0, 1, 1], [], []>} : vector<2x2xbf16>, vector<2x512xbf16>, vector<2x512xf32> -> vector<2x512xf32>
    %297 = arith.addf %287, %296 : vector<2x512xf32>
    %c0_215 = arith.constant 0 : index
    %c145_216 = arith.constant 145 : index
    %298 = vector.load %arg16[%c0_215, %c145_216] : memref<2x768xf32, #tpu.memory_space<vmem>>, vector<2x512xf32>
    %c8_217 = arith.constant 8 : index
    %c0_218 = arith.constant 0 : index
    %299 = vector.load %arg1[%c8_217, %c0_218] : memref<9x512xf32, #tpu.memory_space<vmem>>, vector<1x512xf32>
    %300 = vector.broadcast %299 : vector<1x512xf32> to vector<2x512xf32>
    %301 = arith.mulf %298, %300 : vector<2x512xf32>
    %c8_219 = arith.constant 8 : index
    %c0_220 = arith.constant 0 : index
    %c0_221 = arith.constant 0 : index
    %302 = vector.load %arg8[%c8_219, %c0_220, %c0_221] : memref<9x2x2xf32, #tpu.memory_space<vmem>>, vector<1x2x2xf32>
    %303 = vector.shape_cast %302 : vector<1x2x2xf32> to vector<2x2xf32>
    %304 = arith.truncf %303 : vector<2x2xf32> to vector<2x2xbf16>
    %305 = arith.truncf %301 : vector<2x512xf32> to vector<2x512xbf16>
    %cst_222 = arith.constant dense<0.000000e+00> : vector<2x512xf32>
    %306 = tpu.matmul %304, %305, %cst_222 {dimension_numbers = #tpu.dot_dimension_numbers<[1], [0], [0], [1], [0, 0, 1, 1], [], []>} : vector<2x2xbf16>, vector<2x512xbf16>, vector<2x512xf32> -> vector<2x512xf32>
    %307 = arith.addf %297, %306 : vector<2x512xf32>
    %308 = arith.addf %219, %307 : vector<2x512xf32>
    %c0_223 = arith.constant 0 : index
    %c0_224 = arith.constant 0 : index
    %309 = vector.load %arg9[%c0_223, %c0_224] : memref<2x1xf32, #tpu.memory_space<vmem>>, vector<2x1xf32>
    %310 = vector.broadcast %309 : vector<2x1xf32> to vector<2x512xf32>
    %311 = arith.addf %308, %310 : vector<2x512xf32>
    %c0_225 = arith.constant 0 : index
    %c0_226 = arith.constant 0 : index
    %312 = vector.load %arg10[%c0_225, %c0_226] : memref<2x2xf32, #tpu.memory_space<vmem>>, vector<2x2xf32>
    %313 = arith.truncf %312 : vector<2x2xf32> to vector<2x2xbf16>
    %314 = arith.truncf %311 : vector<2x512xf32> to vector<2x512xbf16>
    %cst_227 = arith.constant dense<0.000000e+00> : vector<2x512xf32>
    %315 = tpu.matmul %313, %314, %cst_227 {dimension_numbers = #tpu.dot_dimension_numbers<[1], [0], [0], [1], [0, 0, 1, 1], [], []>} : vector<2x2xbf16>, vector<2x512xbf16>, vector<2x512xf32> -> vector<2x512xf32>
    %c0_228 = arith.constant 0 : index
    %c0_229 = arith.constant 0 : index
    %316 = vector.load %arg11[%c0_228, %c0_229] : memref<2x2xf32, #tpu.memory_space<vmem>>, vector<2x2xf32>
    %317 = arith.truncf %316 : vector<2x2xf32> to vector<2x2xbf16>
    %318 = arith.truncf %34 : vector<2x512xf32> to vector<2x512xbf16>
    %cst_230 = arith.constant dense<0.000000e+00> : vector<2x512xf32>
    %319 = tpu.matmul %317, %318, %cst_230 {dimension_numbers = #tpu.dot_dimension_numbers<[1], [0], [0], [1], [0, 0, 1, 1], [], []>} : vector<2x2xbf16>, vector<2x512xbf16>, vector<2x512xf32> -> vector<2x512xf32>
    %320 = arith.addf %315, %319 : vector<2x512xf32>
    %c0_231 = arith.constant 0 : index
    %c0_232 = arith.constant 0 : index
    %321 = vector.load %arg12[%c0_231, %c0_232] : memref<2x2xf32, #tpu.memory_space<vmem>>, vector<2x2xf32>
    %322 = arith.truncf %321 : vector<2x2xf32> to vector<2x2xbf16>
    %323 = arith.truncf %128 : vector<2x512xf32> to vector<2x512xbf16>
    %cst_233 = arith.constant dense<0.000000e+00> : vector<2x512xf32>
    %324 = tpu.matmul %322, %323, %cst_233 {dimension_numbers = #tpu.dot_dimension_numbers<[1], [0], [0], [1], [0, 0, 1, 1], [], []>} : vector<2x2xbf16>, vector<2x512xbf16>, vector<2x512xf32> -> vector<2x512xf32>
    %325 = arith.addf %320, %324 : vector<2x512xf32>
    %cst_234 = arith.constant dense<0.000000e+00> : vector<2xf32>
    %326 = vector.multi_reduction <add>, %325, %cst_234 [1] : vector<2x512xf32> to vector<2xf32>
    %327 = vector.shape_cast %326 : vector<2xf32> to vector<2x1xf32>
    %328 = arith.mulf %325, %325 : vector<2x512xf32>
    %cst_235 = arith.constant dense<0.000000e+00> : vector<2xf32>
    %329 = vector.multi_reduction <add>, %328, %cst_235 [1] : vector<2x512xf32> to vector<2xf32>
    %330 = vector.shape_cast %329 : vector<2xf32> to vector<2x1xf32>
    %cst_236 = arith.constant 0.001953125 : f32
    %331 = vector.broadcast %cst_236 : f32 to vector<2x1xf32>
    %332 = arith.mulf %327, %331 : vector<2x1xf32>
    %cst_237 = arith.constant 0.001953125 : f32
    %333 = vector.broadcast %cst_237 : f32 to vector<2x1xf32>
    %334 = arith.mulf %330, %333 : vector<2x1xf32>
    %335 = arith.mulf %332, %332 : vector<2x1xf32>
    %336 = arith.subf %334, %335 : vector<2x1xf32>
    %cst_238 = arith.constant 0.000000e+00 : f32
    %337 = vector.broadcast %cst_238 : f32 to vector<2x1xf32>
    %338 = arith.maximumf %336, %337 : vector<2x1xf32>
    %c0_239 = arith.constant 0 : index
    %c0_240 = arith.constant 0 : index
    %339 = vector.load %arg13[%c0_239, %c0_240] : memref<2x1xf32, #tpu.memory_space<vmem>>, vector<2x1xf32>
    %cst_241 = arith.constant 9.99999974E-6 : f32
    %340 = vector.broadcast %cst_241 : f32 to vector<2x1xf32>
    %341 = arith.addf %338, %340 : vector<2x1xf32>
    %342 = math.rsqrt %341 : vector<2x1xf32>
    %343 = arith.mulf %339, %342 : vector<2x1xf32>
    %c0_242 = arith.constant 0 : index
    %c0_243 = arith.constant 0 : index
    %344 = vector.load %arg14[%c0_242, %c0_243] : memref<2x1xf32, #tpu.memory_space<vmem>>, vector<2x1xf32>
    %345 = arith.mulf %332, %343 : vector<2x1xf32>
    %346 = arith.subf %344, %345 : vector<2x1xf32>
    %347 = vector.broadcast %343 : vector<2x1xf32> to vector<2x512xf32>
    %348 = arith.mulf %325, %347 : vector<2x512xf32>
    %349 = vector.broadcast %346 : vector<2x1xf32> to vector<2x512xf32>
    %350 = arith.addf %348, %349 : vector<2x512xf32>
    %cst_244 = arith.constant 0.000000e+00 : f32
    %351 = vector.broadcast %cst_244 : f32 to vector<2x512xf32>
    %352 = arith.cmpf oge, %350, %351 : vector<2x512xf32>
    %cst_245 = arith.constant 0.00999999977 : f32
    %353 = vector.broadcast %cst_245 : f32 to vector<2x512xf32>
    %354 = arith.mulf %353, %350 : vector<2x512xf32>
    %355 = arith.select %352, %350, %354 : vector<2x512xi1>, vector<2x512xf32>
    %c0_246 = arith.constant 0 : index
    %c0_247 = arith.constant 0 : index
    %356 = vector.load %arg15[%c0_246, %c0_247] : memref<2x512xf32, #tpu.memory_space<vmem>>, vector<2x512xf32>
    tpu.vector_store %arg15[%c0_246, %c0_247], %355 {strides = array<i32>} : memref<2x512xf32, #tpu.memory_space<vmem>>, vector<2x512xf32>,
    return
  }
}

</mosaic_0001>

<bundles_post_ra>
// kernel: dense_up_block_forward.1
= control target key start
LH: loop header
LB: loop body
LE: loop exit
PB: predicated region body
PF: predicated region fallthrough
CT: control target
= control target key end

     0   :  { %vm69_vm0 = vcmask 1041408   ;;  %v5861_v2 = vmov 0   ;;  %vm65_vm1 = vcmask 31744   ;;  %v239_v39 = vlaneseq  ;;  %s5863_s26 = smov 112   ;;  %s5864_s27 = smov 17   ;;  %s7025_s0 = inlined_call_operand.vmem [shape: f32[4,512], index: 0, kind: input, shape index: {}]   ;;  %s7026_s2 = inlined_call_operand.vmem [shape: f32[2,4], index: 2, kind: input, shape index: {}]   ;;  %s7027_s1 = inlined_call_operand.vmem [shape: f32[9,512], index: 1, kind: input, shape index: {}]   ;;  %s7028_s3 = inlined_call_operand.vmem [shape: f32[2,1], index: 3, kind: input, shape index: {}]   ;;  %s7029_s4 = inlined_call_operand.vmem [shape: f32[2,1], index: 4, kind: input, shape index: {}]   ;;  %s7030_s6 = inlined_call_operand.vmem [shape: f32[2,1], index: 6, kind: input, shape index: {}]   ;;  %s7031_s5 = inlined_call_operand.vmem [shape: f32[9,2,2], index: 5, kind: input, shape index: {}]   ;;  %s7032_s7 = inlined_call_operand.vmem [shape: f32[9,2,2], index: 7, kind: input, shape index: {}]   ;;  %s7033_s8 = inlined_call_operand.vmem [shape: f32[9,2,2], index: 8, kind: input, shape index: {}]   ;;  %s7034_s9 = inlined_call_operand.vmem [shape: f32[2,1], index: 9, kind: input, shape index: {}]   ;;  %s7035_s11 = inlined_call_operand.vmem [shape: f32[2,2], index: 11, kind: input, shape index: {}]   ;;  %s7036_s10 = inlined_call_operand.vmem [shape: f32[2,2], index: 10, kind: input, shape index: {}]   ;;  %s7037_s12 = inlined_call_operand.vmem [shape: f32[2,2], index: 12, kind: input, shape index: {}]   ;;  %s7038_s13 = inlined_call_operand.vmem [shape: f32[2,1], index: 13, kind: input, shape index: {}]   ;;  %s7039_s14 = inlined_call_operand.vmem [shape: f32[2,1], index: 14, kind: input, shape index: {}]   ;;  %s7040_s15 = inlined_call_operand.vmem [shape: f32[2,512], index: 15, kind: output, shape index: {}]  }
   0x1   :  { %v51_v0 = vld [vmem:[%s7025_s0] sm:$0xff]  ;;  %v52_v1 = vld [vmem:[%s7025_s0 + $0x8] sm:$0xff]  ;;  %114 = vmatprep.mubr.bf16.mxu0 %v5861_v2  ;;  %155 = vmatprep.mubr.bf16.mxu1 %v5861_v2  ;;  %v5862_v40 = vmov 1983009808   ;;  %s5867_s28 = smov 113   ;;  %s5868_s29 = smov 127  }
   0x2   :  { %v57_v3 = vcombine.high %v51_v0, %v51_v0  ;;  %v58_v4 = vcombine.high %v52_v1, %v52_v1  ;;  %v61_v5 = vpack.c.bf16 %v51_v0, %v51_v0  ;;  %v63_v6 = vpack.c.bf16 %v52_v1, %v52_v1  ;;  %5848 = vset.pattern.permute.xlu1 %v5861_v2  ;;  %v53_v7 = vld [vmem:[%s7026_s2] sm:$0x3]  ;;  %s5866_s2 = smov 111   ;;  %s5869_s30 = smov 1  }
   0x3   :  { %5849 = vset.pattern.permute.xlu0 %v5861_v2  ;;  %v54_v12 = vpack.c.bf16 %v53_v7, %v53_v7  ;;  %v237_v41 = vunpack.c.l.s4 %v5862_v40  ;;  %v240_v42 = vshrl.u32 %v239_v39, 7  ;;  %v5663_v48 = vld [vmem:[%s7027_s1 + $0x1] ss:$8 sm:$0xf]  ;;  %s5870_s16 = smov 15   ;;  %s5871_s17 = smov 16  }
   0x4   :  { %v62_v8 = vpack.c.bf16 %v57_v3, %v57_v3  ;;  %v64_v9 = vpack.c.bf16 %v58_v4, %v58_v4  ;;  %v71_v10 = vsel %vm69_vm0, %v61_v5, 0  ;;  %v77_v11 = vsel %vm69_vm0, %v63_v6, 0  ;;  %v5708_v56 = vld [vmem:[%s7027_s1 + $0x20] ss:$8 sm:$0xf] }
   0x5   :  { %v238_v43 = vunpack.c.0.s8 %v237_v41  ;;  %v5999_v44 = vsub.s32 0, %v240_v42  ;;  %v6001_v45 = vsub.s32 1, %v240_v42  ;;  %v6003_v46 = vsub.s32 2, %v240_v42 }
   0x6   :  { %5659 = vmatprep.subr.msk.bf16.mxu0 %vm69_vm0, %v62_v8  ;;  %5661 = vmatprep.subr.msk.bf16.mxu1 %vm69_vm0, %v64_v9  ;;  %v6005_v47 = vsub.s32 3, %v240_v42  ;;  %vm293_vm6 = vcmask 908288   ;;  %vm376_vm7 = vcmask 916480   ;;  %vm698_vm8 = vcmask 924672  }
   0x7   :  { %83 = vmatpush1.bf16.msra.mxu0 %v71_v10  ;;  %124 = vmatpush1.bf16.msra.mxu1 %v77_v11  ;;  %v6010_v49 = vsub.s32 %v238_v43, %v240_v42  ;;  %v343_v50 = vrot.slane %v5663_v48, %v5999_v44  ;;  %v347_v51 = vrot.slane %v5663_v48, %v6001_v45  ;;  %vm905_vm9 = vcmask 1039360  }
   0x8   :  { %v351_v52 = vrot.slane %v5663_v48, %v6003_v46  ;;  %v355_v53 = vrot.slane %v5663_v48, %v6005_v47  ;;  %v1831_v58 = vrot.slane %v5708_v56, %v5999_v44  ;;  %v1835_v60 = vrot.slane %v5708_v56, %v6001_v45  ;;  %v5690_v48 = vld [vmem:[%s7027_s1 + $0x5] ss:$8 sm:$0xf] }
   0x9   :  { %v356_v54 = vcombine.low %v343_v50, %v347_v51  ;;  %v1839_v61 = vrot.slane %v5708_v56, %v6003_v46  ;;  %v1843_v62 = vrot.slane %v5708_v56, %v6005_v47  ;;  %v5865_v50 = vmov 0.0  }
   0xa   :  { %5660 = vmatmul.mubr.msk.bf16.vlgmr.msra.gmra.mrb[0].mxu0 %vm65_vm1, %v54_v12  ;;  %5662 = vmatmul.mubr.msk.bf16.vlgmr.msra.gmra.mrb[0].mxu1 %vm65_vm1, %v54_v12  ;;  %v357_v55 = vcombine.low %v351_v52, %v355_v53  ;;  %v1844_v0 = vcombine.low %v1831_v58, %v1835_v60  ;;  %228 = vst [vmem:[#allocation2] sm:$0xff] %v5865_v50  ;;  %229 = vst [vmem:[#allocation2 + $0x8] sm:$0xf] %v5865_v50  ;;  %vm965_vm10 = vcmask 7168   ;;  %vm758_vm11 = vcmask 121856  }
   0xb   :  { %490 = vmatprep.mubr.bf16.mxu0 %v5861_v2  ;;  %531 = vmatprep.mubr.bf16.mxu1 %v5861_v2  ;;  %v364_v57 = vrot.slane %v356_v54, %v6010_v49  ;;  %v1845_v1 = vcombine.low %v1839_v61, %v1843_v62  ;;  %2040 = vst [vmem:[#allocation3] sm:$0xff] %v5865_v50  ;;  %2041 = vst [vmem:[#allocation3 + $0x8] sm:$0xf] %v5865_v50  ;;  %v5696_v61 = vld [vmem:[%s7027_s1 + $0x6] ss:$8 sm:$0xf] }
   0xc   :  { %v371_v59 = vrot.slane %v357_v55, %v6010_v49  ;;  %v1852_v3 = vrot.slane %v1844_v0, %v6010_v49  ;;  %v1210_v54 = vrot.slane %v5690_v48, %v5999_v44  ;;  %v1214_v55 = vrot.slane %v5690_v48, %v6001_v45 }
   0xd   :  { %v1859_v4 = vrot.slane %v1845_v1, %v6010_v49  ;;  %v1218_v56 = vrot.slane %v5690_v48, %v6003_v46  ;;  %vm436_vm12 = vcmask 130048   ;;  %vm555_vm13 = vcmask 138240  }
   0xe   :  { %v372_v63 = vcombine.low %v364_v57, %v371_v59  ;;  %v1222_v57 = vrot.slane %v5690_v48, %v6005_v47  ;;  %v1223_v0 = vcombine.low %v1210_v54, %v1214_v55  ;;  %vm445_vm14 = vcmask 1040384  }
   0xf   :  { %v1860_v5 = vcombine.low %v1852_v3, %v1859_v4  ;;  %v1417_v3 = vrot.slane %v5696_v61, %v5999_v44  ;;  %v1421_v4 = vrot.slane %v5696_v61, %v6001_v45  ;;  %vm441_vm15 = vcmask 15360  }
  0x10   :  { %v1224_v1 = vcombine.low %v1218_v56, %v1222_v57 }
  0xdd   :  { %v5971_v13 = vpop.f32.mrb[0].mxu0  ;;  %v5973_v14 = vpop.f32.mrb[0].mxu1 }
  0xde   :  { %v164_v15 = vsel %vm69_vm0, %v5971_v13, 0.0  ;;  %v173_v16 = vmul.f32 %v5971_v13, %v5971_v13  ;;  %v175_v17 = vmul.f32 %v5973_v14, %v5973_v14  ;;  %v5981_v18 = vpop.f32.mrb[1].mxu0  ;;  %v5983_v19 = vpop.f32.mrb[1].mxu1  ;;  %v167_v24 = vsel %vm69_vm0, %v5973_v14, 0.0 }
  0xdf   :  { %v165_v20 = vsel %vm69_vm0, %v5981_v18, 0.0  ;;  %v174_v21 = vmul.f32 %v5981_v18, %v5981_v18  ;;  %v120_v22 = vpop.f32.mrb[2].mxu0  ;;  %v161_v23 = vpop.f32.mrb[2].mxu1  ;;  %v176_v30 = vmul.f32 %v5983_v19, %v5983_v19  ;;  %v169_v34 = vsel %vm69_vm0, %v5983_v19, 0.0 }
  0xe0   :  { %v177_v25 = vsel %vm69_vm0, %v173_v16, 0.0  ;;  %v121_v26 = vpop.f32.mrb[3].mxu0  ;;  %v162_v27 = vpop.f32.mrb[3].mxu1  ;;  %v166_v28 = vadd.f32 %v165_v20, %v164_v15  ;;  %v180_v31 = vsel %vm69_vm0, %v175_v17, 0.0 }
  0xe1   :  { %v178_v29 = vsel %vm69_vm0, %v174_v21, 0.0  ;;  %v182_v37 = vsel %vm69_vm0, %v176_v30, 0.0  ;;  %v255_v16 = vld [vmem:[%s7027_s1] ss:$8 sm:$0xf] }
  0xe2   :  { %v168_v32 = vadd.f32 %v167_v24, %v166_v28  ;;  %v179_v33 = vadd.f32 %v178_v29, %v177_v25  ;;  %v260_v17 = vrot.slane %v255_v16, %v5999_v44  ;;  %v264_v20 = vrot.slane %v255_v16, %v6001_v45  ;;  %v5673_v23 = vld [vmem:[%s7027_s1 + $0x2] ss:$8 sm:$0xf]  ;;  %v5679_v24 = vld [vmem:[%s7027_s1 + $0x3] ss:$8 sm:$0xf] }
  0xe3   :  { %v268_v21 = vrot.slane %v255_v16, %v6003_v46  ;;  %v272_v22 = vrot.slane %v255_v16, %v6005_v47  ;;  %v191_v25 = vld [vmem:[%s7028_s3] sm:$0x3]  ;;  %v665_v26 = vrot.slane %v5673_v23, %v5999_v44  ;;  %v669_v27 = vrot.slane %v5673_v23, %v6001_v45 }
  0xe4   :  { %v170_v35 = vadd.f32 %v169_v34, %v168_v32  ;;  %v181_v36 = vadd.f32 %v180_v31, %v179_v33  ;;  %v673_v28 = vrot.slane %v5673_v23, %v6003_v46  ;;  %v677_v29 = vrot.slane %v5673_v23, %v6005_v47 }
  0xe5   :  { %v273_v30 = vcombine.low %v260_v17, %v264_v20  ;;  %v274_v31 = vcombine.low %v268_v21, %v272_v22  ;;  %v872_v33 = vrot.slane %v5679_v24, %v5999_v44  ;;  %v678_v39 = vcombine.low %v665_v26, %v669_v27 }
  0xe6   :  { %171 = vadd.xlane.f32.xlu0 %v170_v35  ;;  %v183_v38 = vadd.f32 %v182_v37, %v181_v36  ;;  %v876_v35 = vrot.slane %v5679_v24, %v6001_v45  ;;  %v880_v36 = vrot.slane %v5679_v24, %v6003_v46  ;;  %v884_v37 = vrot.slane %v5679_v24, %v6005_v47 }
  0xe7   :  { %v679_v40 = vcombine.low %v673_v28, %v677_v29  ;;  %v281_v42 = vrot.slane %v273_v30, %v6010_v49  ;;  %v288_v43 = vrot.slane %v274_v31, %v6010_v49  ;;  %v686_v59 = vrot.slane %v678_v39, %v6010_v49 }
  0xe8   :  { %v885_v52 = vcombine.low %v872_v33, %v876_v35  ;;  %v886_v53 = vcombine.low %v880_v36, %v884_v37 }
  0xe9   :  { %v289_v58 = vcombine.low %v281_v42, %v288_v43  ;;  %v693_v60 = vrot.slane %v679_v40, %v6010_v49 }
  0xea   :  { %184 = vadd.xlane.f32.xlu0 %v183_v38  ;;  %v195_v38 = vld [vmem:[%s7029_s4] sm:$0x3]  ;;  %v893_v62 = vrot.slane %v885_v52, %v6010_v49 }
 0x100   :  { %373 = vrot.lane.b32.xlu0 %v372_v63, %s5863_s26  ;;  %v900_v63 = vrot.slane %v886_v53, %v6010_v49 }
 0x104   :  { %1861 = vrot.lane.b32.xlu0 %v1860_v5, %s5864_s27  ;;  %v694_v5 = vcombine.low %v686_v59, %v693_v60 }
 0x173   :  { %v172_v6 = vpop.xlane.xlu0 %171 }
 0x174   :  { %v186_v7 = vmul.f32 0.001953125, %v172_v6  ;;  %v1425_v6 = vrot.slane %v5696_v61, %v6003_v46 }
 0x176   :  { %v188_v9 = vmul.f32 %v186_v7, %v186_v7 }
 0x177   :  { %v185_v8 = vpop.xlane.xlu0 %184 }
 0x178   :  { %v187_v10 = vmul.f32 0.001953125, %v185_v8  ;;  %v5702_v8 = vld [vmem:[%s7027_s1 + $0x7] ss:$8 sm:$0xf] }
 0x179   :  { %v1628_v17 = vrot.slane %v5702_v8, %v6001_v45  ;;  %v1632_v20 = vrot.slane %v5702_v8, %v6003_v46  ;;  %v1636_v21 = vrot.slane %v5702_v8, %v6005_v47 }
 0x17a   :  { %v189_v11 = vsub.f32 %v187_v10, %v188_v9  ;;  %v901_v9 = vcombine.low %v893_v62, %v900_v63  ;;  %v1231_v10 = vrot.slane %v1223_v0, %v6010_v49 }
 0x17b   :  { %v1638_v26 = vcombine.low %v1632_v20, %v1636_v21  ;;  %v374_v57 = vpop.permute.xlu0 %373 }
 0x17c   :  { %v190_v12 = vmax.f32 %v189_v11, 0.0  ;;  %v1238_v11 = vrot.slane %v1224_v1, %v6010_v49 }
 0x17d   :  { %v1652_v29 = vrot.slane %v1638_v26, %v6010_v49 }
 0x17e   :  { %v192_v15 = vadd.f32 1e-05, %v190_v12  ;;  %v1430_v12 = vcombine.low %v1417_v3, %v1421_v4  ;;  %v1239_v23 = vcombine.low %v1231_v10, %v1238_v11 }
 0x180   :  { %5853 = vrsqrt.f32 %v192_v15  ;;  %v1624_v15 = vrot.slane %v5702_v8, %v5999_v44  ;;  %v1438_v22 = vrot.slane %v1430_v12, %v6010_v49 }
 0x18a   :  { %v5854_v32 = vpop.eup %5853 }
 0x18b   :  { %v194_v34 = vmul.f32 %v5854_v32, %v191_v25  ;;  %v1637_v25 = vcombine.low %v1624_v15, %v1628_v17 }
 0x18d   :  { %200 = vperm.xlu1 %5848, %v194_v34   ;;  %v196_v41 = vmul.f32 %v194_v34, %v186_v7  ;;  %v1429_v7 = vrot.slane %v5696_v61, %v6005_v47  ;;  %v1645_v28 = vrot.slane %v1637_v25, %v6010_v49 }
 0x18f   :  { %v197_v51 = vsub.f32 %v195_v38, %v196_v41  ;;  %v1431_v16 = vcombine.low %v1425_v6, %v1429_v7  ;;  %v1653_v30 = vcombine.low %v1645_v28, %v1652_v29 }
 0x191   :  { %209 = vperm.xlu1 %5848, %v197_v51   ;;  %v1445_v24 = vrot.slane %v1431_v16, %v6010_v49 }
 0x193   :  { %v1446_v27 = vcombine.low %v1438_v22, %v1445_v24 }
 0x195   :  { %290 = vrot.lane.b32.xlu1 %v289_v58, %s5866_s2  ;;  %v375_v58 = vrot.slane %v374_v57, 6 }
 0x197   :  { %v377_v63 = vsel %vm376_vm7, %v375_v58, %v374_v57 }
 0x199   :  { %695 = vrot.lane.b32.xlu1 %v694_v5, %s5867_s28 }
 0x19d   :  { %902 = vrot.lane.b32.xlu1 %v901_v9, %s5868_s29 }
 0x1a1   :  { %1240 = vrot.lane.b32.xlu1 %v1239_v23, %s5869_s30 }
 0x1a5   :  { %1447 = vrot.lane.b32.xlu1 %v1446_v27, %s5870_s16 }
 0x1a9   :  { %1654 = vrot.lane.b32.xlu1 %v1653_v30, %s5871_s17 }
 0x20c   :  { %v201_v31 = vpop.permute.xlu1 %200 }
 0x20d   :  { %v203_v32 = vmul.f32 %v201_v31, %v5971_v13  ;;  %v204_v33 = vmul.f32 %v201_v31, %v5981_v18  ;;  %v205_v34 = vmul.f32 %v201_v31, %v5973_v14  ;;  %v206_v35 = vmul.f32 %v201_v31, %v5983_v19 }
 0x210   :  { %v210_v36 = vpop.permute.xlu1 %209 }
 0x211   :  { %v212_v37 = vadd.f32 %v210_v36, %v203_v32  ;;  %v213_v38 = vadd.f32 %v210_v36, %v204_v33  ;;  %v214_v39 = vadd.f32 %v210_v36, %v205_v34  ;;  %v215_v40 = vadd.f32 %v210_v36, %v206_v35 }
 0x213   :  { %vm216_vm2 = vcmp.ge.f32.partialorder %v212_v37, 0.0  ;;  %vm217_vm3 = vcmp.ge.f32.partialorder %v213_v38, 0.0  ;;  %vm218_vm4 = vcmp.ge.f32.partialorder %v214_v39, 0.0  ;;  %vm219_vm5 = vcmp.ge.f32.partialorder %v215_v40, 0.0 }
 0x214   :  { %v220_v41 = vmul.f32 0.01, %v212_v37  ;;  %v221_v42 = vmul.f32 0.01, %v213_v38  ;;  %v222_v43 = vmul.f32 0.01, %v214_v39  ;;  %v291_v55 = vpop.permute.xlu1 %290 }
 0x215   :  { %v223_v48 = vmul.f32 0.01, %v215_v40  ;;  %v292_v56 = vrot.slane %v291_v55, 6 }
 0x216   :  { %v6099_v13 = vsel %vm216_vm2, %v212_v37, %v220_v41  ;;  %v6101_v18 = vsel %vm217_vm3, %v213_v38, %v221_v42  ;;  %v6103_v14 = vsel %vm218_vm4, %v214_v39, %v222_v43 }
 0x217   :  { %v6105_v19 = vsel %vm219_vm5, %v215_v40, %v223_v48  ;;  %v234_v50 = vcombine.low %v6099_v13, %v6101_v18  ;;  %v294_v61 = vsel %vm293_vm6, %v292_v56, %v291_v55 }
 0x218   :  { %v235_v51 = vcombine.low %v6103_v14, %v6105_v19  ;;  %v696_v3 = vpop.permute.xlu1 %695 }
 0x219   :  { %v242_v52 = vrot.slane %v234_v50, %v6010_v49  ;;  %v697_v7 = vrot.slane %v696_v3, 6 }
 0x21a   :  { %v6113_v53 = vrot.slane %v235_v51, %v6010_v49 }
 0x21b   :  { %v699_v15 = vsel %vm698_vm8, %v697_v7, %v696_v3 }
 0x21c   :  { %v6116_v54 = vcombine.low %v242_v52, %v6113_v53  ;;  %v903_v22 = vpop.permute.xlu1 %902 }
 0x21d   :  { %v904_v25 = vrot.slane %v903_v22, 6 }
 0x21e   :  { %252 = vst [vmem:[#allocation2 + $0x2] sm:$0xff] %v6116_v54 }
 0x21f   :  { %v906_v30 = vsel %vm905_vm9, %v904_v25, %v903_v22 }
 0x220   :  { %v1241_v38 = vpop.permute.xlu1 %1240 }
 0x221   :  { %v1242_v48 = vrot.slane %v1241_v38, 6 }
 0x223   :  { %v1244_v57 = vsel %vm965_vm10, %v1242_v48, %v1241_v38 }
 0x225   :  { %v253_v59 = vld [vmem:[#allocation2] sm:$0xff]  ;;  %v254_v60 = vld [vmem:[#allocation2 + $0x8] sm:$0x3] }
 0x226   :  { %v297_v62 = vmul.f32 %v294_v61, %v253_v59  ;;  %v380_v0 = vmul.f32 %v377_v63, %v253_v59  ;;  %v381_v1 = vmul.f32 %v375_v58, %v254_v60  ;;  %v298_v23 = vmul.f32 %v292_v56, %v254_v60  ;;  %v658_v37 = vld [vmem:[#allocation2 + $0x8] sm:$0x3]  ;;  %v1448_v58 = vpop.permute.xlu1 %1447 }
 0x227   :  { %v702_v24 = vmul.f32 %v699_v15, %v253_v59  ;;  %v909_v36 = vmul.f32 %v906_v30, %v253_v59  ;;  %v703_v43 = vmul.f32 %v697_v7, %v658_v37  ;;  %v865_v63 = vld [vmem:[#allocation2 + $0x8] sm:$0x3] }
 0x228   :  { %v310_v4 = vrot.slane %v297_v62, %v6010_v49  ;;  %v394_v5 = vrot.slane %v380_v0, %v6010_v49  ;;  %v303_v6 = vcombine.high %v297_v62, %v297_v62  ;;  %v387_v8 = vcombine.high %v380_v0, %v380_v0 }
 0x229   :  { %v410_v11 = vrot.slane %v381_v1, %v6010_v49  ;;  %v716_v33 = vrot.slane %v702_v24, %v6010_v49  ;;  %v326_v34 = vrot.slane %v298_v23, %v6010_v49  ;;  %v709_v35 = vcombine.high %v702_v24, %v702_v24 }
 0x22a   :  { %v332_v9 = vpack.c.bf16 %v310_v4, %v310_v4  ;;  %v416_v10 = vpack.c.bf16 %v394_v5, %v394_v5  ;;  %v402_v12 = vcombine.high %v394_v5, %v394_v5  ;;  %v317_v20 = vrot.slane %v303_v6, %v6010_v49 }
 0x22b   :  { %v420_v16 = vpack.c.bf16 %v410_v11, %v410_v11  ;;  %v401_v21 = vrot.slane %v387_v8, %v6010_v49  ;;  %v318_v28 = vcombine.high %v310_v4, %v310_v4  ;;  %v738_v39 = vpack.c.bf16 %v716_v33, %v716_v33 }
 0x22c   :  { %545 = vrot.lane.b32.xlu0 %v332_v9, %s5864_s27  ;;  %426 = vrot.lane.b32.xlu1 %v416_v10, %s5871_s17  ;;  %v417_v17 = vpack.c.bf16 %v402_v12, %v402_v12  ;;  %v334_v26 = vpack.c.bf16 %v317_v20, %v317_v20  ;;  %v336_v40 = vpack.c.bf16 %v326_v34, %v326_v34  ;;  %v1449_v1 = vrot.slane %v1448_v58, 6  ;;  %v1410_v34 = vld [vmem:[#allocation2 + $0xa] sm:$0x3] }
 0x22d   :  { %v418_v27 = vpack.c.bf16 %v401_v21, %v401_v21  ;;  %v403_v29 = vcombine.high %v401_v21, %v401_v21  ;;  %v333_v31 = vpack.c.bf16 %v318_v28, %v318_v28  ;;  %v319_v41 = vcombine.high %v317_v20, %v317_v20  ;;  %v1655_v21 = vpop.permute.xlu1 %1654 }
 0x22e   :  { %v724_v42 = vcombine.high %v716_v33, %v716_v33  ;;  %v723_v52 = vrot.slane %v709_v35, %v6010_v49  ;;  %v923_v55 = vrot.slane %v909_v36, %v6010_v49  ;;  %v916_v56 = vcombine.high %v909_v36, %v909_v36  ;;  %v1862_v33 = vpop.permute.xlu0 %1861 }
 0x22f   :  { %v419_v32 = vpack.c.bf16 %v403_v29, %v403_v29  ;;  %v335_v50 = vpack.c.bf16 %v319_v41, %v319_v41  ;;  %v732_v61 = vrot.slane %v703_v43, %v6010_v49  ;;  %v1247_v0 = vmul.f32 %v1244_v57, %v6116_v54 }
 0x230   :  { %434 = vrot.lane.b32.xlu1 %v420_v16, %s5871_s17  ;;  %428 = vrot.lane.b32.xlu0 %v417_v17, %s5871_s17  ;;  %v739_v51 = vpack.c.bf16 %v724_v42, %v724_v42  ;;  %v740_v59 = vpack.c.bf16 %v723_v52, %v723_v52  ;;  %v945_v60 = vpack.c.bf16 %v923_v55, %v923_v55  ;;  %v1203_v17 = vld [vmem:[#allocation2 + $0xa] sm:$0x3] }
 0x231   :  { %v725_v62 = vcombine.high %v723_v52, %v723_v52  ;;  %v930_v3 = vrot.slane %v916_v56, %v6010_v49  ;;  %v910_v4 = vmul.f32 %v904_v25, %v865_v63  ;;  %v742_v5 = vpack.c.bf16 %v732_v61, %v732_v61 }
 0x232   :  { %v931_v7 = vcombine.high %v923_v55, %v923_v55  ;;  %v1451_v8 = vsel %vm758_vm11, %v1449_v1, %v1448_v58  ;;  %v1261_v15 = vrot.slane %v1247_v0, %v6010_v49  ;;  %v1254_v20 = vcombine.high %v1247_v0, %v1247_v0  ;;  %v1824_v58 = vld [vmem:[#allocation2 + $0xa] sm:$0x3] }
 0x233   :  { %v741_v6 = vpack.c.bf16 %v725_v62, %v725_v62  ;;  %v947_v9 = vpack.c.bf16 %v930_v3, %v930_v3  ;;  %v932_v11 = vcombine.high %v930_v3, %v930_v3  ;;  %v939_v12 = vrot.slane %v910_v4, %v6010_v49  ;;  %v1617_v3 = vld [vmem:[#allocation2 + $0xa] sm:$0x3] }
 0x234   :  { %549 = vrot.lane.b32.xlu0 %v334_v26, %s5864_s27  ;;  %430 = vrot.lane.b32.xlu1 %v418_v27, %s5871_s17  ;;  %v946_v10 = vpack.c.bf16 %v931_v7, %v931_v7  ;;  %v1454_v16 = vmul.f32 %v1451_v8, %v6116_v54  ;;  %v1269_v24 = vcombine.high %v1261_v15, %v1261_v15  ;;  %v1656_v27 = vrot.slane %v1655_v21, 6 }
 0x235   :  { %v948_v22 = vpack.c.bf16 %v932_v11, %v932_v11  ;;  %v949_v23 = vpack.c.bf16 %v939_v12, %v939_v12  ;;  %v1248_v25 = vmul.f32 %v1242_v48, %v1203_v17  ;;  %v1283_v28 = vpack.c.bf16 %v1261_v15, %v1261_v15  ;;  %v5724_v17 = vld [vmem:[%s7027_s1 + $0x2] ss:$8 sm:$0xf] }
 0x236   :  { %v1461_v26 = vcombine.high %v1454_v16, %v1454_v16  ;;  %v1284_v29 = vpack.c.bf16 %v1269_v24, %v1269_v24  ;;  %v1268_v30 = vrot.slane %v1254_v20, %v6010_v49  ;;  %v1658_v35 = vsel %vm436_vm12, %v1656_v27, %v1655_v21 }
 0x237   :  { %v1661_v41 = vmul.f32 %v1658_v35, %v6116_v54  ;;  %v1662_v8 = vmul.f32 %v1656_v27, %v1617_v3  ;;  %v2469_v27 = vrot.slane %v5724_v17, %v5999_v44 }
 0x238   :  { %547 = vrot.lane.b32.xlu1 %v333_v31, %s5864_s27  ;;  %432 = vrot.lane.b32.xlu0 %v419_v32, %s5871_s17  ;;  %v1468_v31 = vrot.slane %v1454_v16, %v6010_v49  ;;  %v1277_v32 = vrot.slane %v1248_v25, %v6010_v49  ;;  %v1285_v36 = vpack.c.bf16 %v1268_v30, %v1268_v30 }
 0x239   :  { %v1475_v38 = vrot.slane %v1461_v26, %v6010_v49  ;;  %v1675_v56 = vrot.slane %v1661_v41, %v6010_v49  ;;  %v1691_v24 = vrot.slane %v1662_v8, %v6010_v49  ;;  %v2067_v26 = vld [vmem:[%s7027_s1] ss:$8 sm:$0xf] }
 0x23a   :  { %v1490_v37 = vpack.c.bf16 %v1468_v31, %v1468_v31  ;;  %v1287_v42 = vpack.c.bf16 %v1277_v32, %v1277_v32  ;;  %v1476_v48 = vcombine.high %v1468_v31, %v1468_v31  ;;  %v2076_v35 = vrot.slane %v2067_v26, %v6001_v45 }
 0x23b   :  { %v1492_v43 = vpack.c.bf16 %v1475_v38, %v1475_v38  ;;  %v1697_v61 = vpack.c.bf16 %v1675_v56, %v1675_v56  ;;  %v1477_v63 = vcombine.high %v1475_v38, %v1475_v38  ;;  %v1683_v0 = vcombine.high %v1675_v56, %v1675_v56 }
 0x23c   :  { %748 = vrot.lane.b32.xlu1 %v738_v39, %s5870_s16  ;;  %553 = vrot.lane.b32.xlu0 %v336_v40, %s5864_s27  ;;  %v1863_v39 = vrot.slane %v1862_v33, 6  ;;  %v1455_v40 = vmul.f32 %v1449_v1, %v1410_v34  ;;  %v1491_v52 = vpack.c.bf16 %v1476_v48, %v1476_v48  ;;  %v5714_v1 = vld [vmem:[%s7027_s1 + $0x1] ss:$8 sm:$0xf]  ;;  %v2072_v34 = vrot.slane %v2067_v26, %v5999_v44 }
 0x23d   :  { %v2157_v7 = vrot.slane %v5714_v1, %v6001_v45  ;;  %v2161_v15 = vrot.slane %v5714_v1, %v6003_v46  ;;  %v2165_v16 = vrot.slane %v5714_v1, %v6005_v47  ;;  %v1701_v38 = vpack.c.bf16 %v1691_v24, %v1691_v24 }
 0x23e   :  { %v1484_v57 = vrot.slane %v1455_v40, %v6010_v49  ;;  %v1869_v4 = vmul.f32 %v1863_v39, %v1824_v58  ;;  %v5753_v58 = vld [vmem:[%s7027_s1 + $0x7] ss:$8 sm:$0xf] }
 0x23f   :  { %v2167_v32 = vcombine.low %v2161_v15, %v2165_v16  ;;  %v3428_v15 = vrot.slane %v5753_v58, %v6005_v47 }
 0x240   :  { %551 = vrot.lane.b32.xlu1 %v335_v50, %s5864_s27  ;;  %750 = vrot.lane.b32.xlu0 %v739_v51, %s5870_s16  ;;  %v1270_v50 = vcombine.high %v1268_v30, %v1268_v30  ;;  %v1865_v51 = vsel %vm555_vm13, %v1863_v39, %v1862_v33  ;;  %v1494_v62 = vpack.c.bf16 %v1484_v57, %v1484_v57  ;;  %v5741_v33 = vld [vmem:[%s7027_s1 + $0x5] ss:$8 sm:$0xf] }
 0x241   :  { %v6190_v12 = vrot.slane %v1869_v4, %v6010_v49  ;;  %v2481_v30 = vrot.slane %v5724_v17, %v6005_v47  ;;  %v3020_v56 = vrot.slane %v5741_v33, %v6005_v47  ;;  %v2181_v57 = vrot.slane %v2167_v32, %v6010_v49 }
 0x242   :  { %v1286_v55 = vpack.c.bf16 %v1270_v50, %v1270_v50 }
 0x243   :  { %v1908_v31 = vpack.c.bf16 %v6190_v12, %v6190_v12  ;;  %v3424_v12 = vrot.slane %v5753_v58, %v6003_v46 }
 0x244   :  { %752 = vrot.lane.b32.xlu1 %v740_v59, %s5870_s16  ;;  %955 = vrot.lane.b32.xlu0 %v945_v60, %s5869_s30  ;;  %v1868_v59 = vmul.f32 %v1865_v51, %v6116_v54  ;;  %v1668_v60 = vcombine.high %v1661_v41, %v1661_v41  ;;  %v3008_v51 = vrot.slane %v5741_v33, %v5999_v44 }
 0x246   :  { %v1682_v11 = vrot.slane %v1668_v60, %v6010_v49  ;;  %v1875_v20 = vcombine.high %v1868_v59, %v1868_v59 }
 0x248   :  { %756 = vrot.lane.b32.xlu1 %v742_v5, %s5870_s16  ;;  %754 = vrot.lane.b32.xlu0 %v741_v6, %s5870_s16  ;;  %v1882_v5 = vrot.slane %v1868_v59, %v6010_v49  ;;  %v2153_v6 = vrot.slane %v5714_v1, %v5999_v44  ;;  %v1684_v25 = vcombine.high %v1682_v11, %v1682_v11 }
 0x249   :  { %v1889_v41 = vrot.slane %v1875_v20, %v6010_v49  ;;  %v2085_v59 = vcombine.low %v2072_v34, %v2076_v35  ;;  %v3430_v35 = vcombine.low %v3424_v12, %v3428_v15 }
 0x24a   :  { %v6197_v21 = vcombine.low %v2153_v6, %v2157_v7  ;;  %v1700_v39 = vpack.c.bf16 %v1684_v25, %v1684_v25  ;;  %v1890_v40 = vcombine.high %v1882_v5, %v1882_v5  ;;  %v5747_v7 = vld [vmem:[%s7027_s1 + $0x6] ss:$8 sm:$0xf] }
 0x24b   :  { %v2093_v20 = vrot.slane %v2085_v59, %v6010_v49  ;;  %v3216_v24 = vrot.slane %v5747_v7, %v6001_v45  ;;  %v3220_v25 = vrot.slane %v5747_v7, %v6003_v46 }
 0x24c   :  { %957 = vrot.lane.b32.xlu1 %v946_v10, %s5869_s30  ;;  %959 = vrot.lane.b32.xlu0 %v947_v9, %s5869_s30  ;;  %v1493_v9 = vpack.c.bf16 %v1477_v63, %v1477_v63  ;;  %v1698_v10 = vpack.c.bf16 %v1683_v0, %v1683_v0  ;;  %v1906_v63 = vpack.c.bf16 %v1889_v41, %v1889_v41 }
 0x24d   :  { %v1891_v0 = vcombine.high %v1889_v41, %v1889_v41 }
 0x250   :  { %961 = vrot.lane.b32.xlu1 %v948_v22, %s5869_s30  ;;  %963 = vrot.lane.b32.xlu0 %v949_v23, %s5869_s30  ;;  %v1699_v22 = vpack.c.bf16 %v1682_v11, %v1682_v11  ;;  %v1904_v23 = vpack.c.bf16 %v1882_v5, %v1882_v5  ;;  %v3420_v11 = vrot.slane %v5753_v58, %v6001_v45 }
 0x254   :  { %1293 = vrot.lane.b32.xlu1 %v1283_v28, %s5868_s29  ;;  %1295 = vrot.lane.b32.xlu0 %v1284_v29, %s5868_s29  ;;  %v2473_v28 = vrot.slane %v5724_v17, %v6001_v45  ;;  %v2477_v29 = vrot.slane %v5724_v17, %v6003_v46  ;;  %v1907_v17 = vpack.c.bf16 %v1891_v0, %v1891_v0 }
 0x256   :  { %v2482_v48 = vcombine.low %v2469_v27, %v2473_v28  ;;  %v2483_v50 = vcombine.low %v2477_v29, %v2481_v30  ;;  %v5759_v28 = vld [vmem:[%s7027_s1 + $0x20] ss:$8 sm:$0xf] }
 0x257   :  { %v2030_v29 = vld [vmem:[%s7030_s6] sm:$0x3]  ;;  %v3624_v41 = vrot.slane %v5759_v28, %v6001_v45 }
 0x258   :  { %1297 = vrot.lane.b32.xlu1 %v1285_v36, %s5868_s29  ;;  %1500 = vrot.lane.b32.xlu0 %v1490_v37, %s5867_s28  ;;  %v2080_v36 = vrot.slane %v2067_v26, %v6003_v46  ;;  %v2084_v37 = vrot.slane %v2067_v26, %v6005_v47  ;;  %v2490_v3 = vrot.slane %v2482_v48, %v6010_v49 }
 0x259   :  { %v2497_v4 = vrot.slane %v2483_v50, %v6010_v49  ;;  %v3224_v26 = vrot.slane %v5747_v7, %v6005_v47 }
 0x25a   :  { %v2086_v1 = vcombine.low %v2080_v36, %v2084_v37 }
 0x25b   :  { %v2498_v30 = vcombine.low %v2490_v3, %v2497_v4 }
 0x25c   :  { %1301 = vrot.lane.b32.xlu1 %v1287_v42, %s5868_s29  ;;  %1504 = vrot.lane.b32.xlu0 %v1492_v43, %s5867_s28  ;;  %v5730_v42 = vld [vmem:[%s7027_s1 + $0x3] ss:$8 sm:$0xf]  ;;  %v2174_v43 = vrot.slane %v6197_v21, %v6010_v49  ;;  %v2100_v21 = vrot.slane %v2086_v1, %v6010_v49 }
 0x25d   :  { %v2673_v60 = vrot.slane %v5730_v42, %v5999_v44  ;;  %v2681_v5 = vrot.slane %v5730_v42, %v6003_v46  ;;  %v2685_v6 = vrot.slane %v5730_v42, %v6005_v47  ;;  %v5664_v1 = vld [vmem:[%s7031_s5 + $0x2] sm:$0x3] }
 0x25e   :  { %v2182_v27 = vcombine.low %v2174_v43, %v2181_v57  ;;  %v2101_v36 = vcombine.low %v2093_v20, %v2100_v21  ;;  %v3632_v43 = vrot.slane %v5759_v28, %v6005_v47  ;;  %v299_v20 = vld [vmem:[%s7031_s5] sm:$0x3] }
 0x260   :  { %1502 = vrot.lane.b32.xlu1 %v1491_v52, %s5867_s28  ;;  %1299 = vrot.lane.b32.xlu0 %v1286_v55, %s5868_s29  ;;  %v3012_v52 = vrot.slane %v5741_v33, %v6001_v45  ;;  %v3016_v55 = vrot.slane %v5741_v33, %v6003_v46 }
 0x262   :  { %v3021_v8 = vcombine.low %v3008_v51, %v3012_v52  ;;  %v3444_v51 = vrot.slane %v3430_v35, %v6010_v49 }
 0x264   :  { %1707 = vrot.lane.b32.xlu1 %v1697_v61, %s5863_s26  ;;  %1508 = vrot.lane.b32.xlu0 %v1494_v62, %s5867_s28  ;;  %v2677_v61 = vrot.slane %v5730_v42, %v6001_v45  ;;  %v1905_v62 = vpack.c.bf16 %v1890_v40, %v1890_v40  ;;  %v3029_v32 = vrot.slane %v3021_v8, %v6010_v49 }
 0x265   :  { %v3620_v40 = vrot.slane %v5759_v28, %v5999_v44  ;;  %v3628_v42 = vrot.slane %v5759_v28, %v6003_v46 }
 0x266   :  { %v2686_v16 = vcombine.low %v2673_v60, %v2677_v61 }
 0x267   :  { %v3634_v45 = vcombine.low %v3628_v42, %v3632_v43 }
 0x268   :  { %1506 = vrot.lane.b32.xlu1 %v1493_v9, %s5867_s28  ;;  %1709 = vrot.lane.b32.xlu0 %v1698_v10, %s5863_s26  ;;  %v3022_v9 = vcombine.low %v3016_v55, %v3020_v56  ;;  %v3416_v10 = vrot.slane %v5753_v58, %v5999_v44  ;;  %v3633_v56 = vcombine.low %v3620_v40, %v3624_v41 }
 0x269   :  { %v3648_v58 = vrot.slane %v3634_v45, %v6010_v49 }
 0x26a   :  { %v3036_v33 = vrot.slane %v3022_v9, %v6010_v49  ;;  %v3429_v34 = vcombine.low %v3416_v10, %v3420_v11  ;;  %v3641_v47 = vrot.slane %v3633_v56, %v6010_v49 }
 0x26c   :  { %1711 = vrot.lane.b32.xlu1 %v1699_v22, %s5863_s26  ;;  %1914 = vrot.lane.b32.xlu0 %v1904_v23, %s5866_s2  ;;  %v3212_v22 = vrot.slane %v5747_v7, %v5999_v44  ;;  %v2687_v23 = vcombine.low %v2681_v5, %v2685_v6  ;;  %v3037_v48 = vcombine.low %v3029_v32, %v3036_v33 }
 0x26d   :  { %v3437_v50 = vrot.slane %v3429_v34, %v6010_v49  ;;  %v3649_v59 = vcombine.low %v3641_v47, %v3648_v58  ;;  %v384_v7 = vpack.c.bf16 %v5664_v1, %v5664_v1 }
 0x26e   :  { %v2701_v37 = vrot.slane %v2687_v23, %v6010_v49  ;;  %v300_v23 = vpack.c.bf16 %v299_v20, %v299_v20 }
 0x26f   :  { %v3445_v57 = vcombine.low %v3437_v50, %v3444_v51 }
 0x270   :  { %1715 = vrot.lane.b32.xlu1 %v1701_v38, %s5863_s26  ;;  %1713 = vrot.lane.b32.xlu0 %v1700_v39, %s5863_s26  ;;  %v3225_v38 = vcombine.low %v3212_v22, %v3216_v24  ;;  %v3226_v39 = vcombine.low %v3220_v25, %v3224_v26 }
 0x272   :  { %v3233_v55 = vrot.slane %v3225_v38, %v6010_v49  ;;  %v3240_v44 = vrot.slane %v3226_v39, %v6010_v49 }
 0x274   :  { %1916 = vrot.lane.b32.xlu1 %v1905_v62, %s5866_s2  ;;  %1918 = vrot.lane.b32.xlu0 %v1906_v63, %s5866_s2  ;;  %v3241_v46 = vcombine.low %v3233_v55, %v3240_v44 }
 0x278   :  { %1922 = vrot.lane.b32.xlu0 %v1908_v31, %s5866_s2  ;;  %1920 = vrot.lane.b32.xlu1 %v1907_v17, %s5866_s2  ;;  %v2694_v31 = vrot.slane %v2686_v16, %v6010_v49 }
 0x27a   :  { %v2702_v52 = vcombine.low %v2694_v31, %v2701_v37  ;;  %v1083_v31 = vrot.slane %v6116_v54, %v6010_v49  ;;  %v5859_v37 = vcombine.low %v6113_v53, %v6113_v53  ;;  %v5680_v53 = vld [vmem:[%s7031_s5 + $0x6] sm:$0x3] }
 0x27b   :  { %v913_v45 = vpack.c.bf16 %v5680_v53, %v5680_v53 }
 0x27c   :  { %2183 = vrot.lane.b32.xlu0 %v2182_v27, %s5863_s26  ;;  %2033 = vperm.xlu1 %5848, %v2030_v29   ;;  %v1091_v43 = vcombine.high %v1083_v31, %v1083_v31  ;;  %v1090_v54 = vrot.slane %v5859_v37, %v6010_v49  ;;  %v1097_v55 = vpack.c.bf16 %v1083_v31, %v1083_v31  ;;  %v5703_v37 = vld [vmem:[%s7031_s5 + $0xe] sm:$0x3] }
 0x27e   :  { %v1098_v56 = vpack.c.bf16 %v1091_v43, %v1091_v43 }
 0x280   :  { %2499 = vrot.lane.b32.xlu0 %v2498_v30, %s5867_s28  ;;  %2102 = vrot.lane.b32.xlu1 %v2101_v36, %s5866_s2  ;;  %v5674_v30 = vld [vmem:[%s7031_s5 + $0x4] sm:$0x3] }
 0x281   :  { %v706_v36 = vpack.c.bf16 %v5674_v30, %v5674_v30 }
 0x284   :  { %3038 = vrot.lane.b32.xlu0 %v3037_v48, %s5869_s30  ;;  %2703 = vrot.lane.b32.xlu1 %v2702_v52, %s5868_s29 }
 0x288   :  { %3446 = vrot.lane.b32.xlu0 %v3445_v57, %s5871_s17  ;;  %3242 = vrot.lane.b32.xlu1 %v3241_v46, %s5870_s16  ;;  %v1092_v57 = vcombine.high %v1090_v54, %v1090_v54 }
 0x28c   :  { %3650 = vrot.lane.b32.xlu1 %v3649_v59, %s5864_s27 }
 0x29e   :  { %v427_v60 = vpop.permute.xlu1 %426  ;;  %v546_v61 = vpop.permute.xlu0 %545 }
 0x2a2   :  { %v435_v62 = vpop.permute.xlu1 %434  ;;  %v429_v63 = vpop.permute.xlu0 %428 }
 0x2a3   :  { %v437_v0 = vsel %vm436_vm12, %v427_v60, %v429_v63 }
 0x2a4   :  { %v447_v6 = vsel %vm445_vm14, %v437_v0, 0  ;;  %v5685_v0 = vld [vmem:[%s7031_s5 + $0x8] sm:$0x3] }
 0x2a6   :  { %v431_v3 = vpop.permute.xlu1 %430  ;;  %v550_v4 = vpop.permute.xlu0 %549 }
 0x2a7   :  { %v438_v5 = vsel %vm436_vm12, %v429_v63, %v431_v3  ;;  %v1099_v63 = vpack.c.bf16 %v1090_v54, %v1090_v54 }
 0x2a8   :  { %5665 = vmatprep.subr.msk.bf16.mxu0 %vm445_vm14, %v438_v5  ;;  %v1074_v5 = vpack.c.bf16 %v5685_v0, %v5685_v0 }
 0x2a9   :  { %459 = vmatpush1.bf16.msra.mxu0 %v447_v6 }
 0x2aa   :  { %v548_v8 = vpop.permute.xlu1 %547  ;;  %v433_v9 = vpop.permute.xlu0 %432 }
 0x2ab   :  { %v556_v10 = vsel %vm555_vm13, %v546_v61, %v548_v8  ;;  %v439_v11 = vsel %vm436_vm12, %v431_v3, %v433_v9  ;;  %v440_v12 = vsel %vm436_vm12, %v433_v9, %v435_v62  ;;  %v557_v15 = vsel %vm555_vm13, %v548_v8, %v550_v4 }
 0x2ac   :  { %5666 = vmatmul.mubr.msk.bf16.vlgmr.msra.gmra.mrb[4].mxu0 %vm441_vm15, %v384_v7  ;;  %5667 = vmatprep.subr.msk.bf16.mxu1 %vm445_vm14, %v440_v12  ;;  %v453_v16 = vsel %vm445_vm14, %v439_v11, 0  ;;  %v564_v17 = vsel %vm445_vm14, %v556_v10, 0  ;;  %v1105_v61 = vsel %vm445_vm14, %v1097_v55, 0  ;;  %v1100_v62 = vpack.c.bf16 %v1092_v57, %v1092_v57  ;;  %v5691_v11 = vld [vmem:[%s7031_s5 + $0xa] sm:$0x3] }
 0x2ad   :  { %5669 = vmatprep.subr.msk.bf16.mxu0 %vm445_vm14, %v557_v15  ;;  %500 = vmatpush1.bf16.msra.mxu1 %v453_v16  ;;  %v1251_v16 = vpack.c.bf16 %v5691_v11, %v5691_v11 }
 0x2ae   :  { %576 = vmatpush1.bf16.msra.mxu0 %v564_v17  ;;  %v749_v21 = vpop.permute.xlu1 %748  ;;  %v554_v22 = vpop.permute.xlu0 %553  ;;  %607 = vmatprep.mubr.bf16.mxu0 %v5861_v2 }
 0x2b0   :  { %5668 = vmatmul.mubr.msk.bf16.vlgmr.msra.gmra.mrb[4].mxu1 %vm441_vm15, %v384_v7 }
 0x2b1   :  { %648 = vmatprep.mubr.bf16.mxu1 %v5861_v2 }
 0x2b2   :  { %v552_v24 = vpop.permute.xlu1 %551  ;;  %v751_v25 = vpop.permute.xlu0 %750 }
 0x2b3   :  { %v558_v26 = vsel %vm555_vm13, %v550_v4, %v552_v24  ;;  %v559_v27 = vsel %vm555_vm13, %v552_v24, %v554_v22  ;;  %v759_v29 = vsel %vm758_vm11, %v749_v21, %v751_v25  ;;  %v1111_v4 = vsel %vm445_vm14, %v1099_v63, 0 }
 0x2b4   :  { %5670 = vmatmul.mubr.msk.bf16.vlgmr.msra.gmra.mrb[8].mxu0 %vm441_vm15, %v300_v23  ;;  %5671 = vmatprep.subr.msk.bf16.mxu1 %vm445_vm14, %v559_v27  ;;  %v570_v28 = vsel %vm445_vm14, %v558_v26, 0  ;;  %v767_v35 = vsel %vm445_vm14, %v759_v29, 0  ;;  %v5697_v27 = vld [vmem:[%s7031_s5 + $0xc] sm:$0x3] }
 0x2b5   :  { %617 = vmatpush1.bf16.msra.mxu1 %v570_v28  ;;  %810 = vmatprep.mubr.bf16.mxu0 %v5861_v2  ;;  %v1458_v30 = vpack.c.bf16 %v5697_v27, %v5697_v27 }
 0x2b6   :  { %v753_v32 = vpop.permute.xlu1 %752  ;;  %v956_v33 = vpop.permute.xlu0 %955 }
 0x2b7   :  { %v760_v34 = vsel %vm758_vm11, %v751_v25, %v753_v32 }
 0x2b8   :  { %5672 = vmatmul.mubr.msk.bf16.vlgmr.msra.gmra.mrb[8].mxu1 %vm441_vm15, %v300_v23  ;;  %5675 = vmatprep.subr.msk.bf16.mxu0 %vm445_vm14, %v760_v34 }
 0x2b9   :  { %779 = vmatpush1.bf16.msra.mxu0 %v767_v35  ;;  %851 = vmatprep.mubr.bf16.mxu1 %v5861_v2 }
 0x2ba   :  { %v757_v38 = vpop.permute.xlu1 %756  ;;  %v755_v39 = vpop.permute.xlu0 %754 }
 0x2bb   :  { %v761_v40 = vsel %vm758_vm11, %v753_v32, %v755_v39  ;;  %v762_v41 = vsel %vm758_vm11, %v755_v39, %v757_v38 }
 0x2bc   :  { %5676 = vmatmul.mubr.msk.bf16.vlgmr.msra.gmra.mrb[12].mxu0 %vm441_vm15, %v706_v36  ;;  %5677 = vmatprep.subr.msk.bf16.mxu1 %vm445_vm14, %v762_v41  ;;  %v773_v42 = vsel %vm445_vm14, %v761_v40, 0 }
 0x2bd   :  { %820 = vmatpush1.bf16.msra.mxu1 %v773_v42  ;;  %1017 = vmatprep.mubr.bf16.mxu0 %v5861_v2  ;;  %v1665_v42 = vpack.c.bf16 %v5703_v37, %v5703_v37 }
 0x2be   :  { %v958_v48 = vpop.permute.xlu1 %957  ;;  %v960_v50 = vpop.permute.xlu0 %959 }
 0x2bf   :  { %v966_v51 = vsel %vm965_vm10, %v956_v33, %v958_v48  ;;  %v967_v52 = vsel %vm965_vm10, %v958_v48, %v960_v50 }
 0x2c0   :  { %5678 = vmatmul.mubr.msk.bf16.vlgmr.msra.gmra.mrb[12].mxu1 %vm441_vm15, %v706_v36  ;;  %5681 = vmatprep.subr.msk.bf16.mxu0 %vm445_vm14, %v967_v52  ;;  %v974_v44 = vsel %vm445_vm14, %v966_v51, 0  ;;  %v5709_v51 = vld [vmem:[%s7031_s5 + $0x10] sm:$0x3] }
 0x2c1   :  { %986 = vmatpush1.bf16.msra.mxu0 %v974_v44  ;;  %1058 = vmatprep.mubr.bf16.mxu1 %v5861_v2  ;;  %v1872_v57 = vpack.c.bf16 %v5709_v51, %v5709_v51 }
 0x2c2   :  { %v962_v46 = vpop.permute.xlu1 %961  ;;  %5686 = vmatprep.subr.msk.bf16.mxu0 %vm445_vm14, %v1098_v56  ;;  %v964_v47 = vpop.permute.xlu0 %963 }
 0x2c3   :  { %v968_v58 = vsel %vm965_vm10, %v960_v50, %v962_v46  ;;  %v969_v59 = vsel %vm965_vm10, %v962_v46, %v964_v47 }
 0x2c4   :  { %5682 = vmatmul.mubr.msk.bf16.vlgmr.msra.gmra.mrb[16].mxu0 %vm441_vm15, %v913_v45  ;;  %5683 = vmatprep.subr.msk.bf16.mxu1 %vm445_vm14, %v969_v59  ;;  %v980_v60 = vsel %vm445_vm14, %v968_v58, 0 }
 0x2c5   :  { %1027 = vmatpush1.bf16.msra.mxu1 %v980_v60  ;;  %1117 = vmatpush1.bf16.msra.mxu0 %v1105_v61 }
 0x2c6   :  { %v1294_v1 = vpop.permute.xlu1 %1293  ;;  %5688 = vmatprep.subr.msk.bf16.mxu1 %vm445_vm14, %v1100_v62  ;;  %v1296_v3 = vpop.permute.xlu0 %1295  ;;  %1148 = vmatprep.mubr.bf16.mxu0 %v5861_v2 }
 0x2c7   :  { %v1304_v6 = vsel %vm905_vm9, %v1294_v1, %v1296_v3 }
 0x2c8   :  { %5684 = vmatmul.mubr.msk.bf16.vlgmr.msra.gmra.mrb[16].mxu1 %vm441_vm15, %v913_v45  ;;  %v1312_v10 = vsel %vm445_vm14, %v1304_v6, 0 }
 0x2c9   :  { %1158 = vmatpush1.bf16.msra.mxu1 %v1111_v4  ;;  %1189 = vmatprep.mubr.bf16.mxu1 %v5861_v2 }
 0x2ca   :  { %v1298_v7 = vpop.permute.xlu1 %1297  ;;  %v1501_v8 = vpop.permute.xlu0 %1500 }
 0x2cb   :  { %v1305_v9 = vsel %vm905_vm9, %v1296_v3, %v1298_v7 }
 0x2cc   :  { %5687 = vmatmul.mubr.msk.bf16.vlgmr.msra.gmra.mrb[20].mxu0 %vm441_vm15, %v1074_v5  ;;  %5692 = vmatprep.subr.msk.bf16.mxu0 %vm445_vm14, %v1305_v9 }
 0x2cd   :  { %1324 = vmatpush1.bf16.msra.mxu0 %v1312_v10  ;;  %1355 = vmatprep.mubr.bf16.mxu0 %v5861_v2 }
 0x2ce   :  { %v1302_v12 = vpop.permute.xlu1 %1301  ;;  %v1505_v15 = vpop.permute.xlu0 %1504 }
 0x2d0   :  { %5689 = vmatmul.mubr.msk.bf16.vlgmr.msra.gmra.mrb[20].mxu1 %vm441_vm15, %v1074_v5 }
 0x2d1   :  { %1396 = vmatprep.mubr.bf16.mxu1 %v5861_v2 }
 0x2d2   :  { %v1503_v17 = vpop.permute.xlu1 %1502  ;;  %v1300_v20 = vpop.permute.xlu0 %1299 }
 0x2d3   :  { %v1511_v21 = vsel %vm698_vm8, %v1501_v8, %v1503_v17  ;;  %v1306_v22 = vsel %vm905_vm9, %v1298_v7, %v1300_v20  ;;  %v1307_v23 = vsel %vm905_vm9, %v1300_v20, %v1302_v12  ;;  %v1512_v24 = vsel %vm698_vm8, %v1503_v17, %v1505_v15 }
 0x2d4   :  { %5693 = vmatmul.mubr.msk.bf16.vlgmr.msra.gmra.mrb[24].mxu0 %vm441_vm15, %v1251_v16  ;;  %5694 = vmatprep.subr.msk.bf16.mxu1 %vm445_vm14, %v1307_v23  ;;  %v1318_v25 = vsel %vm445_vm14, %v1306_v22, 0  ;;  %v1519_v26 = vsel %vm445_vm14, %v1511_v21, 0 }
 0x2d5   :  { %5698 = vmatprep.subr.msk.bf16.mxu0 %vm445_vm14, %v1512_v24  ;;  %1365 = vmatpush1.bf16.msra.mxu1 %v1318_v25 }
 0x2d6   :  { %1531 = vmatpush1.bf16.msra.mxu0 %v1519_v26  ;;  %v1708_v28 = vpop.permute.xlu1 %1707  ;;  %v1509_v29 = vpop.permute.xlu0 %1508  ;;  %1562 = vmatprep.mubr.bf16.mxu0 %v5861_v2 }
 0x2d8   :  { %5695 = vmatmul.mubr.msk.bf16.vlgmr.msra.gmra.mrb[24].mxu1 %vm441_vm15, %v1251_v16 }
 0x2d9   :  { %1603 = vmatprep.mubr.bf16.mxu1 %v5861_v2 }
 0x2da   :  { %v1507_v32 = vpop.permute.xlu1 %1506  ;;  %v1710_v33 = vpop.permute.xlu0 %1709 }
 0x2db   :  { %v1513_v34 = vsel %vm698_vm8, %v1505_v15, %v1507_v32  ;;  %v1514_v35 = vsel %vm698_vm8, %v1507_v32, %v1509_v29  ;;  %v1718_v31 = vsel %vm376_vm7, %v1708_v28, %v1710_v33 }
 0x2dc   :  { %5699 = vmatmul.mubr.msk.bf16.vlgmr.msra.gmra.mrb[28].mxu0 %vm441_vm15, %v1458_v30  ;;  %5700 = vmatprep.subr.msk.bf16.mxu1 %vm445_vm14, %v1514_v35  ;;  %v1525_v36 = vsel %vm445_vm14, %v1513_v34, 0  ;;  %v1726_v41 = vsel %vm445_vm14, %v1718_v31, 0 }
 0x2dd   :  { %1572 = vmatpush1.bf16.msra.mxu1 %v1525_v36  ;;  %1769 = vmatprep.mubr.bf16.mxu0 %v5861_v2 }
 0x2de   :  { %v1712_v38 = vpop.permute.xlu1 %1711  ;;  %v1915_v39 = vpop.permute.xlu0 %1914 }
 0x2df   :  { %v1719_v40 = vsel %vm376_vm7, %v1710_v33, %v1712_v38 }
 0x2e0   :  { %5701 = vmatmul.mubr.msk.bf16.vlgmr.msra.gmra.mrb[28].mxu1 %vm441_vm15, %v1458_v30  ;;  %5704 = vmatprep.subr.msk.bf16.mxu0 %vm445_vm14, %v1719_v40 }
 0x2e1   :  { %1738 = vmatpush1.bf16.msra.mxu0 %v1726_v41  ;;  %1810 = vmatprep.mubr.bf16.mxu1 %v5861_v2 }
 0x2e2   :  { %v1716_v43 = vpop.permute.xlu1 %1715  ;;  %v1714_v54 = vpop.permute.xlu0 %1713 }
 0x2e3   :  { %v1720_v53 = vsel %vm376_vm7, %v1712_v38, %v1714_v54  ;;  %v1721_v48 = vsel %vm376_vm7, %v1714_v54, %v1716_v43 }
 0x2e4   :  { %5705 = vmatmul.mubr.msk.bf16.vlgmr.msra.gmra.mrb[32].mxu0 %vm441_vm15, %v1665_v42  ;;  %5706 = vmatprep.subr.msk.bf16.mxu1 %vm445_vm14, %v1721_v48  ;;  %v1732_v50 = vsel %vm445_vm14, %v1720_v53, 0 }
 0x2e5   :  { %1779 = vmatpush1.bf16.msra.mxu1 %v1732_v50  ;;  %1976 = vmatprep.mubr.bf16.mxu0 %v5861_v2 }
 0x2e6   :  { %v1917_v52 = vpop.permute.xlu1 %1916  ;;  %v1919_v55 = vpop.permute.xlu0 %1918 }
 0x2e7   :  { %v1925_v44 = vsel %vm293_vm6, %v1915_v39, %v1917_v52  ;;  %v1926_v56 = vsel %vm293_vm6, %v1917_v52, %v1919_v55 }
 0x2e8   :  { %v1933_v45 = vsel %vm445_vm14, %v1925_v44, 0  ;;  %5707 = vmatmul.mubr.msk.bf16.vlgmr.msra.gmra.mrb[32].mxu1 %vm441_vm15, %v1665_v42  ;;  %5710 = vmatprep.subr.msk.bf16.mxu0 %vm445_vm14, %v1926_v56 }
 0x2e9   :  { %1945 = vmatpush1.bf16.msra.mxu0 %v1933_v45  ;;  %2017 = vmatprep.mubr.bf16.mxu1 %v5861_v2 }
 0x2ea   :  { %v1921_v46 = vpop.permute.xlu1 %1920  ;;  %v1923_v47 = vpop.permute.xlu0 %1922 }
 0x2eb   :  { %v1927_v58 = vsel %vm293_vm6, %v1919_v55, %v1921_v46  ;;  %v1928_v59 = vsel %vm293_vm6, %v1921_v46, %v1923_v47 }
 0x2ec   :  { %v1939_v60 = vsel %vm445_vm14, %v1927_v58, 0  ;;  %5711 = vmatmul.mubr.msk.bf16.vlgmr.msra.gmra.mrb[36].mxu0 %vm441_vm15, %v1872_v57  ;;  %5712 = vmatprep.subr.msk.bf16.mxu1 %vm445_vm14, %v1928_v59 }
 0x2ed   :  { %1986 = vmatpush1.bf16.msra.mxu1 %v1939_v60  ;;  %2296 = vmatprep.mubr.bf16.mxu0 %v5861_v2 }
 0x2f0   :  { %5713 = vmatmul.mubr.msk.bf16.vlgmr.msra.gmra.mrb[36].mxu1 %vm441_vm15, %v1872_v57 }
 0x2f1   :  { %2337 = vmatprep.mubr.bf16.mxu1 %v5861_v2 }
 0x37f   :  { %v492_v61 = vpop.f32.mrb[4].mxu0 }
 0x380   :  { %v494_v62 = vpop.f32.mrb[5].mxu0 }
 0x381   :  { %v496_v63 = vpop.f32.mrb[6].mxu0 }
 0x382   :  { %v497_v0 = vpop.f32.mrb[7].mxu0 }
 0x383   :  { %v533_v1 = vpop.f32.mrb[4].mxu1 }
 0x384   :  { %v535_v3 = vpop.f32.mrb[5].mxu1 }
 0x385   :  { %v537_v4 = vpop.f32.mrb[6].mxu1 }
 0x386   :  { %v538_v5 = vpop.f32.mrb[7].mxu1 }
 0x387   :  { %v609_v6 = vpop.f32.mrb[8].mxu0 }
 0x388   :  { %v610_v7 = vadd.f32 %v609_v6, %v492_v61  ;;  %v611_v8 = vpop.f32.mrb[9].mxu0 }
 0x389   :  { %v612_v9 = vadd.f32 %v611_v8, %v494_v62  ;;  %v613_v10 = vpop.f32.mrb[10].mxu0 }
 0x38a   :  { %v614_v11 = vpop.f32.mrb[11].mxu0 }
 0x38b   :  { %v650_v12 = vpop.f32.mrb[8].mxu1 }
 0x38c   :  { %v651_v15 = vadd.f32 %v650_v12, %v533_v1  ;;  %v652_v16 = vpop.f32.mrb[9].mxu1 }
 0x38d   :  { %v653_v17 = vadd.f32 %v652_v16, %v535_v3  ;;  %v654_v20 = vpop.f32.mrb[10].mxu1 }
 0x38e   :  { %v655_v21 = vpop.f32.mrb[11].mxu1 }
 0x38f   :  { %v812_v22 = vpop.f32.mrb[12].mxu0 }
 0x390   :  { %v860_v23 = vadd.f32 %v812_v22, %v610_v7  ;;  %v814_v24 = vpop.f32.mrb[13].mxu0 }
 0x391   :  { %v861_v25 = vadd.f32 %v814_v24, %v612_v9  ;;  %v816_v26 = vpop.f32.mrb[14].mxu0 }
 0x392   :  { %v817_v27 = vpop.f32.mrb[15].mxu0 }
 0x393   :  { %v853_v28 = vpop.f32.mrb[12].mxu1 }
 0x394   :  { %v862_v29 = vadd.f32 %v853_v28, %v651_v15  ;;  %v855_v30 = vpop.f32.mrb[13].mxu1 }
 0x395   :  { %v863_v32 = vadd.f32 %v855_v30, %v653_v17  ;;  %v857_v33 = vpop.f32.mrb[14].mxu1 }
 0x396   :  { %v858_v34 = vpop.f32.mrb[15].mxu1 }
 0x397   :  { %v1019_v35 = vpop.f32.mrb[16].mxu0 }
 0x398   :  { %v1067_v36 = vadd.f32 %v1019_v35, %v860_v23  ;;  %v1021_v31 = vpop.f32.mrb[17].mxu0 }
 0x399   :  { %v1068_v37 = vadd.f32 %v1021_v31, %v861_v25  ;;  %v1023_v38 = vpop.f32.mrb[18].mxu0 }
 0x39a   :  { %v1024_v39 = vpop.f32.mrb[19].mxu0 }
 0x39b   :  { %v1060_v40 = vpop.f32.mrb[16].mxu1  ;;  %v2034_v39 = vpop.permute.xlu1 %2033 }
 0x39c   :  { %v1069_v41 = vadd.f32 %v1060_v40, %v862_v29  ;;  %v1062_v42 = vpop.f32.mrb[17].mxu1 }
 0x39d   :  { %v1070_v43 = vadd.f32 %v1062_v42, %v863_v32  ;;  %v1064_v54 = vpop.f32.mrb[18].mxu1 }
 0x39e   :  { %v1065_v53 = vpop.f32.mrb[19].mxu1 }
 0x39f   :  { %v1150_v48 = vpop.f32.mrb[20].mxu0 }
 0x3a0   :  { %v1198_v50 = vadd.f32 %v1150_v48, %v1067_v36  ;;  %v1152_v51 = vpop.f32.mrb[21].mxu0 }
 0x3a1   :  { %v1199_v52 = vadd.f32 %v1152_v51, %v1068_v37  ;;  %v1154_v55 = vpop.f32.mrb[22].mxu0 }
 0x3a2   :  { %v1155_v44 = vpop.f32.mrb[23].mxu0 }
 0x3a3   :  { %v1191_v56 = vpop.f32.mrb[20].mxu1 }
 0x3a4   :  { %v1200_v45 = vadd.f32 %v1191_v56, %v1069_v41  ;;  %v1193_v57 = vpop.f32.mrb[21].mxu1 }
 0x3a5   :  { %v1201_v46 = vadd.f32 %v1193_v57, %v1070_v43  ;;  %v1195_v47 = vpop.f32.mrb[22].mxu1 }
 0x3a6   :  { %v1196_v58 = vpop.f32.mrb[23].mxu1 }
 0x3a7   :  { %v1357_v59 = vpop.f32.mrb[24].mxu0  ;;  %v2184_v58 = vpop.permute.xlu0 %2183 }
 0x3a8   :  { %v1405_v60 = vadd.f32 %v1357_v59, %v1198_v50  ;;  %v1359_v61 = vpop.f32.mrb[25].mxu0 }
 0x3a9   :  { %v1406_v62 = vadd.f32 %v1359_v61, %v1199_v52  ;;  %v1361_v63 = vpop.f32.mrb[26].mxu0  ;;  %v6441_v61 = vrot.slane %v2184_v58, 6 }
 0x3aa   :  { %v1362_v0 = vpop.f32.mrb[27].mxu0 }
 0x3ab   :  { %v1398_v1 = vpop.f32.mrb[24].mxu1 }
 0x3ac   :  { %v1407_v3 = vadd.f32 %v1398_v1, %v1200_v45  ;;  %v1400_v4 = vpop.f32.mrb[25].mxu1  ;;  %v6449_v1 = vsel %vm376_vm7, %v6441_v61, %v2184_v58 }
 0x3ad   :  { %v1408_v5 = vadd.f32 %v1400_v4, %v1201_v46  ;;  %v1402_v6 = vpop.f32.mrb[26].mxu1 }
 0x3ae   :  { %v1403_v7 = vpop.f32.mrb[27].mxu1 }
 0x3af   :  { %v1564_v8 = vpop.f32.mrb[28].mxu0 }
 0x3b0   :  { %v1612_v9 = vadd.f32 %v1564_v8, %v1405_v60  ;;  %v1566_v10 = vpop.f32.mrb[29].mxu0  ;;  %v2103_v60 = vpop.permute.xlu1 %2102 }
 0x3b1   :  { %v1613_v11 = vadd.f32 %v1566_v10, %v1406_v62  ;;  %v1568_v12 = vpop.f32.mrb[30].mxu0  ;;  %v2500_v62 = vpop.permute.xlu0 %2499  ;;  %v6443_v63 = vrot.slane %v2103_v60, 6 }
 0x3b2   :  { %v1569_v15 = vpop.f32.mrb[31].mxu0  ;;  %v6445_v0 = vrot.slane %v2500_v62, 6 }
 0x3b3   :  { %v1605_v16 = vpop.f32.mrb[28].mxu1 }
 0x3b4   :  { %v1614_v17 = vadd.f32 %v1605_v16, %v1407_v3  ;;  %v1607_v20 = vpop.f32.mrb[29].mxu1  ;;  %v6453_v3 = vsel %vm293_vm6, %v6443_v63, %v2103_v60  ;;  %v6461_v10 = vsel %vm698_vm8, %v6445_v0, %v2500_v62 }
 0x3b5   :  { %v1615_v21 = vadd.f32 %v1607_v20, %v1408_v5  ;;  %v1609_v22 = vpop.f32.mrb[30].mxu1 }
 0x3b6   :  { %v1610_v23 = vpop.f32.mrb[31].mxu1 }
 0x3b7   :  { %v1771_v24 = vpop.f32.mrb[32].mxu0 }
 0x3b8   :  { %v1819_v25 = vadd.f32 %v1771_v24, %v1612_v9  ;;  %v1773_v26 = vpop.f32.mrb[33].mxu0 }
 0x3b9   :  { %v1820_v27 = vadd.f32 %v1773_v26, %v1613_v11  ;;  %v1775_v28 = vpop.f32.mrb[34].mxu0 }
 0x3ba   :  { %v1776_v29 = vpop.f32.mrb[35].mxu0 }
 0x3bb   :  { %v1812_v30 = vpop.f32.mrb[32].mxu1  ;;  %v2704_v29 = vpop.permute.xlu1 %2703 }
 0x3bc   :  { %v1821_v32 = vadd.f32 %v1812_v30, %v1614_v17  ;;  %v1814_v33 = vpop.f32.mrb[33].mxu1 }
 0x3bd   :  { %v1822_v34 = vadd.f32 %v1814_v33, %v1615_v21  ;;  %v1816_v35 = vpop.f32.mrb[34].mxu1 }
 0x3be   :  { %v1817_v36 = vpop.f32.mrb[35].mxu1 }
 0x3bf   :  { %v1978_v31 = vpop.f32.mrb[36].mxu0  ;;  %v6476_v36 = vrot.slane %v2704_v29, 6 }
 0x3c0   :  { %v2026_v37 = vadd.f32 %v1978_v31, %v1819_v25  ;;  %v1980_v38 = vpop.f32.mrb[37].mxu0 }
 0x3c1   :  { %v2027_v40 = vadd.f32 %v1980_v38, %v1820_v27  ;;  %v1982_v41 = vpop.f32.mrb[38].mxu0 }
 0x3c2   :  { %v6421_v42 = vadd.f32 %v2034_v39, %v2026_v37  ;;  %v1983_v43 = vpop.f32.mrb[39].mxu0 }
 0x3c3   :  { %v6423_v54 = vadd.f32 %v2034_v39, %v2027_v40  ;;  %v2019_v53 = vpop.f32.mrb[36].mxu1  ;;  %v6483_v40 = vsel %vm905_vm9, %v6476_v36, %v2704_v29  ;;  %v3002_v29 = vld [vmem:[#allocation3 + $0xa] sm:$0x3] }
 0x3c4   :  { %v2028_v48 = vadd.f32 %v2019_v53, %v1821_v32  ;;  %v2021_v50 = vpop.f32.mrb[37].mxu1 }
 0x3c5   :  { %v2046_v51 = vcombine.low %v6421_v42, %v6423_v54  ;;  %v2029_v52 = vadd.f32 %v2021_v50, %v1822_v34  ;;  %v2023_v55 = vpop.f32.mrb[38].mxu1 }
 0x3c6   :  { %v6427_v44 = vadd.f32 %v2034_v39, %v2028_v48  ;;  %v2024_v56 = vpop.f32.mrb[39].mxu1 }
 0x3c7   :  { %v6429_v45 = vadd.f32 %v2034_v39, %v2029_v52  ;;  %v2054_v46 = vrot.slane %v2046_v51, %v6010_v49  ;;  %v3039_v52 = vpop.permute.xlu0 %3038 }
 0x3c8   :  { %v6492_v62 = vrot.slane %v3039_v52, 6 }
 0x3c9   :  { %v2047_v57 = vcombine.low %v6427_v44, %v6429_v45 }
 0x3cb   :  { %v6435_v47 = vrot.slane %v2047_v57, %v6010_v49 }
 0x3cd   :  { %v6438_v59 = vcombine.low %v2054_v46, %v6435_v47 }
 0x3cf   :  { %2064 = vst [vmem:[#allocation3 + $0x2] sm:$0xff] %v6438_v59 }
 0x3d6   :  { %v2065_v4 = vld [vmem:[#allocation3] sm:$0xff]  ;;  %v2066_v5 = vld [vmem:[#allocation3 + $0x8] sm:$0x3] }
 0x3d7   :  { %v2189_v6 = vmul.f32 %v6449_v1, %v2065_v4  ;;  %v2108_v7 = vmul.f32 %v6453_v3, %v2065_v4  ;;  %v2190_v8 = vmul.f32 %v6441_v61, %v2066_v5  ;;  %v2109_v9 = vmul.f32 %v6443_v63, %v2066_v5  ;;  %v2463_v22 = vld [vmem:[#allocation3 + $0x8] sm:$0x3] }
 0x3d8   :  { %v2505_v15 = vmul.f32 %v6461_v10, %v2065_v4  ;;  %v2506_v24 = vmul.f32 %v6445_v0, %v2463_v22  ;;  %v2709_v43 = vmul.f32 %v6483_v40, %v2065_v4  ;;  %v2667_v60 = vld [vmem:[#allocation3 + $0x8] sm:$0x3] }
 0x3d9   :  { %v2203_v11 = vrot.slane %v2189_v6, %v6010_v49  ;;  %v2121_v12 = vrot.slane %v2108_v7, %v6010_v49  ;;  %v2219_v20 = vrot.slane %v2190_v8, %v6010_v49  ;;  %v2137_v21 = vrot.slane %v2109_v9, %v6010_v49 }
 0x3da   :  { %v2519_v23 = vrot.slane %v2505_v15, %v6010_v49  ;;  %v2114_v28 = vcombine.high %v2108_v7, %v2108_v7  ;;  %v2535_v30 = vrot.slane %v2506_v24, %v6010_v49  ;;  %v2196_v35 = vcombine.high %v2189_v6, %v2189_v6 }
 0x3db   :  { %v2225_v16 = vpack.c.bf16 %v2203_v11, %v2203_v11  ;;  %v2143_v17 = vpack.c.bf16 %v2121_v12, %v2121_v12  ;;  %v2229_v25 = vpack.c.bf16 %v2219_v20, %v2219_v20  ;;  %v2147_v26 = vpack.c.bf16 %v2137_v21, %v2137_v21 }
 0x3dc   :  { %v2211_v27 = vcombine.high %v2203_v11, %v2203_v11  ;;  %v2541_v32 = vpack.c.bf16 %v2519_v23, %v2519_v23  ;;  %v2128_v34 = vrot.slane %v2114_v28, %v6010_v49  ;;  %v2545_v31 = vpack.c.bf16 %v2535_v30, %v2535_v30  ;;  %v3243_v11 = vpop.permute.xlu1 %3242  ;;  %v3447_v30 = vpop.permute.xlu0 %3446 }
 0x3dd   :  { %2235 = vrot.lane.b32.xlu0 %v2225_v16, %s5871_s17  ;;  %2351 = vrot.lane.b32.xlu1 %v2143_v17, %s5864_s27  ;;  %v2210_v38 = vrot.slane %v2196_v35, %v6010_v49  ;;  %v2527_v39 = vcombine.high %v2519_v23, %v2519_v23  ;;  %v2129_v41 = vcombine.high %v2121_v12, %v2121_v12  ;;  %v6507_v21 = vrot.slane %v3243_v11, 6 }
 0x3de   :  { %v2226_v33 = vpack.c.bf16 %v2211_v27, %v2211_v27  ;;  %v2145_v37 = vpack.c.bf16 %v2128_v34, %v2128_v34  ;;  %v2512_v51 = vcombine.high %v2505_v15, %v2505_v15  ;;  %v2723_v55 = vrot.slane %v2709_v43, %v6010_v49 }
 0x3df   :  { %v2227_v53 = vpack.c.bf16 %v2210_v38, %v2210_v38  ;;  %v2542_v48 = vpack.c.bf16 %v2527_v39, %v2527_v39  ;;  %v2212_v50 = vcombine.high %v2210_v38, %v2210_v38  ;;  %v2144_v56 = vpack.c.bf16 %v2129_v41, %v2129_v41  ;;  %v3206_v39 = vld [vmem:[#allocation3 + $0xa] sm:$0x3] }
 0x3e0   :  { %v2526_v46 = vrot.slane %v2512_v51, %v6010_v49  ;;  %v2716_v58 = vcombine.high %v2709_v43, %v2709_v43  ;;  %v2710_v4 = vmul.f32 %v6476_v36, %v2667_v60  ;;  %v2745_v6 = vpack.c.bf16 %v2723_v55, %v2723_v55 }
 0x3e1   :  { %2243 = vrot.lane.b32.xlu0 %v2229_v25, %s5871_s17  ;;  %2359 = vrot.lane.b32.xlu1 %v2147_v26, %s5864_s27  ;;  %v2228_v57 = vpack.c.bf16 %v2212_v50, %v2212_v50  ;;  %v2130_v8 = vcombine.high %v2128_v34, %v2128_v34  ;;  %v6500_v9 = vsel %vm965_vm10, %v6492_v62, %v3039_v52 }
 0x3e2   :  { %v2543_v5 = vpack.c.bf16 %v2526_v46, %v2526_v46  ;;  %v2730_v7 = vrot.slane %v2716_v58, %v6010_v49  ;;  %v3044_v12 = vmul.f32 %v6500_v9, %v6438_v59  ;;  %v2739_v17 = vrot.slane %v2710_v4, %v6010_v49  ;;  %v3651_v58 = vpop.permute.xlu1 %3650 }
 0x3e3   :  { %v2146_v16 = vpack.c.bf16 %v2130_v8, %v2130_v8  ;;  %v2731_v20 = vcombine.high %v2723_v55, %v2723_v55  ;;  %v2528_v25 = vcombine.high %v2526_v46, %v2526_v46  ;;  %v6514_v27 = vsel %vm758_vm11, %v6507_v21, %v3243_v11  ;;  %v3410_v11 = vld [vmem:[#allocation3 + $0xa] sm:$0x3] }
 0x3e4   :  { %v2747_v15 = vpack.c.bf16 %v2730_v7, %v2730_v7  ;;  %v3058_v22 = vrot.slane %v3044_v12, %v6010_v49  ;;  %v2749_v23 = vpack.c.bf16 %v2739_v17, %v2739_v17  ;;  %v3051_v26 = vcombine.high %v3044_v12, %v3044_v12 }
 0x3e5   :  { %2551 = vrot.lane.b32.xlu0 %v2541_v32, %s5870_s16  ;;  %2237 = vrot.lane.b32.xlu1 %v2226_v33, %s5871_s17  ;;  %v2746_v24 = vpack.c.bf16 %v2731_v20, %v2731_v20  ;;  %v3248_v28 = vmul.f32 %v6514_v27, %v6438_v59  ;;  %v2544_v32 = vpack.c.bf16 %v2528_v25, %v2528_v25  ;;  %v6542_v8 = vrot.slane %v3651_v58, 6 }
 0x3e6   :  { %v3080_v33 = vpack.c.bf16 %v3058_v22, %v3058_v22  ;;  %v3066_v34 = vcombine.high %v3058_v22, %v3058_v22  ;;  %v3065_v35 = vrot.slane %v3051_v26, %v6010_v49  ;;  %v3249_v51 = vmul.f32 %v6507_v21, %v3206_v39 }
 0x3e7   :  { %v3262_v38 = vrot.slane %v3248_v28, %v6010_v49  ;;  %v6548_v20 = vsel %vm555_vm13, %v6542_v8, %v3651_v58 }
 0x3e8   :  { %v3081_v41 = vpack.c.bf16 %v3066_v34, %v3066_v34  ;;  %v3082_v43 = vpack.c.bf16 %v3065_v35, %v3065_v35  ;;  %v3278_v60 = vrot.slane %v3249_v51, %v6010_v49  ;;  %v3067_v26 = vcombine.high %v3065_v35, %v3065_v35 }
 0x3e9   :  { %2559 = vrot.lane.b32.xlu0 %v2545_v31, %s5870_s16  ;;  %2355 = vrot.lane.b32.xlu1 %v2145_v37, %s5864_s27  ;;  %v3045_v31 = vmul.f32 %v6492_v62, %v3002_v29  ;;  %v6524_v37 = vrot.slane %v3447_v30, 6  ;;  %v3284_v55 = vpack.c.bf16 %v3262_v38, %v3262_v38 }
 0x3ea   :  { %v3288_v12 = vpack.c.bf16 %v3278_v60, %v3278_v60 }
 0x3eb   :  { %v6531_v50 = vsel %vm436_vm12, %v6524_v37, %v3447_v30  ;;  %v3074_v52 = vrot.slane %v3045_v31, %v6010_v49  ;;  %v3453_v22 = vmul.f32 %v6524_v37, %v3410_v11  ;;  %v3614_v30 = vld [vmem:[#allocation3 + $0xa] sm:$0x3]  ;;  %v3818_v11 = vld [vmem:[#allocation2 + $0x8] sm:$0x3] }
 0x3ec   :  { %v3452_v46 = vmul.f32 %v6531_v50, %v6438_v59  ;;  %v3657_v35 = vmul.f32 %v6542_v8, %v3614_v30  ;;  %v3820_v30 = vmul.f32 %v3818_v11, %v6443_v63 }
 0x3ed   :  { %2239 = vrot.lane.b32.xlu0 %v2227_v53, %s5871_s17  ;;  %2553 = vrot.lane.b32.xlu1 %v2542_v48, %s5870_s16  ;;  %v2732_v53 = vcombine.high %v2730_v7, %v2730_v7  ;;  %v3255_v48 = vcombine.high %v3248_v28, %v3248_v28  ;;  %v3482_v29 = vrot.slane %v3453_v22, %v6010_v49 }
 0x3ee   :  { %v3466_v7 = vrot.slane %v3452_v46, %v6010_v49  ;;  %v3459_v17 = vcombine.high %v3452_v46, %v3452_v46 }
 0x3ef   :  { %v3492_v39 = vpack.c.bf16 %v3482_v29, %v3482_v29 }
 0x3f0   :  { %v3488_v25 = vpack.c.bf16 %v3466_v7, %v3466_v7  ;;  %v3473_v28 = vrot.slane %v3459_v17, %v6010_v49 }
 0x3f1   :  { %2353 = vrot.lane.b32.xlu0 %v2144_v56, %s5864_s27  ;;  %2241 = vrot.lane.b32.xlu1 %v2228_v57, %s5871_s17  ;;  %v2748_v56 = vpack.c.bf16 %v2732_v53, %v2732_v53  ;;  %v3269_v57 = vrot.slane %v3255_v48, %v6010_v49  ;;  %v5857_v53 = vld [vmem:[#allocation2] sm:$0xff] }
 0x3f2   :  { %v3859_v48 = vmul.f32 %v5857_v53, %v6449_v1 }
 0x3f3   :  { %v3286_v4 = vpack.c.bf16 %v3269_v57, %v3269_v57 }
 0x3f4   :  { %v3873_v46 = vrot.slane %v3859_v48, %v6010_v49  ;;  %v3866_v58 = vcombine.high %v3859_v48, %v3859_v48 }
 0x3f5   :  { %2555 = vrot.lane.b32.xlu0 %v2543_v5, %s5870_s16  ;;  %2755 = vrot.lane.b32.xlu1 %v2745_v6, %s5869_s30  ;;  %v3084_v5 = vpack.c.bf16 %v3074_v52, %v3074_v52  ;;  %v3270_v6 = vcombine.high %v3262_v38, %v3262_v38 }
 0x3f6   :  { %v3881_v1 = vcombine.high %v3873_v46, %v3873_v46 }
 0x3f9   :  { %2759 = vrot.lane.b32.xlu1 %v2747_v15, %s5869_s30  ;;  %2357 = vrot.lane.b32.xlu0 %v2146_v16, %s5864_s27  ;;  %v3285_v15 = vpack.c.bf16 %v3270_v6, %v3270_v6  ;;  %v3474_v16 = vcombine.high %v3466_v7, %v3466_v7  ;;  %v3895_v6 = vpack.c.bf16 %v3873_v46, %v3873_v46 }
 0x3fa   :  { %v3880_v7 = vrot.slane %v3866_v58, %v6010_v49 }
 0x3fc   :  { %v3897_v17 = vpack.c.bf16 %v3880_v7, %v3880_v7  ;;  %v3882_v22 = vcombine.high %v3880_v7, %v3880_v7 }
 0x3fd   :  { %2763 = vrot.lane.b32.xlu1 %v2749_v23, %s5869_s30  ;;  %2757 = vrot.lane.b32.xlu0 %v2746_v24, %s5869_s30  ;;  %v3656_v23 = vmul.f32 %v6548_v20, %v6438_v59  ;;  %v3489_v24 = vpack.c.bf16 %v3474_v16, %v3474_v16  ;;  %v3819_v16 = vmul.f32 %v5857_v53, %v6453_v3 }
 0x3ff   :  { %v3670_v34 = vrot.slane %v3656_v23, %v6010_v49  ;;  %v3663_v31 = vcombine.high %v3656_v23, %v3656_v23 }
 0x401   :  { %2557 = vrot.lane.b32.xlu1 %v2544_v32, %s5870_s16  ;;  %3090 = vrot.lane.b32.xlu0 %v3080_v33, %s5868_s29  ;;  %v3083_v32 = vpack.c.bf16 %v3067_v26, %v3067_v26  ;;  %v3490_v33 = vpack.c.bf16 %v3473_v28, %v3473_v28  ;;  %v3692_v38 = vpack.c.bf16 %v3670_v34, %v3670_v34 }
 0x402   :  { %v3832_v26 = vrot.slane %v3819_v16, %v6010_v49 }
 0x405   :  { %3092 = vrot.lane.b32.xlu1 %v3081_v41, %s5868_s29  ;;  %3094 = vrot.lane.b32.xlu0 %v3082_v43, %s5868_s29  ;;  %v3677_v41 = vrot.slane %v3663_v31, %v6010_v49  ;;  %v3271_v43 = vcombine.high %v3269_v57, %v3269_v57 }
 0x407   :  { %v3694_v51 = vpack.c.bf16 %v3677_v41, %v3677_v41  ;;  %v3287_v52 = vpack.c.bf16 %v3271_v43, %v3271_v43  ;;  %v3679_v23 = vcombine.high %v3677_v41, %v3677_v41  ;;  %v3848_v41 = vrot.slane %v3820_v30, %v6010_v49 }
 0x409   :  { %3294 = vrot.lane.b32.xlu1 %v3284_v55, %s5867_s28  ;;  %2761 = vrot.lane.b32.xlu0 %v2748_v56, %s5869_s30  ;;  %v3686_v55 = vrot.slane %v3657_v35, %v6010_v49  ;;  %v3678_v56 = vcombine.high %v3670_v34, %v3670_v34  ;;  %v3695_v29 = vpack.c.bf16 %v3679_v23, %v3679_v23 }
 0x40a   :  { %v3854_v34 = vpack.c.bf16 %v3832_v26, %v3832_v26 }
 0x40b   :  { %v3696_v57 = vpack.c.bf16 %v3686_v55, %v3686_v55  ;;  %v3693_v60 = vpack.c.bf16 %v3678_v56, %v3678_v56  ;;  %v4295_v55 = vld [vmem:[#allocation2] sm:$0xff] }
 0x40c   :  { %v4297_v58 = vmul.f32 %v4295_v55, %v6483_v40  ;;  %v4296_v40 = vld [vmem:[#allocation2 + $0x8] sm:$0x3]  ;;  %v4753_v55 = vld [vmem:[#allocation2 + $0xa] sm:$0x3] }
 0x40d   :  { %3298 = vrot.lane.b32.xlu1 %v3286_v4, %s5867_s28  ;;  %3098 = vrot.lane.b32.xlu0 %v3084_v5, %s5868_s29  ;;  %v3475_v4 = vcombine.high %v3473_v28, %v3473_v28  ;;  %v3898_v28 = vpack.c.bf16 %v3882_v22, %v3882_v22 }
 0x40f   :  { %v3491_v5 = vpack.c.bf16 %v3475_v4, %v3475_v4  ;;  %v4304_v4 = vcombine.high %v4297_v58, %v4297_v58 }
 0x411   :  { %3302 = vrot.lane.b32.xlu1 %v3288_v12, %s5867_s28  ;;  %3296 = vrot.lane.b32.xlu0 %v3285_v15, %s5867_s28  ;;  %v3860_v12 = vmul.f32 %v3818_v11, %v6441_v61  ;;  %v3896_v15 = vpack.c.bf16 %v3881_v1, %v3881_v1  ;;  %v4134_v61 = vmul.f32 %v5857_v53, %v6461_v10 }
 0x412   :  { %v3858_v53 = vpack.c.bf16 %v3848_v41, %v3848_v41  ;;  %v4311_v1 = vrot.slane %v4297_v58, %v6010_v49 }
 0x413   :  { %v4141_v31 = vcombine.high %v4134_v61, %v4134_v61  ;;  %v4148_v35 = vrot.slane %v4134_v61, %v6010_v49 }
 0x415   :  { %3500 = vrot.lane.b32.xlu1 %v3489_v24, %s5863_s26  ;;  %3498 = vrot.lane.b32.xlu0 %v3488_v25, %s5863_s26  ;;  %v3889_v24 = vrot.slane %v3860_v12, %v6010_v49  ;;  %v3825_v25 = vcombine.high %v3819_v16, %v3819_v16  ;;  %v4155_v63 = vrot.slane %v4141_v31, %v6010_v49 }
 0x416   :  { %v4156_v10 = vcombine.high %v4148_v35, %v4148_v35  ;;  %v4170_v56 = vpack.c.bf16 %v4148_v35, %v4148_v35  ;;  %v4298_v12 = vmul.f32 %v4296_v40, %v6476_v36  ;;  %v4319_v16 = vcombine.high %v4311_v1, %v4311_v1  ;;  %v4590_v36 = vld [vmem:[#allocation2 + $0xa] sm:$0x3] }
 0x417   :  { %v3899_v3 = vpack.c.bf16 %v3889_v24, %v3889_v24 }
 0x418   :  { %v4171_v46 = vpack.c.bf16 %v4156_v10, %v4156_v10  ;;  %v4334_v24 = vpack.c.bf16 %v4319_v16, %v4319_v16 }
 0x419   :  { %3096 = vrot.lane.b32.xlu1 %v3083_v32, %s5868_s29  ;;  %3502 = vrot.lane.b32.xlu0 %v3490_v33, %s5863_s26  ;;  %v3839_v32 = vrot.slane %v3825_v25, %v6010_v49  ;;  %v3840_v33 = vcombine.high %v3832_v26, %v3832_v26  ;;  %v4327_v26 = vrot.slane %v4298_v12, %v6010_v49 }
 0x41b   :  { %v3841_v43 = vcombine.high %v3839_v32, %v3839_v32  ;;  %v4337_v30 = vpack.c.bf16 %v4327_v26, %v4327_v26 }
 0x41d   :  { %3702 = vrot.lane.b32.xlu1 %v3692_v38, %s5866_s2  ;;  %3506 = vrot.lane.b32.xlu0 %v3492_v39, %s5863_s26  ;;  %v3855_v38 = vpack.c.bf16 %v3840_v33, %v3840_v33  ;;  %v3856_v39 = vpack.c.bf16 %v3839_v32, %v3839_v32  ;;  %v3857_v48 = vpack.c.bf16 %v3841_v43, %v3841_v43 }
 0x41e   :  { %v4592_v33 = vmul.f32 %v4590_v36, %v6492_v62 }
 0x421   :  { %3706 = vrot.lane.b32.xlu1 %v3694_v51, %s5866_s2  ;;  %3300 = vrot.lane.b32.xlu0 %v3287_v52, %s5867_s28  ;;  %v4133_v51 = vld [vmem:[#allocation2 + $0x8] sm:$0x3] }
 0x422   :  { %v4135_v52 = vmul.f32 %v4133_v51, %v6445_v0  ;;  %v5858_v0 = vld [vmem:[#allocation2 + $0x2] sm:$0xff] }
 0x423   :  { %v4591_v7 = vmul.f32 %v5858_v0, %v6500_v9 }
 0x425   :  { %3710 = vrot.lane.b32.xlu1 %v3696_v57, %s5866_s2  ;;  %3704 = vrot.lane.b32.xlu0 %v3693_v60, %s5866_s2  ;;  %v4157_v57 = vcombine.high %v4155_v63, %v4155_v63  ;;  %v4164_v60 = vrot.slane %v4135_v52, %v6010_v49  ;;  %v4598_v22 = vcombine.high %v4591_v7, %v4591_v7 }
 0x426   :  { %v4605_v23 = vrot.slane %v4591_v7, %v6010_v49  ;;  %v4621_v52 = vrot.slane %v4592_v33, %v6010_v49 }
 0x427   :  { %v4174_v11 = vpack.c.bf16 %v4164_v60, %v4164_v60 }
 0x428   :  { %v4627_v31 = vpack.c.bf16 %v4605_v23, %v4605_v23 }
 0x429   :  { %3504 = vrot.lane.b32.xlu1 %v3491_v5, %s5863_s26  ;;  %3905 = vrot.lane.b32.xlu0 %v3895_v6, %s5871_s17  ;;  %v4173_v5 = vpack.c.bf16 %v4157_v57, %v4157_v57  ;;  %v4172_v6 = vpack.c.bf16 %v4155_v63, %v4155_v63 }
 0x42d   :  { %3907 = vrot.lane.b32.xlu1 %v3896_v15, %s5871_s17  ;;  %3909 = vrot.lane.b32.xlu0 %v3897_v17, %s5871_s17  ;;  %v4318_v15 = vrot.slane %v4304_v4, %v6010_v49  ;;  %v4333_v17 = vpack.c.bf16 %v4311_v1, %v4311_v1  ;;  %v4631_v4 = vpack.c.bf16 %v4621_v52, %v4621_v52 }
 0x42f   :  { %v4335_v25 = vpack.c.bf16 %v4318_v15, %v4318_v15  ;;  %v4320_v9 = vcombine.high %v4318_v15, %v4318_v15 }
 0x431   :  { %3911 = vrot.lane.b32.xlu1 %v3898_v28, %s5871_s17  ;;  %3708 = vrot.lane.b32.xlu0 %v3695_v29, %s5866_s2  ;;  %v4612_v28 = vrot.slane %v4598_v22, %v6010_v49  ;;  %v4613_v29 = vcombine.high %v4605_v23, %v4605_v23  ;;  %v4336_v32 = vpack.c.bf16 %v4320_v9, %v4320_v9 }
 0x433   :  { %v4628_v35 = vpack.c.bf16 %v4613_v29, %v4613_v29  ;;  %v4614_v43 = vcombine.high %v4612_v28, %v4612_v28  ;;  %v4629_v63 = vpack.c.bf16 %v4612_v28, %v4612_v28 }
 0x435   :  { %4021 = vrot.lane.b32.xlu1 %v3854_v34, %s5864_s27  ;;  %3913 = vrot.lane.b32.xlu0 %v3899_v3, %s5871_s17  ;;  %v6617_v34 = vld [vmem:[#allocation2 + $0x2] sm:$0xff]  ;;  %v4630_v51 = vpack.c.bf16 %v4614_v43, %v4614_v43 }
 0x439   :  { %4025 = vrot.lane.b32.xlu1 %v3856_v39, %s5864_s27  ;;  %4023 = vrot.lane.b32.xlu0 %v3855_v38, %s5864_s27  ;;  %v4754_v38 = vmul.f32 %v6617_v34, %v6514_v27  ;;  %v4917_v27 = vmul.f32 %v6617_v34, %v6531_v50  ;;  %v5715_v50 = vld [vmem:[%s7032_s7 + $0x2] sm:$0x3] }
 0x43b   :  { %v4761_v10 = vcombine.high %v4754_v38, %v4754_v38 }
 0x43d   :  { %4029 = vrot.lane.b32.xlu1 %v3858_v53, %s5864_s27  ;;  %4027 = vrot.lane.b32.xlu0 %v3857_v48, %s5864_s27  ;;  %v4768_v53 = vrot.slane %v4754_v38, %v6010_v49  ;;  %v5080_v38 = vmul.f32 %v6617_v34, %v6548_v20 }
 0x43f   :  { %v4790_v58 = vpack.c.bf16 %v4768_v53, %v4768_v53  ;;  %v4776_v1 = vcombine.high %v4768_v53, %v4768_v53  ;;  %v5087_v34 = vcombine.high %v5080_v38, %v5080_v38  ;;  %v5094_v52 = vrot.slane %v5080_v38, %v6010_v49 }
 0x441   :  { %4182 = vrot.lane.b32.xlu1 %v4171_v46, %s5870_s16  ;;  %4180 = vrot.lane.b32.xlu0 %v4170_v56, %s5870_s16  ;;  %v4755_v56 = vmul.f32 %v4753_v55, %v6507_v21  ;;  %v4775_v46 = vrot.slane %v4761_v10, %v6010_v49  ;;  %v4924_v21 = vcombine.high %v4917_v27, %v4917_v27 }
 0x442   :  { %v4791_v12 = vpack.c.bf16 %v4776_v1, %v4776_v1 }
 0x443   :  { %v4792_v40 = vpack.c.bf16 %v4775_v46, %v4775_v46  ;;  %v4777_v22 = vcombine.high %v4775_v46, %v4775_v46  ;;  %v4938_v23 = vrot.slane %v4924_v21, %v6010_v49  ;;  %v5101_v21 = vrot.slane %v5087_v34, %v6010_v49 }
 0x445   :  { %4186 = vrot.lane.b32.xlu1 %v4173_v5, %s5870_s16  ;;  %4184 = vrot.lane.b32.xlu0 %v4172_v6, %s5870_s16  ;;  %v4931_v6 = vrot.slane %v4917_v27, %v6010_v49  ;;  %v4793_v33 = vpack.c.bf16 %v4777_v22, %v4777_v22  ;;  %v4955_v1 = vpack.c.bf16 %v4938_v23, %v4938_v23 }
 0x449   :  { %4343 = vrot.lane.b32.xlu1 %v4333_v17, %s5869_s30  ;;  %4188 = vrot.lane.b32.xlu0 %v4174_v11, %s5870_s16  ;;  %v4784_v11 = vrot.slane %v4755_v56, %v6010_v49  ;;  %v2193_v17 = vpack.c.bf16 %v5715_v50, %v5715_v50  ;;  %v5079_v56 = vld [vmem:[#allocation2 + $0xa] sm:$0x3] }
 0x44a   :  { %v5081_v50 = vmul.f32 %v5079_v56, %v6542_v8  ;;  %v5860_v8 = vcombine.low %v6435_v47, %v6435_v47 }
 0x44b   :  { %v4794_v9 = vpack.c.bf16 %v4784_v11, %v4784_v11 }
 0x44d   :  { %4347 = vrot.lane.b32.xlu1 %v4335_v25, %s5869_s30  ;;  %4345 = vrot.lane.b32.xlu0 %v4334_v24, %s5869_s30  ;;  %v4939_v24 = vcombine.high %v4931_v6, %v4931_v6 }
 0x44f   :  { %v2236_v61 = vpop.permute.xlu0 %2235  ;;  %v2352_v3 = vpop.permute.xlu1 %2351 }
 0x451   :  { %4351 = vrot.lane.b32.xlu1 %v4337_v30, %s5869_s30  ;;  %4349 = vrot.lane.b32.xlu0 %v4336_v32, %s5869_s30 }
 0x453   :  { %v2244_v39 = vpop.permute.xlu0 %2243  ;;  %v6621_v41 = vpop.permute.xlu1 %2359 }
 0x455   :  { %4639 = vrot.lane.b32.xlu1 %v4628_v35, %s5868_s29  ;;  %4637 = vrot.lane.b32.xlu0 %v4627_v31, %s5868_s29  ;;  %v4916_v31 = vld [vmem:[#allocation2 + $0xa] sm:$0x3]  ;;  %v4954_v35 = vpack.c.bf16 %v4939_v24, %v4939_v24  ;;  %v5110_v24 = vrot.slane %v5081_v50, %v6010_v49 }
 0x456   :  { %v4918_v53 = vmul.f32 %v4916_v31, %v6524_v37 }
 0x457   :  { %v6626_v62 = vpop.permute.xlu0 %2551  ;;  %v2238_v48 = vpop.permute.xlu1 %2237 }
 0x458   :  { %v2245_v5 = vsel %vm436_vm12, %v2236_v61, %v2238_v48 }
 0x459   :  { %4643 = vrot.lane.b32.xlu1 %v4630_v51, %s5868_s29  ;;  %4641 = vrot.lane.b32.xlu0 %v4629_v63, %s5868_s29  ;;  %v2253_v16 = vsel %vm445_vm14, %v2245_v5, 0  ;;  %v4940_v63 = vcombine.high %v4938_v23, %v4938_v23  ;;  %v4947_v5 = vrot.slane %v4918_v53, %v6010_v49  ;;  %v5118_v23 = vpack.c.bf16 %v5101_v21, %v5101_v21 }
 0x45b   :  { %v6635_v57 = vpop.permute.xlu0 %2559  ;;  %v6637_v60 = vpop.permute.xlu1 %2355  ;;  %v4956_v37 = vpack.c.bf16 %v4940_v63, %v4940_v63 }
 0x45d   :  { %4800 = vrot.lane.b32.xlu1 %v4790_v58, %s5867_s28  ;;  %4645 = vrot.lane.b32.xlu0 %v4631_v4, %s5868_s29 }
 0x45f   :  { %v2240_v0 = vpop.permute.xlu0 %2239  ;;  %v2554_v7 = vpop.permute.xlu1 %2553 }
 0x460   :  { %v2246_v15 = vsel %vm436_vm12, %v2238_v48, %v2240_v0  ;;  %v4953_v48 = vpack.c.bf16 %v4931_v6, %v4931_v6  ;;  %v2561_v20 = vsel %vm758_vm11, %v6626_v62, %v2554_v7  ;;  %v5116_v6 = vpack.c.bf16 %v5094_v52, %v5094_v52 }
 0x461   :  { %5716 = vmatprep.subr.msk.bf16.mxu0 %vm445_vm14, %v2246_v15  ;;  %4804 = vrot.lane.b32.xlu1 %v4792_v40, %s5867_s28  ;;  %v2569_v58 = vsel %vm445_vm14, %v2561_v20, 0  ;;  %v5102_v40 = vcombine.high %v5094_v52, %v5094_v52  ;;  %v5736_v52 = vld [vmem:[%s7032_s7 + $0x8] sm:$0x3] }
 0x462   :  { %4802 = vrot.lane.b32.xlu0 %v4791_v12, %s5867_s28  ;;  %2265 = vmatpush1.bf16.msra.mxu0 %v2253_v16  ;;  %v4957_v12 = vpack.c.bf16 %v4947_v5, %v4947_v5  ;;  %v5742_v5 = vld [vmem:[%s7032_s7 + $0xa] sm:$0x3] }
 0x463   :  { %v2354_v25 = vpop.permute.xlu0 %2353  ;;  %v2242_v26 = vpop.permute.xlu1 %2241  ;;  %v3048_v50 = vpack.c.bf16 %v5742_v5, %v5742_v5 }
 0x464   :  { %v2361_v36 = vsel %vm555_vm13, %v2352_v3, %v2354_v25  ;;  %v2362_v28 = vsel %vm555_vm13, %v2354_v25, %v6637_v60  ;;  %v2247_v29 = vsel %vm436_vm12, %v2240_v0, %v2242_v26  ;;  %v2248_v61 = vsel %vm436_vm12, %v2242_v26, %v2244_v39  ;;  %v2110_v3 = vld [vmem:[%s7032_s7] sm:$0x3] }
 0x465   :  { %v2369_v30 = vsel %vm445_vm14, %v2361_v36, 0  ;;  %v2259_v32 = vsel %vm445_vm14, %v2247_v29, 0  ;;  %5717 = vmatmul.mubr.msk.bf16.vlgmr.msra.gmra.mrb[40].mxu0 %vm441_vm15, %v2193_v17  ;;  %4808 = vrot.lane.b32.xlu1 %v4794_v9, %s5867_s28  ;;  %v2111_v51 = vpack.c.bf16 %v2110_v3, %v2110_v3  ;;  %v5117_v25 = vpack.c.bf16 %v5102_v40, %v5102_v40 }
 0x466   :  { %5718 = vmatprep.subr.msk.bf16.mxu1 %vm445_vm14, %v2248_v61  ;;  %5720 = vmatprep.subr.msk.bf16.mxu0 %vm445_vm14, %v2362_v28  ;;  %v5103_v28 = vcombine.high %v5101_v21, %v5101_v21  ;;  %v2889_v29 = vrot.slane %v5860_v8, %v6010_v49  ;;  %v5748_v8 = vld [vmem:[%s7032_s7 + $0xc] sm:$0x3] }
 0x467   :  { %4806 = vrot.lane.b32.xlu0 %v4793_v33, %s5867_s28  ;;  %2306 = vmatpush1.bf16.msra.mxu1 %v2259_v32  ;;  %v2556_v39 = vpop.permute.xlu0 %2555  ;;  %v2756_v43 = vpop.permute.xlu1 %2755  ;;  %v5120_v33 = vpack.c.bf16 %v5110_v24, %v5110_v24 }
 0x468   :  { %2381 = vmatpush1.bf16.msra.mxu0 %v2369_v30  ;;  %v2562_v10 = vsel %vm758_vm11, %v2554_v7, %v2556_v39  ;;  %2412 = vmatprep.mubr.bf16.mxu0 %v5861_v2  ;;  %v5731_v30 = vld [vmem:[%s7032_s7 + $0x6] sm:$0x3]  ;;  %v5119_v31 = vpack.c.bf16 %v5103_v28, %v5103_v28  ;;  %v2891_v38 = vcombine.high %v2889_v29, %v2889_v29 }
 0x469   :  { %4965 = vrot.lane.b32.xlu1 %v4954_v35, %s5863_s26  ;;  %5726 = vmatprep.subr.msk.bf16.mxu0 %vm445_vm14, %v2562_v10  ;;  %v2713_v3 = vpack.c.bf16 %v5731_v30, %v5731_v30  ;;  %v2898_v34 = vpack.c.bf16 %v2889_v29, %v2889_v29 }
 0x46a   :  { %5719 = vmatmul.mubr.msk.bf16.vlgmr.msra.gmra.mrb[40].mxu1 %vm441_vm15, %v2193_v17 }
 0x46b   :  { %4963 = vrot.lane.b32.xlu0 %v4953_v48, %s5863_s26  ;;  %v6680_v55 = vpop.permute.xlu1 %2759  ;;  %v2358_v27 = vpop.permute.xlu0 %2357  ;;  %2453 = vmatprep.mubr.bf16.mxu1 %v5861_v2 }
 0x46c   :  { %v2363_v46 = vsel %vm555_vm13, %v6637_v60, %v2358_v27  ;;  %v2364_v62 = vsel %vm555_vm13, %v2358_v27, %v6621_v41  ;;  %v5725_v60 = vld [vmem:[%s7032_s7 + $0x4] sm:$0x3]  ;;  %v2882_v41 = vrot.slane %v6438_v59, %v6010_v49 }
 0x46d   :  { %v2375_v4 = vsel %vm445_vm14, %v2363_v46, 0  ;;  %4969 = vrot.lane.b32.xlu1 %v4956_v37, %s5863_s26  ;;  %5721 = vmatmul.mubr.msk.bf16.vlgmr.msra.gmra.mrb[44].mxu0 %vm441_vm15, %v2111_v51  ;;  %v2509_v59 = vpack.c.bf16 %v5725_v60, %v5725_v60  ;;  %v2873_v37 = vpack.c.bf16 %v5736_v52, %v5736_v52  ;;  %v2910_v46 = vsel %vm445_vm14, %v2898_v34, 0 }
 0x46e   :  { %2581 = vmatpush1.bf16.msra.mxu0 %v2569_v58  ;;  %5722 = vmatprep.subr.msk.bf16.mxu1 %vm445_vm14, %v2364_v62  ;;  %v2890_v16 = vcombine.high %v2882_v41, %v2882_v41  ;;  %v2896_v35 = vpack.c.bf16 %v2882_v41, %v2882_v41 }
 0x46f   :  { %4967 = vrot.lane.b32.xlu0 %v4955_v1, %s5863_s26  ;;  %2422 = vmatpush1.bf16.msra.mxu1 %v2375_v4  ;;  %v2764_v0 = vpop.permute.xlu1 %2763  ;;  %v2758_v7 = vpop.permute.xlu0 %2757 }
 0x470   :  { %v2766_v11 = vsel %vm965_vm10, %v2758_v7, %v6680_v55  ;;  %2612 = vmatprep.mubr.bf16.mxu0 %v5861_v2  ;;  %v2765_v15 = vsel %vm965_vm10, %v2756_v43, %v2758_v7  ;;  %v2897_v61 = vpack.c.bf16 %v2890_v16, %v2890_v16  ;;  %v2904_v48 = vsel %vm445_vm14, %v2896_v35, 0 }
 0x471   :  { %5126 = vrot.lane.b32.xlu1 %v5116_v6, %s5866_s2  ;;  %5732 = vmatprep.subr.msk.bf16.mxu0 %vm445_vm14, %v2766_v11  ;;  %v2773_v9 = vsel %vm445_vm14, %v2765_v15, 0 }
 0x472   :  { %5723 = vmatmul.mubr.msk.bf16.vlgmr.msra.gmra.mrb[44].mxu1 %vm441_vm15, %v2111_v51  ;;  %v2899_v51 = vpack.c.bf16 %v2891_v38, %v2891_v38 }
 0x473   :  { %4971 = vrot.lane.b32.xlu0 %v4957_v12, %s5863_s26  ;;  %v2558_v17 = vpop.permute.xlu1 %2557  ;;  %v3091_v22 = vpop.permute.xlu0 %3090  ;;  %2653 = vmatprep.mubr.bf16.mxu1 %v5861_v2 }
 0x474   :  { %v2563_v26 = vsel %vm758_vm11, %v2556_v39, %v2558_v17  ;;  %v2564_v47 = vsel %vm758_vm11, %v2558_v17, %v6635_v57  ;;  %v3252_v17 = vpack.c.bf16 %v5748_v8, %v5748_v8 }
 0x475   :  { %v2575_v36 = vsel %vm445_vm14, %v2563_v26, 0  ;;  %5130 = vrot.lane.b32.xlu1 %v5118_v23, %s5866_s2  ;;  %5727 = vmatmul.mubr.msk.bf16.vlgmr.msra.gmra.mrb[48].mxu0 %vm441_vm15, %v2509_v59 }
 0x476   :  { %5728 = vmatprep.subr.msk.bf16.mxu1 %vm445_vm14, %v2564_v47  ;;  %2785 = vmatpush1.bf16.msra.mxu0 %v2773_v9 }
 0x477   :  { %5128 = vrot.lane.b32.xlu0 %v5117_v25, %s5866_s2  ;;  %2622 = vmatpush1.bf16.msra.mxu1 %v2575_v36  ;;  %v3093_v57 = vpop.permute.xlu1 %3092  ;;  %v3095_v32 = vpop.permute.xlu0 %3094  ;;  %v5754_v36 = vld [vmem:[%s7032_s7 + $0xe] sm:$0x3] }
 0x478   :  { %5737 = vmatprep.subr.msk.bf16.mxu0 %vm445_vm14, %v2897_v61  ;;  %2816 = vmatprep.mubr.bf16.mxu0 %v5861_v2  ;;  %v3101_v20 = vsel %vm905_vm9, %v3093_v57, %v3095_v32  ;;  %v3100_v56 = vsel %vm905_vm9, %v3091_v22, %v3093_v57  ;;  %v3456_v30 = vpack.c.bf16 %v5754_v36, %v5754_v36 }
 0x479   :  { %5134 = vrot.lane.b32.xlu1 %v5120_v33, %s5866_s2  ;;  %v3108_v1 = vsel %vm445_vm14, %v3100_v56, 0 }
 0x47a   :  { %5729 = vmatmul.mubr.msk.bf16.vlgmr.msra.gmra.mrb[48].mxu1 %vm441_vm15, %v2509_v59 }
 0x47b   :  { %5132 = vrot.lane.b32.xlu0 %v5119_v31, %s5866_s2  ;;  %v3295_v39 = vpop.permute.xlu1 %3294  ;;  %v2762_v43 = vpop.permute.xlu0 %2761  ;;  %2857 = vmatprep.mubr.bf16.mxu1 %v5861_v2 }
 0x47c   :  { %v2767_v63 = vsel %vm965_vm10, %v6680_v55, %v2762_v43  ;;  %v2768_v10 = vsel %vm965_vm10, %v2762_v43, %v2764_v0 }
 0x47d   :  { %v2779_v53 = vsel %vm445_vm14, %v2767_v63, 0  ;;  %5733 = vmatmul.mubr.msk.bf16.vlgmr.msra.gmra.mrb[52].mxu0 %vm441_vm15, %v2713_v3  ;;  %5734 = vmatprep.subr.msk.bf16.mxu1 %vm445_vm14, %v2768_v10 }
 0x47e   :  { %2916 = vmatpush1.bf16.msra.mxu0 %v2904_v48  ;;  %2826 = vmatpush1.bf16.msra.mxu1 %v2779_v53 }
 0x47f   :  { %5743 = vmatprep.subr.msk.bf16.mxu0 %vm445_vm14, %v3101_v20  ;;  %v3299_v55 = vpop.permute.xlu1 %3298  ;;  %5739 = vmatprep.subr.msk.bf16.mxu1 %vm445_vm14, %v2899_v51  ;;  %v3099_v27 = vpop.permute.xlu0 %3098 }
 0x480   :  { %2947 = vmatprep.mubr.bf16.mxu0 %v5861_v2 }
 0x482   :  { %5735 = vmatmul.mubr.msk.bf16.vlgmr.msra.gmra.mrb[52].mxu1 %vm441_vm15, %v2713_v3 }
 0x483   :  { %2957 = vmatpush1.bf16.msra.mxu1 %v2910_v46  ;;  %v3303_v62 = vpop.permute.xlu1 %3302  ;;  %v3297_v58 = vpop.permute.xlu0 %3296  ;;  %2988 = vmatprep.mubr.bf16.mxu1 %v5861_v2 }
 0x484   :  { %v3305_v4 = vsel %vm698_vm8, %v3297_v58, %v3299_v55  ;;  %v3304_v21 = vsel %vm698_vm8, %v3295_v39, %v3297_v58  ;;  %v5760_v39 = vld [vmem:[%s7032_s7 + $0x10] sm:$0x3] }
 0x485   :  { %5738 = vmatmul.mubr.msk.bf16.vlgmr.msra.gmra.mrb[56].mxu0 %vm441_vm15, %v2873_v37  ;;  %v3312_v12 = vsel %vm445_vm14, %v3304_v21, 0  ;;  %v3660_v53 = vpack.c.bf16 %v5760_v39, %v5760_v39 }
 0x486   :  { %3120 = vmatpush1.bf16.msra.mxu0 %v3108_v1  ;;  %3151 = vmatprep.mubr.bf16.mxu0 %v5861_v2 }
 0x487   :  { %5749 = vmatprep.subr.msk.bf16.mxu0 %vm445_vm14, %v3305_v4  ;;  %v3501_v60 = vpop.permute.xlu1 %3500  ;;  %v3499_v41 = vpop.permute.xlu0 %3498 }
 0x488   :  { %v3508_v22 = vsel %vm376_vm7, %v3499_v41, %v3501_v60 }
 0x489   :  { %v3516_v47 = vsel %vm445_vm14, %v3508_v22, 0  ;;  %v4458_v22 = vld [vmem:[#allocation2 + $0x2] sm:$0xff] }
 0x48a   :  { %5740 = vmatmul.mubr.msk.bf16.vlgmr.msra.gmra.mrb[56].mxu1 %vm441_vm15, %v2873_v37  ;;  %v5765_v37 = vld [vmem:[%s7033_s8 + $0x2] sm:$0x3]  ;;  %v4463_v36 = vcombine.high %v4458_v22, %v4458_v22 }
 0x48b   :  { %v3097_v6 = vpop.permute.xlu1 %3096  ;;  %v3503_v0 = vpop.permute.xlu0 %3502  ;;  %3192 = vmatprep.mubr.bf16.mxu1 %v5861_v2  ;;  %v3863_v4 = vpack.c.bf16 %v5765_v37, %v5765_v37 }
 0x48c   :  { %v3102_v7 = vsel %vm905_vm9, %v3095_v32, %v3097_v6  ;;  %v3103_v40 = vsel %vm905_vm9, %v3097_v6, %v3099_v27  ;;  %v3509_v11 = vsel %vm376_vm7, %v3501_v60, %v3503_v0  ;;  %v3821_v6 = vld [vmem:[%s7033_s8] sm:$0x3] }
 0x48d   :  { %v3114_v59 = vsel %vm445_vm14, %v3102_v7, 0  ;;  %5744 = vmatmul.mubr.msk.bf16.vlgmr.msra.gmra.mrb[60].mxu0 %vm441_vm15, %v3048_v50  ;;  %5745 = vmatprep.subr.msk.bf16.mxu1 %vm445_vm14, %v3103_v40 }
 0x48e   :  { %3324 = vmatpush1.bf16.msra.mxu0 %v3312_v12  ;;  %3161 = vmatpush1.bf16.msra.mxu1 %v3114_v59  ;;  %v3822_v59 = vpack.c.bf16 %v3821_v6, %v3821_v6 }
 0x48f   :  { %5755 = vmatprep.subr.msk.bf16.mxu0 %vm445_vm14, %v3509_v11  ;;  %v3703_v15 = vpop.permute.xlu1 %3702  ;;  %v3507_v16 = vpop.permute.xlu0 %3506  ;;  %3355 = vmatprep.mubr.bf16.mxu0 %v5861_v2 }
 0x492   :  { %5746 = vmatmul.mubr.msk.bf16.vlgmr.msra.gmra.mrb[60].mxu1 %vm441_vm15, %v3048_v50 }
 0x493   :  { %v3707_v23 = vpop.permute.xlu1 %3706  ;;  %v3301_v24 = vpop.permute.xlu0 %3300  ;;  %3396 = vmatprep.mubr.bf16.mxu1 %v5861_v2 }
 0x494   :  { %v3306_v25 = vsel %vm698_vm8, %v3299_v55, %v3301_v24  ;;  %v3307_v26 = vsel %vm698_vm8, %v3301_v24, %v3303_v62 }
 0x495   :  { %v3318_v9 = vsel %vm445_vm14, %v3306_v25, 0  ;;  %5750 = vmatmul.mubr.msk.bf16.vlgmr.msra.gmra.mrb[64].mxu0 %vm441_vm15, %v3252_v17  ;;  %5751 = vmatprep.subr.msk.bf16.mxu1 %vm445_vm14, %v3307_v26 }
 0x496   :  { %3528 = vmatpush1.bf16.msra.mxu0 %v3516_v47  ;;  %3365 = vmatpush1.bf16.msra.mxu1 %v3318_v9  ;;  %v4470_v9 = vrot.slane %v4458_v22, %v6010_v49 }
 0x497   :  { %v3711_v28 = vpop.permute.xlu1 %3710  ;;  %v3705_v29 = vpop.permute.xlu0 %3704  ;;  %3559 = vmatprep.mubr.bf16.mxu0 %v5861_v2 }
 0x498   :  { %v3713_v61 = vsel %vm293_vm6, %v3705_v29, %v3707_v23  ;;  %v3712_v57 = vsel %vm293_vm6, %v3703_v15, %v3705_v29 }
 0x499   :  { %5761 = vmatprep.subr.msk.bf16.mxu0 %vm445_vm14, %v3713_v61  ;;  %v3720_v35 = vsel %vm445_vm14, %v3712_v57, 0 }
 0x49a   :  { %5752 = vmatmul.mubr.msk.bf16.vlgmr.msra.gmra.mrb[64].mxu1 %vm441_vm15, %v3252_v17  ;;  %v5774_v17 = vld [vmem:[%s7033_s8 + $0x4] sm:$0x3] }
 0x49b   :  { %v3505_v32 = vpop.permute.xlu1 %3504  ;;  %v3906_v33 = vpop.permute.xlu0 %3905  ;;  %3600 = vmatprep.mubr.bf16.mxu1 %v5861_v2  ;;  %v4138_v47 = vpack.c.bf16 %v5774_v17, %v5774_v17 }
 0x49c   :  { %v3510_v31 = vsel %vm376_vm7, %v3503_v0, %v3505_v32  ;;  %v3511_v3 = vsel %vm376_vm7, %v3505_v32, %v3507_v16  ;;  %v4478_v32 = vcombine.high %v4470_v9, %v4470_v9 }
 0x49d   :  { %v3522_v38 = vsel %vm445_vm14, %v3510_v31, 0  ;;  %5756 = vmatmul.mubr.msk.bf16.vlgmr.msra.gmra.mrb[68].mxu0 %vm441_vm15, %v3456_v30  ;;  %5757 = vmatprep.subr.msk.bf16.mxu1 %vm445_vm14, %v3511_v3  ;;  %v5779_v31 = vld [vmem:[%s7033_s8 + $0x6] sm:$0x3] }
 0x49e   :  { %3732 = vmatpush1.bf16.msra.mxu0 %v3720_v35  ;;  %3569 = vmatpush1.bf16.msra.mxu1 %v3522_v38 }
 0x49f   :  { %v3908_v43 = vpop.permute.xlu1 %3907  ;;  %v3910_v63 = vpop.permute.xlu0 %3909  ;;  %3763 = vmatprep.mubr.bf16.mxu0 %v5861_v2 }
 0x4a0   :  { %v3916_v10 = vsel %vm436_vm12, %v3908_v43, %v3910_v63  ;;  %v3915_v48 = vsel %vm436_vm12, %v3906_v33, %v3908_v43  ;;  %v4477_v33 = vrot.slane %v4463_v36, %v6010_v49  ;;  %v4484_v43 = vpack.c.bf16 %v4470_v9, %v4470_v9 }
 0x4a1   :  { %5766 = vmatprep.subr.msk.bf16.mxu0 %vm445_vm14, %v3916_v10  ;;  %v3923_v55 = vsel %vm445_vm14, %v3915_v48, 0  ;;  %v4485_v10 = vpack.c.bf16 %v4478_v32, %v4478_v32  ;;  %v5799_v32 = vld [vmem:[%s7033_s8 + $0xe] sm:$0x3] }
 0x4a2   :  { %5758 = vmatmul.mubr.msk.bf16.vlgmr.msra.gmra.mrb[68].mxu1 %vm441_vm15, %v3456_v30  ;;  %v4479_v48 = vcombine.high %v4477_v33, %v4477_v33 }
 0x4a3   :  { %v3912_v51 = vpop.permute.xlu1 %3911  ;;  %v3709_v20 = vpop.permute.xlu0 %3708  ;;  %3804 = vmatprep.mubr.bf16.mxu1 %v5861_v2 }
 0x4a4   :  { %v3714_v34 = vsel %vm293_vm6, %v3707_v23, %v3709_v20  ;;  %v3715_v52 = vsel %vm293_vm6, %v3709_v20, %v3711_v28  ;;  %v3917_v56 = vsel %vm436_vm12, %v3910_v63, %v3912_v51  ;;  %v4487_v37 = vpack.c.bf16 %v4479_v48, %v4479_v48  ;;  %v5804_v48 = vld [vmem:[%s7033_s8 + $0x10] sm:$0x3] }
 0x4a5   :  { %v3726_v27 = vsel %vm445_vm14, %v3714_v34, 0  ;;  %5762 = vmatmul.mubr.msk.bf16.vlgmr.msra.gmra.mrb[72].mxu0 %vm441_vm15, %v3660_v53  ;;  %5763 = vmatprep.subr.msk.bf16.mxu1 %vm445_vm14, %v3715_v52  ;;  %v3929_v1 = vsel %vm445_vm14, %v3917_v56, 0  ;;  %v4486_v56 = vpack.c.bf16 %v4477_v33, %v4477_v33 }
 0x4a6   :  { %3935 = vmatpush1.bf16.msra.mxu0 %v3923_v55  ;;  %3773 = vmatpush1.bf16.msra.mxu1 %v3726_v27  ;;  %v4492_v27 = vsel %vm445_vm14, %v4484_v43, 0 }
 0x4a7   :  { %v4022_v46 = vpop.permute.xlu1 %4021  ;;  %v3914_v62 = vpop.permute.xlu0 %3913  ;;  %3966 = vmatprep.mubr.bf16.mxu0 %v5861_v2 }
 0x4a8   :  { %v3918_v58 = vsel %vm436_vm12, %v3912_v51, %v3914_v62 }
 0x4a9   :  { %5768 = vmatprep.subr.msk.bf16.mxu1 %vm445_vm14, %v3918_v58 }
 0x4aa   :  { %5764 = vmatmul.mubr.msk.bf16.vlgmr.msra.gmra.mrb[72].mxu1 %vm441_vm15, %v3660_v53  ;;  %v4301_v53 = vpack.c.bf16 %v5779_v31, %v5779_v31 }
 0x4ab   :  { %3976 = vmatpush1.bf16.msra.mxu1 %v3929_v1  ;;  %v4026_v5 = vpop.permute.xlu1 %4025  ;;  %v4024_v60 = vpop.permute.xlu0 %4023  ;;  %4007 = vmatprep.mubr.bf16.mxu1 %v5861_v2 }
 0x4ac   :  { %v4031_v41 = vsel %vm555_vm13, %v4022_v46, %v4024_v60  ;;  %v4032_v50 = vsel %vm555_vm13, %v4024_v60, %v4026_v5  ;;  %v5784_v46 = vld [vmem:[%s7033_s8 + $0x8] sm:$0x3]  ;;  %v4498_v60 = vsel %vm445_vm14, %v4486_v56, 0  ;;  %v5263_v56 = vpack.c.bf16 %v6099_v13, %v6099_v13 }
 0x4ad   :  { %v4039_v21 = vsel %vm445_vm14, %v4031_v41, 0  ;;  %5767 = vmatmul.mubr.msk.bf16.vlgmr.msra.gmra.mrb[76].mxu0 %vm441_vm15, %v3863_v4  ;;  %5770 = vmatprep.subr.msk.bf16.mxu0 %vm445_vm14, %v4032_v50  ;;  %v4461_v1 = vpack.c.bf16 %v5784_v46, %v5784_v46  ;;  %v5266_v13 = vpack.c.bf16 %v6105_v19, %v6105_v19 }
 0x4ae   :  { %4051 = vmatpush1.bf16.msra.mxu0 %v4039_v21  ;;  %4082 = vmatprep.mubr.bf16.mxu0 %v5861_v2 }
 0x4af   :  { %v4030_v0 = vpop.permute.xlu1 %4029  ;;  %v4028_v7 = vpop.permute.xlu0 %4027 }
 0x4b0   :  { %v4033_v40 = vsel %vm555_vm13, %v4026_v5, %v4028_v7  ;;  %v4034_v11 = vsel %vm555_vm13, %v4028_v7, %v4030_v0  ;;  %v5789_v0 = vld [vmem:[%s7033_s8 + $0xa] sm:$0x3] }
 0x4b1   :  { %v4045_v12 = vsel %vm445_vm14, %v4033_v40, 0  ;;  %5772 = vmatprep.subr.msk.bf16.mxu1 %vm445_vm14, %v4034_v11 }
 0x4b2   :  { %5769 = vmatmul.mubr.msk.bf16.vlgmr.msra.gmra.mrb[76].mxu1 %vm441_vm15, %v3863_v4  ;;  %v5245_v4 = vld [vmem:[%s7034_s9] sm:$0x3] }
 0x4b3   :  { %4092 = vmatpush1.bf16.msra.mxu1 %v4045_v12  ;;  %v4183_v8 = vpop.permute.xlu1 %4182  ;;  %v4181_v15 = vpop.permute.xlu0 %4180  ;;  %4123 = vmatprep.mubr.bf16.mxu1 %v5861_v2 }
 0x4b4   :  { %v4190_v16 = vsel %vm758_vm11, %v4181_v15, %v4183_v8  ;;  %5248 = vperm.xlu0 %5849, %v5245_v4  }
 0x4b5   :  { %5771 = vmatmul.mubr.msk.bf16.vlgmr.msra.gmra.mrb[80].mxu0 %vm441_vm15, %v3822_v59  ;;  %v4198_v26 = vsel %vm445_vm14, %v4190_v16, 0 }
 0x4b6   :  { %4241 = vmatprep.mubr.bf16.mxu0 %v5861_v2 }
 0x4b7   :  { %v4187_v23 = vpop.permute.xlu1 %4186  ;;  %v4185_v24 = vpop.permute.xlu0 %4184 }
 0x4b8   :  { %v4191_v25 = vsel %vm758_vm11, %v4183_v8, %v4185_v24  ;;  %v4192_v28 = vsel %vm758_vm11, %v4185_v24, %v4187_v23  ;;  %v5794_v24 = vld [vmem:[%s7033_s8 + $0xc] sm:$0x3] }
 0x4b9   :  { %5775 = vmatprep.subr.msk.bf16.mxu0 %vm445_vm14, %v4191_v25  ;;  %v4204_v57 = vsel %vm445_vm14, %v4192_v28, 0 }
 0x4ba   :  { %5773 = vmatmul.mubr.msk.bf16.vlgmr.msra.gmra.mrb[80].mxu1 %vm441_vm15, %v3822_v59  ;;  %4210 = vmatpush1.bf16.msra.mxu0 %v4198_v26  ;;  %v4595_v59 = vpack.c.bf16 %v5789_v0, %v5789_v0 }
 0x4bb   :  { %v4344_v29 = vpop.permute.xlu1 %4343  ;;  %v4189_v61 = vpop.permute.xlu0 %4188  ;;  %4282 = vmatprep.mubr.bf16.mxu1 %v5861_v2 }
 0x4bc   :  { %v4193_v30 = vsel %vm758_vm11, %v4187_v23, %v4189_v61 }
 0x4bd   :  { %5776 = vmatmul.mubr.msk.bf16.vlgmr.msra.gmra.mrb[84].mxu0 %vm441_vm15, %v4138_v47  ;;  %5777 = vmatprep.subr.msk.bf16.mxu1 %vm445_vm14, %v4193_v30 }
 0x4be   :  { %4251 = vmatpush1.bf16.msra.mxu1 %v4204_v57  ;;  %4404 = vmatprep.mubr.bf16.mxu0 %v5861_v2 }
 0x4bf   :  { %v4348_v3 = vpop.permute.xlu1 %4347  ;;  %v4346_v35 = vpop.permute.xlu0 %4345 }
 0x4c0   :  { %v4353_v38 = vsel %vm965_vm10, %v4344_v29, %v4346_v35  ;;  %v4354_v39 = vsel %vm965_vm10, %v4346_v35, %v4348_v3 }
 0x4c1   :  { %v4361_v63 = vsel %vm445_vm14, %v4353_v38, 0  ;;  %5780 = vmatprep.subr.msk.bf16.mxu0 %vm445_vm14, %v4354_v39  ;;  %v4921_v38 = vpack.c.bf16 %v5799_v32, %v5799_v32 }
 0x4c2   :  { %5778 = vmatmul.mubr.msk.bf16.vlgmr.msra.gmra.mrb[84].mxu1 %vm441_vm15, %v4138_v47  ;;  %4373 = vmatpush1.bf16.msra.mxu0 %v4361_v63  ;;  %v4758_v47 = vpack.c.bf16 %v5794_v24, %v5794_v24  ;;  %v5261_v24 = vld [vmem:[%s7035_s11] sm:$0x3] }
 0x4c3   :  { %v4352_v51 = vpop.permute.xlu1 %4351  ;;  %5785 = vmatprep.subr.msk.bf16.mxu0 %vm445_vm14, %v4485_v10  ;;  %v4350_v20 = vpop.permute.xlu0 %4349  ;;  %4445 = vmatprep.mubr.bf16.mxu1 %v5861_v2 }
 0x4c4   :  { %v4355_v34 = vsel %vm965_vm10, %v4348_v3, %v4350_v20  ;;  %v4356_v52 = vsel %vm965_vm10, %v4350_v20, %v4352_v51 }
 0x4c5   :  { %v4367_v55 = vsel %vm445_vm14, %v4355_v34, 0  ;;  %5781 = vmatmul.mubr.msk.bf16.vlgmr.msra.gmra.mrb[88].mxu0 %vm441_vm15, %v4301_v53  ;;  %5782 = vmatprep.subr.msk.bf16.mxu1 %vm445_vm14, %v4356_v52 }
 0x4c6   :  { %4414 = vmatpush1.bf16.msra.mxu1 %v4367_v55  ;;  %4504 = vmatpush1.bf16.msra.mxu0 %v4492_v27  ;;  %v5264_v27 = vpack.c.bf16 %v6101_v18, %v6101_v18  ;;  %v5271_v18 = vsel %vm445_vm14, %v5263_v56, 0 }
 0x4c7   :  { %v4640_v62 = vpop.permute.xlu1 %4639  ;;  %5787 = vmatprep.subr.msk.bf16.mxu1 %vm445_vm14, %v4487_v37  ;;  %v4638_v58 = vpop.permute.xlu0 %4637  ;;  %4535 = vmatprep.mubr.bf16.mxu0 %v5861_v2  ;;  %v5084_v37 = vpack.c.bf16 %v5804_v48, %v5804_v48 }
 0x4c8   :  { %v4647_v5 = vsel %vm905_vm9, %v4638_v58, %v4640_v62 }
 0x4c9   :  { %v4655_v6 = vsel %vm445_vm14, %v4647_v5, 0 }
 0x4ca   :  { %5783 = vmatmul.mubr.msk.bf16.vlgmr.msra.gmra.mrb[88].mxu1 %vm441_vm15, %v4301_v53 }
 0x4cb   :  { %4545 = vmatpush1.bf16.msra.mxu1 %v4498_v60  ;;  %v4644_v41 = vpop.permute.xlu1 %4643  ;;  %v4642_v50 = vpop.permute.xlu0 %4641  ;;  %4576 = vmatprep.mubr.bf16.mxu1 %v5861_v2 }
 0x4cc   :  { %v4648_v21 = vsel %vm905_vm9, %v4640_v62, %v4642_v50  ;;  %v4649_v7 = vsel %vm905_vm9, %v4642_v50, %v4644_v41 }
 0x4cd   :  { %5786 = vmatmul.mubr.msk.bf16.vlgmr.msra.gmra.mrb[92].mxu0 %vm441_vm15, %v4461_v1  ;;  %5790 = vmatprep.subr.msk.bf16.mxu0 %vm445_vm14, %v4648_v21  ;;  %v4661_v8 = vsel %vm445_vm14, %v4649_v7, 0 }
 0x4ce   :  { %4667 = vmatpush1.bf16.msra.mxu0 %v4655_v6  ;;  %4698 = vmatprep.mubr.bf16.mxu0 %v5861_v2 }
 0x4cf   :  { %v4801_v40 = vpop.permute.xlu1 %4800  ;;  %v4646_v11 = vpop.permute.xlu0 %4645 }
 0x4d0   :  { %v4650_v12 = vsel %vm905_vm9, %v4644_v41, %v4646_v11 }
 0x4d1   :  { %5792 = vmatprep.subr.msk.bf16.mxu1 %vm445_vm14, %v4650_v12 }
 0x4d2   :  { %5788 = vmatmul.mubr.msk.bf16.vlgmr.msra.gmra.mrb[92].mxu1 %vm441_vm15, %v4461_v1  ;;  %v5265_v1 = vpack.c.bf16 %v6103_v14, %v6103_v14 }
 0x4d3   :  { %4708 = vmatpush1.bf16.msra.mxu1 %v4661_v8  ;;  %v4805_v15 = vpop.permute.xlu1 %4804  ;;  %4739 = vmatprep.mubr.bf16.mxu1 %v5861_v2 }
 0x4d4   :  { %v4803_v16 = vpop.permute.xlu0 %4802  ;;  %v5277_v5 = vsel %vm445_vm14, %v5265_v1, 0 }
 0x4d5   :  { %v4810_v17 = vsel %vm698_vm8, %v4801_v40, %v4803_v16  ;;  %v4811_v22 = vsel %vm698_vm8, %v4803_v16, %v4805_v15  ;;  %5791 = vmatmul.mubr.msk.bf16.vlgmr.msra.gmra.mrb[96].mxu0 %vm441_vm15, %v4595_v59 }
 0x4d6   :  { %v4818_v23 = vsel %vm445_vm14, %v4810_v17, 0  ;;  %5795 = vmatprep.subr.msk.bf16.mxu0 %vm445_vm14, %v4811_v22  ;;  %4861 = vmatprep.mubr.bf16.mxu0 %v5861_v2 }
 0x4d7   :  { %4830 = vmatpush1.bf16.msra.mxu0 %v4818_v23  ;;  %v4809_v25 = vpop.permute.xlu1 %4808 }
 0x4d9   :  { %v4807_v26 = vpop.permute.xlu0 %4806 }
 0x4da   :  { %v4812_v9 = vsel %vm698_vm8, %v4805_v15, %v4807_v26  ;;  %v4813_v36 = vsel %vm698_vm8, %v4807_v26, %v4809_v25  ;;  %5793 = vmatmul.mubr.msk.bf16.vlgmr.msra.gmra.mrb[96].mxu1 %vm441_vm15, %v4595_v59 }
 0x4db   :  { %v4824_v28 = vsel %vm445_vm14, %v4812_v9, 0  ;;  %5797 = vmatprep.subr.msk.bf16.mxu1 %vm445_vm14, %v4813_v36  ;;  %v4966_v29 = vpop.permute.xlu1 %4965  ;;  %4902 = vmatprep.mubr.bf16.mxu1 %v5861_v2 }
 0x4dc   :  { %4871 = vmatpush1.bf16.msra.mxu1 %v4824_v28 }
 0x4dd   :  { %v4964_v61 = vpop.permute.xlu0 %4963  ;;  %5796 = vmatmul.mubr.msk.bf16.vlgmr.msra.gmra.mrb[100].mxu0 %vm441_vm15, %v4758_v47 }
 0x4de   :  { %5024 = vmatprep.mubr.bf16.mxu0 %v5861_v2  ;;  %v4973_v57 = vsel %vm376_vm7, %v4964_v61, %v4966_v29 }
 0x4df   :  { %v4970_v30 = vpop.permute.xlu1 %4969  ;;  %v4981_v3 = vsel %vm445_vm14, %v4973_v57, 0 }
 0x4e1   :  { %v4968_v33 = vpop.permute.xlu0 %4967 }
 0x4e2   :  { %v4974_v31 = vsel %vm376_vm7, %v4966_v29, %v4968_v33  ;;  %5798 = vmatmul.mubr.msk.bf16.vlgmr.msra.gmra.mrb[100].mxu1 %vm441_vm15, %v4758_v47  ;;  %v4975_v39 = vsel %vm376_vm7, %v4968_v33, %v4970_v30  ;;  %v5262_v47 = vpack.c.bf16 %v5261_v24, %v5261_v24 }
 0x4e3   :  { %5800 = vmatprep.subr.msk.bf16.mxu0 %vm445_vm14, %v4974_v31  ;;  %v5127_v35 = vpop.permute.xlu1 %5126  ;;  %5065 = vmatprep.mubr.bf16.mxu1 %v5861_v2  ;;  %v4987_v10 = vsel %vm445_vm14, %v4975_v39, 0 }
 0x4e4   :  { %4993 = vmatpush1.bf16.msra.mxu0 %v4981_v3 }
 0x4e5   :  { %v4972_v43 = vpop.permute.xlu0 %4971 }
 0x4e6   :  { %v4976_v63 = vsel %vm376_vm7, %v4970_v30, %v4972_v43 }
 0x4e7   :  { %5801 = vmatmul.mubr.msk.bf16.vlgmr.msra.gmra.mrb[104].mxu0 %vm441_vm15, %v4921_v38  ;;  %5802 = vmatprep.subr.msk.bf16.mxu1 %vm445_vm14, %v4976_v63  ;;  %v5131_v53 = vpop.permute.xlu1 %5130 }
 0x4e8   :  { %5034 = vmatpush1.bf16.msra.mxu1 %v4987_v10  ;;  %5187 = vmatprep.mubr.bf16.mxu0 %v5861_v2 }
 0x4e9   :  { %v5129_v51 = vpop.permute.xlu0 %5128 }
 0x4ea   :  { %v5136_v20 = vsel %vm293_vm6, %v5127_v35, %v5129_v51  ;;  %v5137_v34 = vsel %vm293_vm6, %v5129_v51, %v5131_v53 }
 0x4eb   :  { %v5144_v52 = vsel %vm445_vm14, %v5136_v20, 0  ;;  %5803 = vmatmul.mubr.msk.bf16.vlgmr.msra.gmra.mrb[104].mxu1 %vm441_vm15, %v4921_v38  ;;  %5805 = vmatprep.subr.msk.bf16.mxu0 %vm445_vm14, %v5137_v34  ;;  %v5135_v55 = vpop.permute.xlu1 %5134 }
 0x4ec   :  { %5156 = vmatpush1.bf16.msra.mxu0 %v5144_v52  ;;  %5228 = vmatprep.mubr.bf16.mxu1 %v5861_v2 }
 0x4ed   :  { %5809 = vmatprep.subr.msk.bf16.mxu0 %vm445_vm14, %v5264_v27  ;;  %v5133_v46 = vpop.permute.xlu0 %5132 }
 0x4ee   :  { %v5138_v62 = vsel %vm293_vm6, %v5131_v53, %v5133_v46  ;;  %v5139_v58 = vsel %vm293_vm6, %v5133_v46, %v5135_v55 }
 0x4ef   :  { %v5150_v4 = vsel %vm445_vm14, %v5138_v62, 0  ;;  %5806 = vmatmul.mubr.msk.bf16.vlgmr.msra.gmra.mrb[108].mxu0 %vm441_vm15, %v5084_v37  ;;  %5807 = vmatprep.subr.msk.bf16.mxu1 %vm445_vm14, %v5139_v58 }
 0x4f0   :  { %5197 = vmatpush1.bf16.msra.mxu1 %v5150_v4  ;;  %5283 = vmatpush1.bf16.msra.mxu0 %v5271_v18 }
 0x4f1   :  { %5811 = vmatprep.subr.msk.bf16.mxu1 %vm445_vm14, %v5266_v13  ;;  %5314 = vmatprep.mubr.bf16.mxu0 %v5861_v2 }
 0x4f3   :  { %5808 = vmatmul.mubr.msk.bf16.vlgmr.msra.gmra.mrb[108].mxu1 %vm441_vm15, %v5084_v37 }
 0x4f4   :  { %5324 = vmatpush1.bf16.msra.mxu1 %v5277_v5  ;;  %5355 = vmatprep.mubr.bf16.mxu1 %v5861_v2 }
 0x4f7   :  { %5810 = vmatmul.mubr.msk.bf16.vlgmr.msra.gmra.mrb[112].mxu0 %vm441_vm15, %v5262_v47 }
 0x4f8   :  { %5411 = vmatprep.mubr.bf16.mxu0 %v5861_v2 }
 0x4fb   :  { %5812 = vmatmul.mubr.msk.bf16.vlgmr.msra.gmra.mrb[112].mxu1 %vm441_vm15, %v5262_v47 }
 0x4fc   :  { %5452 = vmatprep.mubr.bf16.mxu1 %v5861_v2 }
 0x538   :  { %v2298_v60 = vpop.f32.mrb[40].mxu0 }
 0x539   :  { %v2300_v41 = vpop.f32.mrb[41].mxu0 }
 0x53a   :  { %v2302_v50 = vpop.f32.mrb[42].mxu0 }
 0x53b   :  { %v2303_v19 = vpop.f32.mrb[43].mxu0 }
 0x53d   :  { %v2339_v21 = vpop.f32.mrb[40].mxu1 }
 0x53e   :  { %v2341_v6 = vpop.f32.mrb[41].mxu1 }
 0x53f   :  { %v2343_v14 = vpop.f32.mrb[42].mxu1 }
 0x540   :  { %v2344_v0 = vpop.f32.mrb[43].mxu1  ;;  %v2414_v7 = vpop.f32.mrb[44].mxu0 }
 0x541   :  { %v2415_v40 = vadd.f32 %v2414_v7, %v2298_v60  ;;  %v2416_v11 = vpop.f32.mrb[45].mxu0 }
 0x542   :  { %v2417_v12 = vadd.f32 %v2416_v11, %v2300_v41  ;;  %v2418_v59 = vpop.f32.mrb[46].mxu0 }
 0x543   :  { %v2419_v8 = vpop.f32.mrb[47].mxu0 }
 0x545   :  { %v2455_v15 = vpop.f32.mrb[44].mxu1 }
 0x546   :  { %v2456_v16 = vadd.f32 %v2455_v15, %v2339_v21  ;;  %v2457_v17 = vpop.f32.mrb[45].mxu1 }
 0x547   :  { %v2458_v22 = vadd.f32 %v2457_v17, %v2341_v6  ;;  %v2459_v23 = vpop.f32.mrb[46].mxu1 }
 0x548   :  { %v2460_v25 = vpop.f32.mrb[47].mxu1  ;;  %v2614_v26 = vpop.f32.mrb[48].mxu0 }
 0x549   :  { %v2662_v9 = vadd.f32 %v2614_v26, %v2415_v40  ;;  %v2616_v36 = vpop.f32.mrb[49].mxu0 }
 0x54a   :  { %v2663_v28 = vadd.f32 %v2616_v36, %v2417_v12  ;;  %v2618_v29 = vpop.f32.mrb[50].mxu0 }
 0x54b   :  { %v2619_v61 = vpop.f32.mrb[51].mxu0 }
 0x54d   :  { %v2655_v30 = vpop.f32.mrb[48].mxu1 }
 0x54e   :  { %v2664_v57 = vadd.f32 %v2655_v30, %v2456_v16  ;;  %v2657_v32 = vpop.f32.mrb[49].mxu1 }
 0x54f   :  { %v2665_v33 = vadd.f32 %v2657_v32, %v2458_v22  ;;  %v2659_v31 = vpop.f32.mrb[50].mxu1 }
 0x550   :  { %v2660_v3 = vpop.f32.mrb[51].mxu1  ;;  %v2818_v35 = vpop.f32.mrb[52].mxu0 }
 0x551   :  { %v2866_v38 = vadd.f32 %v2818_v35, %v2662_v9  ;;  %v2820_v39 = vpop.f32.mrb[53].mxu0 }
 0x552   :  { %v2867_v43 = vadd.f32 %v2820_v39, %v2663_v28  ;;  %v2822_v63 = vpop.f32.mrb[54].mxu0 }
 0x553   :  { %v2823_v10 = vpop.f32.mrb[55].mxu0 }
 0x555   :  { %v2859_v53 = vpop.f32.mrb[52].mxu1 }
 0x556   :  { %v2868_v48 = vadd.f32 %v2859_v53, %v2664_v57  ;;  %v2861_v51 = vpop.f32.mrb[53].mxu1 }
 0x557   :  { %v2869_v20 = vadd.f32 %v2861_v51, %v2665_v33  ;;  %v2863_v34 = vpop.f32.mrb[54].mxu1 }
 0x558   :  { %v2864_v52 = vpop.f32.mrb[55].mxu1  ;;  %v2949_v55 = vpop.f32.mrb[56].mxu0 }
 0x559   :  { %v2997_v27 = vadd.f32 %v2949_v55, %v2866_v38  ;;  %v2951_v37 = vpop.f32.mrb[57].mxu0 }
 0x55a   :  { %v2998_v56 = vadd.f32 %v2951_v37, %v2867_v43  ;;  %v2953_v46 = vpop.f32.mrb[58].mxu0 }
 0x55b   :  { %v2954_v62 = vpop.f32.mrb[59].mxu0 }
 0x55d   :  { %v2990_v58 = vpop.f32.mrb[56].mxu1 }
 0x55e   :  { %v2999_v4 = vadd.f32 %v2990_v58, %v2868_v48  ;;  %v2992_v18 = vpop.f32.mrb[57].mxu1 }
 0x55f   :  { %v3000_v13 = vadd.f32 %v2992_v18, %v2869_v20  ;;  %v2994_v1 = vpop.f32.mrb[58].mxu1 }
 0x560   :  { %v2995_v5 = vpop.f32.mrb[59].mxu1  ;;  %v3153_v60 = vpop.f32.mrb[60].mxu0 }
 0x561   :  { %v3201_v41 = vadd.f32 %v3153_v60, %v2997_v27  ;;  %v3155_v50 = vpop.f32.mrb[61].mxu0 }
 0x562   :  { %v3202_v19 = vadd.f32 %v3155_v50, %v2998_v56  ;;  %v3157_v21 = vpop.f32.mrb[62].mxu0 }
 0x563   :  { %v3158_v6 = vpop.f32.mrb[63].mxu0 }
 0x565   :  { %v3194_v14 = vpop.f32.mrb[60].mxu1 }
 0x566   :  { %v3203_v0 = vadd.f32 %v3194_v14, %v2999_v4  ;;  %v3196_v7 = vpop.f32.mrb[61].mxu1 }
 0x567   :  { %v3204_v40 = vadd.f32 %v3196_v7, %v3000_v13  ;;  %v3198_v11 = vpop.f32.mrb[62].mxu1 }
 0x568   :  { %v3199_v12 = vpop.f32.mrb[63].mxu1  ;;  %v3357_v59 = vpop.f32.mrb[64].mxu0 }
 0x569   :  { %v3405_v8 = vadd.f32 %v3357_v59, %v3201_v41  ;;  %v3359_v15 = vpop.f32.mrb[65].mxu0 }
 0x56a   :  { %v3406_v16 = vadd.f32 %v3359_v15, %v3202_v19  ;;  %v3361_v17 = vpop.f32.mrb[66].mxu0 }
 0x56b   :  { %v3362_v22 = vpop.f32.mrb[67].mxu0 }
 0x56d   :  { %v3398_v23 = vpop.f32.mrb[64].mxu1 }
 0x56e   :  { %v3407_v24 = vadd.f32 %v3398_v23, %v3203_v0  ;;  %v3400_v25 = vpop.f32.mrb[65].mxu1 }
 0x56f   :  { %v3408_v26 = vadd.f32 %v3400_v25, %v3204_v40  ;;  %v3402_v47 = vpop.f32.mrb[66].mxu1 }
 0x570   :  { %v3403_v9 = vpop.f32.mrb[67].mxu1  ;;  %v3561_v36 = vpop.f32.mrb[68].mxu0 }
 0x571   :  { %v3609_v28 = vadd.f32 %v3561_v36, %v3405_v8  ;;  %v3563_v29 = vpop.f32.mrb[69].mxu0 }
 0x572   :  { %v3610_v61 = vadd.f32 %v3563_v29, %v3406_v16  ;;  %v3565_v30 = vpop.f32.mrb[70].mxu0 }
 0x573   :  { %v3566_v57 = vpop.f32.mrb[71].mxu0 }
 0x575   :  { %v3602_v32 = vpop.f32.mrb[68].mxu1 }
 0x576   :  { %v3611_v33 = vadd.f32 %v3602_v32, %v3407_v24  ;;  %v3604_v31 = vpop.f32.mrb[69].mxu1 }
 0x577   :  { %v3612_v3 = vadd.f32 %v3604_v31, %v3408_v26  ;;  %v3606_v35 = vpop.f32.mrb[70].mxu1 }
 0x578   :  { %v3607_v38 = vpop.f32.mrb[71].mxu1  ;;  %v3765_v39 = vpop.f32.mrb[72].mxu0 }
 0x579   :  { %v6966_v43 = vadd.f32 %v3765_v39, %v3609_v28  ;;  %v3767_v63 = vpop.f32.mrb[73].mxu0 }
 0x57a   :  { %v6968_v10 = vadd.f32 %v3767_v63, %v3610_v61  ;;  %v3769_v53 = vpop.f32.mrb[74].mxu0 }
 0x57b   :  { %v3770_v48 = vpop.f32.mrb[75].mxu0 }
 0x57d   :  { %v3806_v51 = vpop.f32.mrb[72].mxu1 }
 0x57e   :  { %v6970_v20 = vadd.f32 %v3806_v51, %v3611_v33  ;;  %v3808_v34 = vpop.f32.mrb[73].mxu1 }
 0x57f   :  { %v6972_v52 = vadd.f32 %v3808_v34, %v3612_v3  ;;  %v3810_v55 = vpop.f32.mrb[74].mxu1 }
 0x580   :  { %v3811_v27 = vpop.f32.mrb[75].mxu1  ;;  %v3968_v37 = vpop.f32.mrb[76].mxu0 }
 0x581   :  { %v3970_v56 = vpop.f32.mrb[77].mxu0 }
 0x582   :  { %v3972_v46 = vpop.f32.mrb[78].mxu0 }
 0x583   :  { %v3973_v62 = vpop.f32.mrb[79].mxu0 }
 0x585   :  { %v4009_v58 = vpop.f32.mrb[76].mxu1 }
 0x586   :  { %v4011_v4 = vpop.f32.mrb[77].mxu1 }
 0x587   :  { %v4013_v18 = vpop.f32.mrb[78].mxu1 }
 0x588   :  { %v4014_v13 = vpop.f32.mrb[79].mxu1  ;;  %v4084_v1 = vpop.f32.mrb[80].mxu0 }
 0x589   :  { %v4085_v5 = vadd.f32 %v4084_v1, %v3968_v37  ;;  %v4086_v60 = vpop.f32.mrb[81].mxu0 }
 0x58a   :  { %v4087_v41 = vadd.f32 %v4086_v60, %v3970_v56  ;;  %v4088_v50 = vpop.f32.mrb[82].mxu0 }
 0x58b   :  { %v4089_v19 = vpop.f32.mrb[83].mxu0 }
 0x58d   :  { %v4125_v21 = vpop.f32.mrb[80].mxu1 }
 0x58e   :  { %v4126_v6 = vadd.f32 %v4125_v21, %v4009_v58  ;;  %v4127_v14 = vpop.f32.mrb[81].mxu1 }
 0x58f   :  { %v4128_v0 = vadd.f32 %v4127_v14, %v4011_v4  ;;  %v4129_v7 = vpop.f32.mrb[82].mxu1 }
 0x590   :  { %v4130_v40 = vpop.f32.mrb[83].mxu1  ;;  %v4243_v11 = vpop.f32.mrb[84].mxu0 }
 0x591   :  { %v4291_v12 = vadd.f32 %v4243_v11, %v4085_v5  ;;  %v4245_v59 = vpop.f32.mrb[85].mxu0 }
 0x592   :  { %v4292_v8 = vadd.f32 %v4245_v59, %v4087_v41  ;;  %v4247_v15 = vpop.f32.mrb[86].mxu0 }
 0x593   :  { %v4248_v16 = vpop.f32.mrb[87].mxu0 }
 0x595   :  { %v4284_v17 = vpop.f32.mrb[84].mxu1 }
 0x596   :  { %v4293_v22 = vadd.f32 %v4284_v17, %v4126_v6  ;;  %v4286_v23 = vpop.f32.mrb[85].mxu1 }
 0x597   :  { %v4294_v24 = vadd.f32 %v4286_v23, %v4128_v0  ;;  %v4288_v25 = vpop.f32.mrb[86].mxu1 }
 0x598   :  { %v4289_v26 = vpop.f32.mrb[87].mxu1  ;;  %v4406_v47 = vpop.f32.mrb[88].mxu0 }
 0x599   :  { %v4454_v9 = vadd.f32 %v4406_v47, %v4291_v12  ;;  %v4408_v36 = vpop.f32.mrb[89].mxu0 }
 0x59a   :  { %v4455_v28 = vadd.f32 %v4408_v36, %v4292_v8  ;;  %v4410_v29 = vpop.f32.mrb[90].mxu0 }
 0x59b   :  { %v4411_v61 = vpop.f32.mrb[91].mxu0 }
 0x59d   :  { %v4447_v30 = vpop.f32.mrb[88].mxu1 }
 0x59e   :  { %v4456_v57 = vadd.f32 %v4447_v30, %v4293_v22  ;;  %v4449_v32 = vpop.f32.mrb[89].mxu1 }
 0x59f   :  { %v4457_v33 = vadd.f32 %v4449_v32, %v4294_v24  ;;  %v4451_v31 = vpop.f32.mrb[90].mxu1 }
 0x5a0   :  { %v4452_v3 = vpop.f32.mrb[91].mxu1  ;;  %v4537_v35 = vpop.f32.mrb[92].mxu0 }
 0x5a1   :  { %v4585_v38 = vadd.f32 %v4537_v35, %v4454_v9  ;;  %v4539_v39 = vpop.f32.mrb[93].mxu0  ;;  %v5249_v3 = vpop.permute.xlu0 %5248 }
 0x5a2   :  { %v4586_v63 = vadd.f32 %v4539_v39, %v4455_v28  ;;  %v4541_v53 = vpop.f32.mrb[94].mxu0 }
 0x5a3   :  { %v4542_v48 = vpop.f32.mrb[95].mxu0 }
 0x5a5   :  { %v4578_v51 = vpop.f32.mrb[92].mxu1 }
 0x5a6   :  { %v4587_v34 = vadd.f32 %v4578_v51, %v4456_v57  ;;  %v4580_v55 = vpop.f32.mrb[93].mxu1 }
 0x5a7   :  { %v4588_v27 = vadd.f32 %v4580_v55, %v4457_v33  ;;  %v4582_v37 = vpop.f32.mrb[94].mxu1 }
 0x5a8   :  { %v4583_v56 = vpop.f32.mrb[95].mxu1  ;;  %v4700_v46 = vpop.f32.mrb[96].mxu0 }
 0x5a9   :  { %v4748_v62 = vadd.f32 %v4700_v46, %v4585_v38  ;;  %v4702_v58 = vpop.f32.mrb[97].mxu0 }
 0x5aa   :  { %v4749_v4 = vadd.f32 %v4702_v58, %v4586_v63  ;;  %v4704_v18 = vpop.f32.mrb[98].mxu0 }
 0x5ab   :  { %v4705_v13 = vpop.f32.mrb[99].mxu0  ;;  %v5463_v18 = vpack.c.bf16 %v6421_v42, %v6421_v42  ;;  %v5466_v42 = vpack.c.bf16 %v6429_v45, %v6429_v45 }
 0x5ac   :  { %v5464_v13 = vpack.c.bf16 %v6423_v54, %v6423_v54 }
 0x5ad   :  { %v4741_v1 = vpop.f32.mrb[96].mxu1  ;;  %v5471_v54 = vsel %vm445_vm14, %v5463_v18, 0 }
 0x5ae   :  { %v4750_v5 = vadd.f32 %v4741_v1, %v4587_v34  ;;  %v4743_v60 = vpop.f32.mrb[97].mxu1 }
 0x5af   :  { %v4751_v41 = vadd.f32 %v4743_v60, %v4588_v27  ;;  %v4745_v50 = vpop.f32.mrb[98].mxu1 }
 0x5b0   :  { %v4746_v19 = vpop.f32.mrb[99].mxu1  ;;  %v4863_v21 = vpop.f32.mrb[100].mxu0 }
 0x5b1   :  { %v4911_v6 = vadd.f32 %v4863_v21, %v4748_v62  ;;  %v4865_v14 = vpop.f32.mrb[101].mxu0  ;;  %v5255_v62 = vld [vmem:[%s7036_s10] sm:$0x3] }
 0x5b2   :  { %v4912_v0 = vadd.f32 %v4865_v14, %v4749_v4  ;;  %v4867_v7 = vpop.f32.mrb[102].mxu0 }
 0x5b3   :  { %v4868_v40 = vpop.f32.mrb[103].mxu0 }
 0x5b5   :  { %v4904_v11 = vpop.f32.mrb[100].mxu1 }
 0x5b6   :  { %v4913_v12 = vadd.f32 %v4904_v11, %v4750_v5  ;;  %v4906_v59 = vpop.f32.mrb[101].mxu1 }
 0x5b7   :  { %v4914_v8 = vadd.f32 %v4906_v59, %v4751_v41  ;;  %v4908_v15 = vpop.f32.mrb[102].mxu1  ;;  %v5465_v41 = vpack.c.bf16 %v6427_v44, %v6427_v44  ;;  %v5461_v44 = vld [vmem:[%s7037_s12] sm:$0x3] }
 0x5b8   :  { %v4909_v16 = vpop.f32.mrb[103].mxu1  ;;  %v5462_v45 = vpack.c.bf16 %v5461_v44, %v5461_v44 }
 0x5b9   :  { %v5477_v50 = vsel %vm445_vm14, %v5465_v41, 0 }
 0x5ba   :  { %v5026_v17 = vpop.f32.mrb[104].mxu0 }
 0x5bb   :  { %v5074_v22 = vadd.f32 %v5026_v17, %v4911_v6  ;;  %v5028_v23 = vpop.f32.mrb[105].mxu0 }
 0x5bc   :  { %v5075_v24 = vadd.f32 %v5028_v23, %v4912_v0  ;;  %v5030_v25 = vpop.f32.mrb[106].mxu0 }
 0x5bd   :  { %v5031_v26 = vpop.f32.mrb[107].mxu0 }
 0x5be   :  { %v5067_v47 = vpop.f32.mrb[104].mxu1 }
 0x5bf   :  { %v5076_v9 = vadd.f32 %v5067_v47, %v4913_v12  ;;  %v5069_v36 = vpop.f32.mrb[105].mxu1 }
 0x5c0   :  { %v5077_v28 = vadd.f32 %v5069_v36, %v4914_v8  ;;  %v5071_v29 = vpop.f32.mrb[106].mxu1 }
 0x5c1   :  { %v5072_v61 = vpop.f32.mrb[107].mxu1 }
 0x5c2   :  { %v5189_v30 = vpop.f32.mrb[108].mxu0 }
 0x5c3   :  { %v5237_v57 = vadd.f32 %v5189_v30, %v5074_v22  ;;  %v5191_v32 = vpop.f32.mrb[109].mxu0 }
 0x5c4   :  { %v5238_v33 = vadd.f32 %v5191_v32, %v5075_v24  ;;  %v5193_v31 = vpop.f32.mrb[110].mxu0 }
 0x5c5   :  { %v5241_v35 = vadd.f32 %v5237_v57, %v6966_v43  ;;  %v5194_v38 = vpop.f32.mrb[111].mxu0 }
 0x5c6   :  { %v5242_v39 = vadd.f32 %v5238_v33, %v6968_v10  ;;  %v5230_v63 = vpop.f32.mrb[108].mxu1 }
 0x5c7   :  { %v5239_v53 = vadd.f32 %v5230_v63, %v5076_v9  ;;  %v5251_v48 = vadd.f32 %v5249_v3, %v5241_v35  ;;  %v5232_v51 = vpop.f32.mrb[109].mxu1 }
 0x5c8   :  { %v5252_v34 = vadd.f32 %v5249_v3, %v5242_v39  ;;  %v5240_v55 = vadd.f32 %v5232_v51, %v5077_v28  ;;  %v5234_v27 = vpop.f32.mrb[110].mxu1  ;;  %v5595_v39 = vld [vmem:[%s7038_s13] sm:$0x3] }
 0x5c9   :  { %v5243_v37 = vadd.f32 %v5239_v53, %v6970_v20  ;;  %v5235_v56 = vpop.f32.mrb[111].mxu1  ;;  %v5257_v46 = vpack.c.bf16 %v5251_v48, %v5251_v48  ;;  %v5256_v20 = vpack.c.bf16 %v5255_v62, %v5255_v62  ;;  %v5599_v48 = vld [vmem:[%s7039_s14] sm:$0x3] }
 0x5ca   :  { %v5258_v58 = vpack.c.bf16 %v5252_v34, %v5252_v34  ;;  %v5244_v43 = vadd.f32 %v5240_v55, %v6972_v52 }
 0x5cb   :  { %v5253_v4 = vadd.f32 %v5249_v3, %v5243_v37  ;;  %v5368_v10 = vsel %vm445_vm14, %v5257_v46, 0 }
 0x5cc   :  { %v5254_v1 = vadd.f32 %v5249_v3, %v5244_v43  ;;  %5813 = vmatprep.subr.msk.bf16.mxu0 %vm445_vm14, %v5258_v58 }
 0x5cd   :  { %5380 = vmatpush1.bf16.msra.mxu0 %v5368_v10  ;;  %v5259_v5 = vpack.c.bf16 %v5253_v4, %v5253_v4 }
 0x5ce   :  { %v5260_v60 = vpack.c.bf16 %v5254_v1, %v5254_v1  ;;  %5817 = vmatprep.subr.msk.bf16.mxu0 %vm445_vm14, %v5464_v13 }
 0x5cf   :  { %v5374_v52 = vsel %vm445_vm14, %v5259_v5, 0 }
 0x5d0   :  { %5814 = vmatmul.mubr.msk.bf16.vlgmr.msra.gmra.mrb[112].mxu0 %vm441_vm15, %v5256_v20  ;;  %5815 = vmatprep.subr.msk.bf16.mxu1 %vm445_vm14, %v5260_v60 }
 0x5d1   :  { %5421 = vmatpush1.bf16.msra.mxu1 %v5374_v52  ;;  %5483 = vmatpush1.bf16.msra.mxu0 %v5471_v54 }
 0x5d2   :  { %5819 = vmatprep.subr.msk.bf16.mxu1 %vm445_vm14, %v5466_v42  ;;  %5514 = vmatprep.mubr.bf16.mxu0 %v5861_v2 }
 0x5d4   :  { %5816 = vmatmul.mubr.msk.bf16.vlgmr.msra.gmra.mrb[112].mxu1 %vm441_vm15, %v5256_v20 }
 0x5d5   :  { %5524 = vmatpush1.bf16.msra.mxu1 %v5477_v50  ;;  %5555 = vmatprep.mubr.bf16.mxu1 %v5861_v2 }
 0x5dc   :  { %5818 = vmatmul.mubr.msk.bf16.vlgmr.msra.gmra.mrb[112].mxu0 %vm441_vm15, %v5462_v45 }
 0x5e0   :  { %5820 = vmatmul.mubr.msk.bf16.vlgmr.msra.gmra.mrb[112].mxu1 %vm441_vm15, %v5462_v45 }
 0x6af   :  { %v5516_v19 = vpop.f32.mrb[112].mxu0 }
 0x6b0   :  { %v5568_v21 = vsel %vm69_vm0, %v5516_v19, 0.0  ;;  %v5577_v6 = vmul.f32 %v5516_v19, %v5516_v19  ;;  %v5518_v14 = vpop.f32.mrb[113].mxu0 }
 0x6b1   :  { %v5569_v0 = vsel %vm69_vm0, %v5518_v14, 0.0  ;;  %v5578_v7 = vmul.f32 %v5518_v14, %v5518_v14  ;;  %v5520_v40 = vpop.f32.mrb[114].mxu0 }
 0x6b2   :  { %v5581_v11 = vsel %vm69_vm0, %v5577_v6, 0.0  ;;  %v5570_v12 = vadd.f32 %v5569_v0, %v5568_v21  ;;  %v5521_v59 = vpop.f32.mrb[115].mxu0 }
 0x6b3   :  { %v5582_v2 = vsel %vm69_vm0, %v5578_v7, 0.0  ;;  %v5557_v8 = vpop.f32.mrb[112].mxu1 }
 0x6b4   :  { %v5583_v15 = vadd.f32 %v5582_v2, %v5581_v11  ;;  %v5571_v16 = vsel %vm69_vm0, %v5557_v8, 0.0  ;;  %v5579_v17 = vmul.f32 %v5557_v8, %v5557_v8  ;;  %v5559_v22 = vpop.f32.mrb[113].mxu1 }
 0x6b5   :  { %v5572_v23 = vadd.f32 %v5571_v16, %v5570_v12  ;;  %v5573_v24 = vsel %vm69_vm0, %v5559_v22, 0.0  ;;  %v5580_v25 = vmul.f32 %v5559_v22, %v5559_v22  ;;  %v5561_v26 = vpop.f32.mrb[114].mxu1 }
 0x6b6   :  { %v5584_v47 = vsel %vm69_vm0, %v5579_v17, 0.0  ;;  %v5562_v9 = vpop.f32.mrb[115].mxu1 }
 0x6b7   :  { %v5574_v36 = vadd.f32 %v5573_v24, %v5572_v23  ;;  %v5585_v28 = vadd.f32 %v5584_v47, %v5583_v15  ;;  %v5586_v29 = vsel %vm69_vm0, %v5580_v25, 0.0 }
 0x6b9   :  { %5575 = vadd.xlane.f32.xlu1 %v5574_v36  ;;  %v5587_v61 = vadd.f32 %v5586_v29, %v5585_v28 }
 0x6bb   :  { %5588 = vadd.xlane.f32.xlu0 %v5587_v61 }
 0x746   :  { %v5576_v30 = vpop.xlane.xlu1 %5575 }
 0x747   :  { %v5590_v57 = vmul.f32 0.001953125, %v5576_v30 }
 0x748   :  { %v5589_v32 = vpop.xlane.xlu0 %5588 }
 0x749   :  { %v5592_v33 = vmul.f32 %v5590_v57, %v5590_v57  ;;  %v5591_v31 = vmul.f32 0.001953125, %v5589_v32 }
 0x74b   :  { %v5593_v3 = vsub.f32 %v5591_v31, %v5592_v33 }
 0x74d   :  { %v5594_v35 = vmax.f32 %v5593_v3, 0.0 }
 0x74f   :  { %v5596_v38 = vadd.f32 1e-05, %v5594_v35 }
 0x751   :  { %5855 = vrsqrt.f32 %v5596_v38 }
 0x75b   :  { %v5856_v63 = vpop.eup %5855 }
 0x75c   :  { %v5598_v53 = vmul.f32 %v5856_v63, %v5595_v39 }
 0x75e   :  { %5604 = vperm.xlu1 %5848, %v5598_v53   ;;  %v5600_v51 = vmul.f32 %v5598_v53, %v5590_v57 }
 0x760   :  { %v5601_v34 = vsub.f32 %v5599_v48, %v5600_v51 }
 0x762   :  { %5613 = vperm.xlu0 %5849, %v5601_v34  }
 0x7dd   :  { %v5605_v55 = vpop.permute.xlu1 %5604 }
 0x7de   :  { %v5607_v27 = vmul.f32 %v5605_v55, %v5516_v19  ;;  %v5608_v37 = vmul.f32 %v5605_v55, %v5518_v14  ;;  %v5609_v56 = vmul.f32 %v5605_v55, %v5557_v8  ;;  %v5610_v46 = vmul.f32 %v5605_v55, %v5559_v22 }
 0x7e1   :  { %v5614_v62 = vpop.permute.xlu0 %5613 }
 0x7e2   :  { %v5616_v58 = vadd.f32 %v5614_v62, %v5607_v27  ;;  %v5617_v43 = vadd.f32 %v5614_v62, %v5608_v37  ;;  %v5618_v4 = vadd.f32 %v5614_v62, %v5609_v56  ;;  %v5619_v10 = vadd.f32 %v5614_v62, %v5610_v46 }
 0x7e4   :  { %vm5620_vm0 = vcmp.ge.f32.partialorder %v5616_v58, 0.0  ;;  %vm5621_vm1 = vcmp.ge.f32.partialorder %v5617_v43, 0.0  ;;  %vm5622_vm2 = vcmp.ge.f32.partialorder %v5618_v4, 0.0  ;;  %vm5623_vm3 = vcmp.ge.f32.partialorder %v5619_v10, 0.0 }
 0x7e5   :  { %v5624_v18 = vmul.f32 0.01, %v5616_v58  ;;  %v5625_v13 = vmul.f32 0.01, %v5617_v43  ;;  %v5626_v1 = vmul.f32 0.01, %v5618_v4 }
 0x7e6   :  { %v5627_v20 = vmul.f32 0.01, %v5619_v10 }
 0x7e7   :  { %v5628_v5 = vsel %vm5620_vm0, %v5616_v58, %v5624_v18  ;;  %v5629_v60 = vsel %vm5621_vm1, %v5617_v43, %v5625_v13  ;;  %v5630_v52 = vsel %vm5622_vm2, %v5618_v4, %v5626_v1 }
 0x7e8   :  { %v5631_v41 = vsel %vm5623_vm3, %v5619_v10, %v5627_v20  ;;  %v5636_v42 = vcombine.low %v5628_v5, %v5629_v60 }
 0x7e9   :  { %v5637_v54 = vcombine.low %v5630_v52, %v5631_v41 }
 0x7ea   :  { %v5644_v50 = vrot.slane %v5636_v42, %v6010_v49 }
 0x7eb   :  { %v5651_v44 = vrot.slane %v5637_v54, %v6010_v49 }
 0x7ed   :  { %v5652_v45 = vcombine.low %v5644_v50, %v5651_v44 }
 0x7ef   :  { %5654 = vst [vmem:[%s7040_s15] sm:$0xff] %v5652_v45 }

</bundles_post_ra>
